<compile_context>
chip_gen: v6e
topology: v6e:2x2x1
jax: 0.10.0
libtpu: 0.0.40
codegen_flags: <defaults>
</compile_context>

<pallas_src>
import functools

import jax
import jax.numpy as jnp
from jax.experimental import pallas as pl
from jax.experimental.pallas import tpu as pltpu


def _round_up(x, m):
    return (x + m - 1) // m * m


def _vmem_capacity_bytes():
    try:
        return int(pltpu.get_tpu_info().vmem_capacity_bytes)
    except Exception:
        return 64 << 20  # smallest per-TC VMEM (v7x); safe on every chip


def _record_mlp_kernel(x_ref, w1_ref, b1_ref, w2_ref, b2_ref, y_ref, kept_ref,
                       *, precision):
    # fc1 on the MXU with f32 accumulation; bias + ReLU stay in f32 (cheap on
    # all chips, required for the no-bf16-VPU v5e path).
    h = jnp.dot(x_ref[...], w1_ref[...],
                preferred_element_type=jnp.float32, precision=precision)
    h = jnp.maximum(h + b1_ref[...].astype(jnp.float32), 0.0)

    # Single downcast of h, reused for both the recorded copy and the fc2
    # matmul (saves one (tm x hidden_p) VPU cast per grid step when dtypes
    # match, which they do in the default configuration).
    h_c = h.astype(w2_ref.dtype)

    # RecordInputs hook on "fc2": record (clone) the input of fc2.
    kept_ref[...] = h_c.astype(kept_ref.dtype)

    # fc2: f32 accumulation on the MXU, cast only at the store.
    y = jnp.dot(h_c, w2_ref[...],
                preferred_element_type=jnp.float32, precision=precision)
    y_ref[...] = (y + b2_ref[...].astype(jnp.float32)).astype(y_ref.dtype)


def prepare_params(w1, b1, w2, b2):
    """Lane-pad weights/biases ONCE, outside the per-call forward.

    hidden / d_out are padded to multiples of 128 so the kept/y stores are
    lane-dense, unmasked vst. d_in (the fc1 contraction dim) is left unpadded:
    the x / W1 blocks cover the full array dim, so the (8,128) block rule is
    still satisfied and x streams from HBM without padding traffic.
    """
    d_in, hidden = w1.shape
    hidden_w2, d_out = w2.shape
    assert hidden_w2 == hidden
    hidden_p = _round_up(hidden, 128)
    d_out_p = _round_up(d_out, 128)
    w1p = jnp.pad(w1, ((0, 0), (0, hidden_p - hidden)))
    b1p = jnp.pad(jnp.reshape(b1, (1, -1)), ((0, 0), (0, hidden_p - hidden)))
    w2p = jnp.pad(w2, ((0, hidden_p - hidden), (0, d_out_p - d_out)))
    b2p = jnp.pad(jnp.reshape(b2, (1, -1)), ((0, 0), (0, d_out_p - d_out)))
    return (w1p, b1p, w2p, b2p), (d_in, hidden, d_out)


@functools.partial(
    jax.jit,
    static_argnames=("hidden", "d_out", "tm", "vmem_cap",
                     "single_buffer_weights", "out_dtype_name"))
def _forward_impl(x, w1p, b1p, w2p, b2p, *, hidden, d_out, tm, vmem_cap,
                  single_buffer_weights, out_dtype_name):
    batch, d_in = x.shape
    hidden_p = w1p.shape[1]
    d_out_p = w2p.shape[1]
    out_dtype = jnp.dtype(out_dtype_name)

    # Pad batch to a multiple of 8 only (<= 7 wasted rows). Note: padded rows
    # are NOT zero after fc1 (relu(b1) may be > 0); they are sliced away below.
    batch_p = _round_up(batch, 8)
    assert batch_p % tm == 0
    grid_m = batch_p // tm
    xp = x if batch_p == batch else jnp.pad(x, ((0, batch_p - batch), (0, 0)))

    # VMEM budget: double-buffered activation/output streams + (single- or
    # double-buffered) resident weights + headroom for Mosaic internal scratch,
    # clamped to ~85% of this chip's physical VMEM.
    act_b = x.dtype.itemsize
    out_b = out_dtype.itemsize
    w_b = w1p.dtype.itemsize
    w_bufs = 1 if single_buffer_weights else 2
    vmem_est = (2 * tm * d_in * act_b
                + 2 * tm * (hidden_p + d_out_p) * out_b
                + w_bufs * (d_in * hidden_p + hidden_p * d_out_p
                            + hidden_p + d_out_p) * w_b)
    vmem_limit = int(min(max(vmem_est + (4 << 20), 16 << 20),
                         int(0.85 * vmem_cap)))

    # f32 inputs: HIGHEST precision on the MXU for parity with an f32
    # reference. bf16 inputs already hit the exact bf16 MXU path.
    precision = (jax.lax.Precision.HIGHEST
                 if x.dtype == jnp.float32 else jax.lax.Precision.DEFAULT)

    weight_pm = pl.Buffered(1) if single_buffer_weights else None

    def resident(shape):
        # Constant index_map: the block never changes, so it never needs
        # double-buffering.
        if weight_pm is None:
            return pl.BlockSpec(shape, lambda i: (0, 0))
        return pl.BlockSpec(shape, lambda i: (0, 0), pipeline_mode=weight_pm)

    flops = 2 * batch_p * (d_in * hidden_p + hidden_p * d_out_p)
    bytes_accessed = (batch_p * d_in * act_b
                      + (d_in * hidden_p + hidden_p * d_out_p
                         + hidden_p + d_out_p) * w_b
                      + batch_p * (hidden_p + d_out_p) * out_b)

    y_p, kept_p = pl.pallas_call(
        functools.partial(_record_mlp_kernel, precision=precision),
        grid=(grid_m,),
        in_specs=[
            pl.BlockSpec((tm, d_in), lambda i: (i, 0)),      # x: streamed
            resident((d_in, hidden_p)),                      # W1: resident
            resident((1, hidden_p)),                         # b1: resident
            resident((hidden_p, d_out_p)),                   # W2: resident
            resident((1, d_out_p)),                          # b2: resident
        ],
        out_specs=(
            pl.BlockSpec((tm, d_out_p), lambda i: (i, 0)),   # y
            pl.BlockSpec((tm, hidden_p), lambda i: (i, 0)),  # kept["fc2"]
        ),
        out_shape=(
            jax.ShapeDtypeStruct((batch_p, d_out_p), out_dtype),
            jax.ShapeDtypeStruct((batch_p, hidden_p), out_dtype),
        ),
        compiler_params=pltpu.CompilerParams(
            dimension_semantics=("parallel",),   # batch tiles across TCs (v7x)
            vmem_limit_bytes=vmem_limit,
        ),
        cost_estimate=pl.CostEstimate(
            flops=flops, transcendentals=0, bytes_accessed=bytes_accessed),
    )(xp, w1p, b1p, w2p, b2p)

    # Slice back to logical shapes only when actually padded (skips an extra
    # HBM round trip for aligned shapes).
    y = y_p if (batch_p == batch and d_out_p == d_out) else y_p[:batch, :d_out]
    kept = (kept_p if (batch_p == batch and hidden_p == hidden)
            else kept_p[:batch, :hidden])
    return y, kept


_SINGLE_BUFFER_OK = None  # lazily probed: does this build accept pl.Buffered(1)?


def record_inputs_forward(x, padded_params, logical_dims, *, tile_m=None,
                          out_dtype=None):
    """Returns (model_output, kept_fc2_input) — mirrors RecordInputs(model).forward."""
    global _SINGLE_BUFFER_OK
    w1p, b1p, w2p, b2p = padded_params
    d_in, hidden, d_out = logical_dims
    batch = x.shape[0]
    assert x.shape[1] == d_in

    vmem_cap = _vmem_capacity_bytes()
    if tile_m is None:
        # 128 MiB parts (v5e/v6e) can afford bigger batch tiles than v7x (64 MiB).
        tile_m = 1024 if vmem_cap >= (100 << 20) else 512

    # Batch tile: largest multiple-of-8 divisor of round_up(batch, 8) that is
    # <= tile_m, so batch is padded by at most 7 rows (never to a full tile).
    batch_p = _round_up(batch, 8)
    tm = 8
    for cand in range(8, min(tile_m, batch_p) + 1, 8):
        if batch_p % cand == 0:
            tm = cand

    out_dtype_name = jnp.dtype(out_dtype if out_dtype is not None
                               else x.dtype).name
    kwargs = dict(hidden=hidden, d_out=d_out, tm=tm, vmem_cap=vmem_cap,
                  out_dtype_name=out_dtype_name)

    if _SINGLE_BUFFER_OK is None:
        try:
            out = _forward_impl(x, w1p, b1p, w2p, b2p,
                                single_buffer_weights=True, **kwargs)
            jax.block_until_ready(out)
            _SINGLE_BUFFER_OK = True
            return out
        except Exception:
            _SINGLE_BUFFER_OK = False  # fall back to default double-buffering
    return _forward_impl(x, w1p, b1p, w2p, b2p,
                         single_buffer_weights=_SINGLE_BUFFER_OK, **kwargs)


class RecordInputsMLP:
    """Pallas analogue of RecordInputs(model, keep=["fc2"]) for a 2-layer MLP.

    The fc2-input recording hook is fused into the same kernel as the forward
    pass; the recorded tensor is exposed via self.kept["fc2"] after forward().
    Note: when inputs/weights are bf16, kept["fc2"] is stored in out_dtype
    (default: input dtype) — an extra quantization point vs torch's clone().
    """

    def __init__(self, w1, b1, w2, b2, keep=("fc2",)):
        self.kept = {name: None for name in keep if name == "fc2"}
        assert len(self.kept) > 0  # mirrors the assert in RecordInputs.__init__
        self._params, self._dims = prepare_params(w1, b1, w2, b2)

    def forward(self, inputs, *, tile_m=None, out_dtype=None):
        y, kept_fc2 = record_inputs_forward(inputs, self._params, self._dims,
                                            tile_m=tile_m, out_dtype=out_dtype)
        self.kept["fc2"] = kept_fc2
        return y


def init_params(key, d_in, hidden, d_out, dtype=jnp.float32):
    """Deterministic synthetic parameters (torch Linear shapes, pre-transposed)."""
    k1, k2, k3, k4 = jax.random.split(key, 4)
    w1 = jax.random.normal(k1, (d_in, hidden), dtype) * (1.0 / jnp.sqrt(d_in))
    b1 = jax.random.normal(k2, (1, hidden), dtype) * 0.01
    w2 = jax.random.normal(k3, (hidden, d_out), dtype) * (1.0 / jnp.sqrt(hidden))
    b2 = jax.random.normal(k4, (1, d_out), dtype) * 0.01
    return w1, b1, w2, b2


if __name__ == "__main__":
    key = jax.random.PRNGKey(0)
    kx, kp = jax.random.split(key)

    # Small shapes consistent with the synthetic wrapped model; batch large
    # enough that the grid actually tiles (tile_m=128 -> grid=(2,)).
    batch, d_in, hidden, d_out = 256, 32, 64, 16
    x = jax.random.normal(kx, (batch, d_in), jnp.float32)
    w1, b1, w2, b2 = init_params(kp, d_in, hidden, d_out)

    # ---- f32 path (in-kernel MXU precision=HIGHEST): strict correctness ----
    model = RecordInputsMLP(w1, b1, w2, b2, keep=("fc2",))
    y = model.forward(x, tile_m=128)
    kept_fc2 = model.kept["fc2"]
    jax.block_until_ready((y, kept_fc2))

    hi = jax.lax.Precision.HIGHEST
    h_ref = jnp.maximum(jnp.dot(x, w1, precision=hi) + b1, 0.0)
    y_ref = jnp.dot(h_ref, w2, precision=hi) + b2
    assert jnp.allclose(kept_fc2, h_ref, atol=1e-5, rtol=1e-5)
    assert jnp.allclose(y, y_ref, atol=1e-5, rtol=1e-5)
    assert len(model.kept) > 0  # mirrors the assert in RecordInputs.__init__

    # ---- bf16 path: the HBM-halving configuration for v6e/v7x (and the
    # ---- preferred v5e path, since kept writeback dominates there) --------
    xb = x.astype(jnp.bfloat16)
    w1b, b1b, w2b, b2b = (t.astype(jnp.bfloat16) for t in (w1, b1, w2, b2))
    model_b = RecordInputsMLP(w1b, b1b, w2b, b2b)
    yb = model_b.forward(xb, tile_m=128)
    keptb = model_b.kept["fc2"]
    jax.block_until_ready((yb, keptb))

    # Reference mirrors the kernel's quantization points (bf16 storage,
    # f32 accumulation / epilogue).
    xf, w1f, b1f, w2f, b2f = (t.astype(jnp.float32)
                              for t in (xb, w1b, b1b, w2b, b2b))
    hf = jnp.maximum(xf @ w1f + b1f, 0.0)
    yf = hf.astype(jnp.bfloat16).astype(jnp.float32) @ w2f + b2f
    assert jnp.allclose(keptb.astype(jnp.float32), hf, atol=5e-2, rtol=5e-2)
    assert jnp.allclose(yb.astype(jnp.float32), yf, atol=5e-2, rtol=5e-2)

    print("KERNEL_OK")
</pallas_src>

<mosaic_0001>
module attributes {stable_mosaic.version = 11 : i64} {
  func.func @_record_mlp_kernel(%arg0: i32, %arg1: memref<128x32xf32, #tpu.memory_space<vmem>>, %arg2: memref<32x128xf32, #tpu.memory_space<vmem>>, %arg3: memref<1x128xf32, #tpu.memory_space<vmem>>, %arg4: memref<128x128xf32, #tpu.memory_space<vmem>>, %arg5: memref<1x128xf32, #tpu.memory_space<vmem>>, %arg6: memref<128x128xf32, #tpu.memory_space<vmem>>, %arg7: memref<128x128xf32, #tpu.memory_space<vmem>>) attributes {dimension_semantics = [#tpu.dimension_semantics<parallel>], iteration_bounds = array<i64: 2>, scalar_prefetch = 0 : i64, scratch_operands = 0 : i64, tpu.core_type = #tpu.core_type<tc>, window_params = [{transform_indices = @transform_0, window_bounds = array<i64: 128, 32>}, {pipeline_mode = #tpu.pipeline_mode<synchronous>, transform_indices = @transform_1, window_bounds = array<i64: 32, 128>}, {pipeline_mode = #tpu.pipeline_mode<synchronous>, transform_indices = @transform_2, window_bounds = array<i64: 1, 128>}, {pipeline_mode = #tpu.pipeline_mode<synchronous>, transform_indices = @transform_3, window_bounds = array<i64: 128, 128>}, {pipeline_mode = #tpu.pipeline_mode<synchronous>, transform_indices = @transform_4, window_bounds = array<i64: 1, 128>}, {transform_indices = @transform_5, window_bounds = array<i64: 128, 128>}, {transform_indices = @transform_6, window_bounds = array<i64: 128, 128>}]} {
    %c0 = arith.constant 0 : index
    %c0_0 = arith.constant 0 : index
    %0 = vector.load %arg1[%c0, %c0_0] : memref<128x32xf32, #tpu.memory_space<vmem>>, vector<128x32xf32>
    %c0_1 = arith.constant 0 : index
    %c0_2 = arith.constant 0 : index
    %1 = vector.load %arg2[%c0_1, %c0_2] : memref<32x128xf32, #tpu.memory_space<vmem>>, vector<32x128xf32>
    %cst = arith.constant dense<0.000000e+00> : vector<128x128xf32>
    %2 = tpu.matmul %0, %1, %cst {dimension_numbers = #tpu.dot_dimension_numbers<[1], [0], [0], [1], [0, 0, 1, 1], [], []>, precision = #tpu.contract_precision<fp32>} : vector<128x32xf32>, vector<32x128xf32>, vector<128x128xf32> -> vector<128x128xf32>
    %c0_3 = arith.constant 0 : index
    %c0_4 = arith.constant 0 : index
    %3 = vector.load %arg3[%c0_3, %c0_4] : memref<1x128xf32, #tpu.memory_space<vmem>>, vector<1x128xf32>
    %4 = vector.broadcast %3 : vector<1x128xf32> to vector<128x128xf32>
    %5 = arith.addf %2, %4 : vector<128x128xf32>
    %cst_5 = arith.constant 0.000000e+00 : f32
    %6 = vector.broadcast %cst_5 : f32 to vector<128x128xf32>
    %7 = arith.maximumf %5, %6 : vector<128x128xf32>
    %c0_6 = arith.constant 0 : index
    %c0_7 = arith.constant 0 : index
    %8 = vector.load %arg7[%c0_6, %c0_7] : memref<128x128xf32, #tpu.memory_space<vmem>>, vector<128x128xf32>
    tpu.vector_store %arg7[%c0_6, %c0_7], %7 {strides = array<i32>} : memref<128x128xf32, #tpu.memory_space<vmem>>, vector<128x128xf32>,
    %c0_8 = arith.constant 0 : index
    %c0_9 = arith.constant 0 : index
    %9 = vector.load %arg4[%c0_8, %c0_9] : memref<128x128xf32, #tpu.memory_space<vmem>>, vector<128x128xf32>
    %cst_10 = arith.constant dense<0.000000e+00> : vector<128x128xf32>
    %10 = tpu.matmul %7, %9, %cst_10 {dimension_numbers = #tpu.dot_dimension_numbers<[1], [0], [0], [1], [0, 0, 1, 1], [], []>, precision = #tpu.contract_precision<fp32>} : vector<128x128xf32>, vector<128x128xf32>, vector<128x128xf32> -> vector<128x128xf32>
    %c0_11 = arith.constant 0 : index
    %c0_12 = arith.constant 0 : index
    %11 = vector.load %arg5[%c0_11, %c0_12] : memref<1x128xf32, #tpu.memory_space<vmem>>, vector<1x128xf32>
    %12 = vector.broadcast %11 : vector<1x128xf32> to vector<128x128xf32>
    %13 = arith.addf %10, %12 : vector<128x128xf32>
    %c0_13 = arith.constant 0 : index
    %c0_14 = arith.constant 0 : index
    %14 = vector.load %arg6[%c0_13, %c0_14] : memref<128x128xf32, #tpu.memory_space<vmem>>, vector<128x128xf32>
    tpu.vector_store %arg6[%c0_13, %c0_14], %13 {strides = array<i32>} : memref<128x128xf32, #tpu.memory_space<vmem>>, vector<128x128xf32>,
    return
  }
  func.func @transform_0(%arg0: i32) -> (i32, i32) {
    %c0_i32 = arith.constant 0 : i32
    %c0_i32_0 = arith.constant 0 : i32
    return %arg0, %c0_i32 : i32, i32
  }
  func.func @transform_1(%arg0: i32) -> (i32, i32) {
    %c0_i32 = arith.constant 0 : i32
    %c0_i32_0 = arith.constant 0 : i32
    %c0_i32_1 = arith.constant 0 : i32
    return %c0_i32, %c0_i32_0 : i32, i32
  }
  func.func @transform_2(%arg0: i32) -> (i32, i32) {
    %c0_i32 = arith.constant 0 : i32
    %c0_i32_0 = arith.constant 0 : i32
    %c0_i32_1 = arith.constant 0 : i32
    return %c0_i32, %c0_i32_0 : i32, i32
  }
  func.func @transform_3(%arg0: i32) -> (i32, i32) {
    %c0_i32 = arith.constant 0 : i32
    %c0_i32_0 = arith.constant 0 : i32
    %c0_i32_1 = arith.constant 0 : i32
    return %c0_i32, %c0_i32_0 : i32, i32
  }
  func.func @transform_4(%arg0: i32) -> (i32, i32) {
    %c0_i32 = arith.constant 0 : i32
    %c0_i32_0 = arith.constant 0 : i32
    %c0_i32_1 = arith.constant 0 : i32
    return %c0_i32, %c0_i32_0 : i32, i32
  }
  func.func @transform_5(%arg0: i32) -> (i32, i32) {
    %c0_i32 = arith.constant 0 : i32
    %c0_i32_0 = arith.constant 0 : i32
    return %arg0, %c0_i32 : i32, i32
  }
  func.func @transform_6(%arg0: i32) -> (i32, i32) {
    %c0_i32 = arith.constant 0 : i32
    %c0_i32_0 = arith.constant 0 : i32
    return %arg0, %c0_i32 : i32, i32
  }
}

module attributes {stable_mosaic.version = 11 : i64} {
  func.func @_record_mlp_kernel(%arg0: i32, %arg1: memref<128x32xf32, #tpu.memory_space<vmem>>, %arg2: memref<32x128xf32, #tpu.memory_space<vmem>>, %arg3: memref<1x128xf32, #tpu.memory_space<vmem>>, %arg4: memref<128x128xf32, #tpu.memory_space<vmem>>, %arg5: memref<1x128xf32, #tpu.memory_space<vmem>>, %arg6: memref<128x128xf32, #tpu.memory_space<vmem>>, %arg7: memref<128x128xf32, #tpu.memory_space<vmem>>) attributes {dimension_semantics = [#tpu.dimension_semantics<parallel>], iteration_bounds = array<i64: 2>, scalar_prefetch = 0 : i64, scratch_operands = 0 : i64, tpu.core_type = #tpu.core_type<tc>, window_params = [{transform_indices = @transform_0, window_bounds = array<i64: 128, 32>}, {pipeline_mode = #tpu.pipeline_mode<synchronous>, transform_indices = @transform_1, window_bounds = array<i64: 32, 128>}, {pipeline_mode = #tpu.pipeline_mode<synchronous>, transform_indices = @transform_2, window_bounds = array<i64: 1, 128>}, {pipeline_mode = #tpu.pipeline_mode<synchronous>, transform_indices = @transform_3, window_bounds = array<i64: 128, 128>}, {pipeline_mode = #tpu.pipeline_mode<synchronous>, transform_indices = @transform_4, window_bounds = array<i64: 1, 128>}, {transform_indices = @transform_5, window_bounds = array<i64: 128, 128>}, {transform_indices = @transform_6, window_bounds = array<i64: 128, 128>}]} {
    %c0 = arith.constant 0 : index
    %c0_0 = arith.constant 0 : index
    %0 = vector.load %arg1[%c0, %c0_0] : memref<128x32xf32, #tpu.memory_space<vmem>>, vector<128x32xf32>
    %c0_1 = arith.constant 0 : index
    %c0_2 = arith.constant 0 : index
    %1 = vector.load %arg2[%c0_1, %c0_2] : memref<32x128xf32, #tpu.memory_space<vmem>>, vector<32x128xf32>
    %cst = arith.constant dense<0.000000e+00> : vector<128x128xf32>
    %2 = tpu.matmul %0, %1, %cst {dimension_numbers = #tpu.dot_dimension_numbers<[1], [0], [0], [1], [0, 0, 1, 1], [], []>, precision = #tpu.contract_precision<fp32>} : vector<128x32xf32>, vector<32x128xf32>, vector<128x128xf32> -> vector<128x128xf32>
    %c0_3 = arith.constant 0 : index
    %c0_4 = arith.constant 0 : index
    %3 = vector.load %arg3[%c0_3, %c0_4] : memref<1x128xf32, #tpu.memory_space<vmem>>, vector<1x128xf32>
    %4 = vector.broadcast %3 : vector<1x128xf32> to vector<128x128xf32>
    %5 = arith.addf %2, %4 : vector<128x128xf32>
    %cst_5 = arith.constant 0.000000e+00 : f32
    %6 = vector.broadcast %cst_5 : f32 to vector<128x128xf32>
    %7 = arith.maximumf %5, %6 : vector<128x128xf32>
    %c0_6 = arith.constant 0 : index
    %c0_7 = arith.constant 0 : index
    %8 = vector.load %arg7[%c0_6, %c0_7] : memref<128x128xf32, #tpu.memory_space<vmem>>, vector<128x128xf32>
    tpu.vector_store %arg7[%c0_6, %c0_7], %7 {strides = array<i32>} : memref<128x128xf32, #tpu.memory_space<vmem>>, vector<128x128xf32>,
    %c0_8 = arith.constant 0 : index
    %c0_9 = arith.constant 0 : index
    %9 = vector.load %arg4[%c0_8, %c0_9] : memref<128x128xf32, #tpu.memory_space<vmem>>, vector<128x128xf32>
    %cst_10 = arith.constant dense<0.000000e+00> : vector<128x128xf32>
    %10 = tpu.matmul %7, %9, %cst_10 {dimension_numbers = #tpu.dot_dimension_numbers<[1], [0], [0], [1], [0, 0, 1, 1], [], []>, precision = #tpu.contract_precision<fp32>} : vector<128x128xf32>, vector<128x128xf32>, vector<128x128xf32> -> vector<128x128xf32>
    %c0_11 = arith.constant 0 : index
    %c0_12 = arith.constant 0 : index
    %11 = vector.load %arg5[%c0_11, %c0_12] : memref<1x128xf32, #tpu.memory_space<vmem>>, vector<1x128xf32>
    %12 = vector.broadcast %11 : vector<1x128xf32> to vector<128x128xf32>
    %13 = arith.addf %10, %12 : vector<128x128xf32>
    %c0_13 = arith.constant 0 : index
    %c0_14 = arith.constant 0 : index
    %14 = vector.load %arg6[%c0_13, %c0_14] : memref<128x128xf32, #tpu.memory_space<vmem>>, vector<128x128xf32>
    tpu.vector_store %arg6[%c0_13, %c0_14], %13 {strides = array<i32>} : memref<128x128xf32, #tpu.memory_space<vmem>>, vector<128x128xf32>,
    return
  }
  func.func @transform_0(%arg0: i32) -> (i32, i32) {
    %c0_i32 = arith.constant 0 : i32
    %c0_i32_0 = arith.constant 0 : i32
    return %arg0, %c0_i32 : i32, i32
  }
  func.func @transform_1(%arg0: i32) -> (i32, i32) {
    %c0_i32 = arith.constant 0 : i32
    %c0_i32_0 = arith.constant 0 : i32
    %c0_i32_1 = arith.constant 0 : i32
    return %c0_i32, %c0_i32_0 : i32, i32
  }
  func.func @transform_2(%arg0: i32) -> (i32, i32) {
    %c0_i32 = arith.constant 0 : i32
    %c0_i32_0 = arith.constant 0 : i32
    %c0_i32_1 = arith.constant 0 : i32
    return %c0_i32, %c0_i32_0 : i32, i32
  }
  func.func @transform_3(%arg0: i32) -> (i32, i32) {
    %c0_i32 = arith.constant 0 : i32
    %c0_i32_0 = arith.constant 0 : i32
    %c0_i32_1 = arith.constant 0 : i32
    return %c0_i32, %c0_i32_0 : i32, i32
  }
  func.func @transform_4(%arg0: i32) -> (i32, i32) {
    %c0_i32 = arith.constant 0 : i32
    %c0_i32_0 = arith.constant 0 : i32
    %c0_i32_1 = arith.constant 0 : i32
    return %c0_i32, %c0_i32_0 : i32, i32
  }
  func.func @transform_5(%arg0: i32) -> (i32, i32) {
    %c0_i32 = arith.constant 0 : i32
    %c0_i32_0 = arith.constant 0 : i32
    return %arg0, %c0_i32 : i32, i32
  }
  func.func @transform_6(%arg0: i32) -> (i32, i32) {
    %c0_i32 = arith.constant 0 : i32
    %c0_i32_0 = arith.constant 0 : i32
    return %arg0, %c0_i32 : i32, i32
  }
}

</mosaic_0001>

<bundles_post_ra>
// kernel: _forward_impl.1
= control target key start
LH: loop header
LB: loop body
LE: loop exit
PB: predicated region body
PF: predicated region fallthrough
CT: control target
= control target key end

     0   :  { %s3828_s21 = smov 0   ;;  %s5191_s0 = inlined_call_operand.vmem [shape: f32[256,32], index: 0, kind: input, shape index: {}]   ;;  %s5192_s1 = inlined_call_operand.vmem [shape: f32[32,128], index: 1, kind: input, shape index: {}]   ;;  %s5193_s2 = inlined_call_operand.vmem [shape: f32[1,128], index: 2, kind: input, shape index: {}]   ;;  %s5194_s3 = inlined_call_operand.vmem [shape: f32[128,128], index: 3, kind: input, shape index: {}]   ;;  %s5195_s4 = inlined_call_operand.vmem [shape: f32[1,128], index: 4, kind: input, shape index: {}]   ;;  %s5196_s5 = inlined_call_operand.vmem [shape: f32[256,128], index: 5, kind: output, shape index: {0}]   ;;  %s5197_s6 = inlined_call_operand.vmem [shape: f32[256,128], index: 6, kind: output, shape index: {1}]  }
   0x1 LB: > { %s2922_s22 = sadd.s32 4294967295, %s3791_s21   ;;  %p2926_p0 = scmp.ge.s32.totalorder %s3791_s21, 1  ;;  %s3791_s21 = sphi %s3828_s21, %s17_s21  }
   0x2   : > { %p216_p1 = scmp.lt.s32.totalorder %s3791_s21, 3 }
   0x4   : > { %p217_p2 = pnand %p2926_p0, %p216_p1 }
   0x6   : > { %220 = sbr.rel (%p217_p2) target bundleno = 628 (0x274), region = 40 }
   0xb   : > { %v288_v0 = vld [vmem:[%s5192_s1 + $0x18] sm:$0xff]  ;;  %v287_v1 = vld [vmem:[%s5192_s1 + $0x10] sm:$0xff]  ;;  %v286_v2 = vld [vmem:[%s5192_s1 + $0x8] sm:$0xff]  ;;  %s2927_s29 = sshll.u32 %s2922_s22, 4  ;;  %vm296_vm0 = vcmask 261120  }
   0xc   : > { %v3845_v3 = vand.u32 4294901760, %v288_v0  ;;  %v3847_v4 = vand.u32 4294901760, %v287_v1  ;;  %v3849_v5 = vand.u32 4294901760, %v286_v2  ;;  %v285_v6 = vld [vmem:[%s5192_s1] sm:$0xff]  ;;  %p252_p3 = scmp.lt.s32.totalorder %s2927_s29, 31 }
   0xd   : > { %v3854_v7 = vand.u32 4294901760, %v285_v6 }
   0xe   : > { %3249 = vmatprep.subr.mxu0 %v3845_v3  ;;  %v3858_v8 = vsub.f32 %v288_v0, %v3845_v3  ;;  %v3861_v9 = vsub.f32 %v287_v1, %v3847_v4  ;;  %v3864_v10 = vsub.f32 %v286_v2, %v3849_v5  ;;  %s5448_s29 = smov (!%p252_p3, %s2927_s29), 31 }
   0xf   : > { %3250 = vmatpush3.msra.mxu0 %v3845_v3  ;;  %v3868_v11 = vsub.f32 %v285_v6, %v3854_v7  ;;  %s3880_s8 = sshll.u32 %s5448_s29, 3 }
  0x10   : > { %v3871_v12 = vand.u32 4294901760, %v3858_v8  ;;  %3251 = vmatprep.subr.mxu0 %v3847_v4  ;;  %v3875_v13 = vand.u32 4294901760, %v3861_v9  ;;  %v3878_v14 = vand.u32 4294901760, %v3864_v10  ;;  %s3890_s11 = scalar_lea.vmem %s5191_s0, %s3880_s8  ;;  %s4565_s27 = scalar_lea.vmem %s5197_s6, %s3880_s8 }
  0x11   : > { %3252 = vmatpush3.msra.mxu0 %v3847_v4  ;;  %v3884_v15 = vand.u32 4294901760, %v3868_v11  ;;  %v269_v19 = vld [vmem:[%s3890_s11] sm:$0xff]  ;;  %v270_v20 = vld [vmem:[%s3890_s11 + $0x8] sm:$0xff]  ;;  %v271_v21 = vld [vmem:[%s3890_s11 + $0x10] sm:$0xff]  ;;  %s5120_s9 = scalar_lea.vmem %s5196_s5, %s3880_s8 }
  0x12   : > { %v602_v16 = vsub.f32 %v3858_v8, %v3871_v12  ;;  %v609_v17 = vsub.f32 %v3861_v9, %v3875_v13  ;;  %3253 = vmatprep.subr.mxu0 %v3849_v5  ;;  %v616_v18 = vsub.f32 %v3864_v10, %v3878_v14  ;;  %v298_v23 = vsel %vm296_vm0, %v269_v19, 0  ;;  %v272_v26 = vld [vmem:[%s3890_s11 + $0x18] sm:$0xff]  ;;  %v273_v27 = vld [vmem:[%s3890_s11 + $0x20] sm:$0xff]  ;;  %v274_v28 = vld [vmem:[%s3890_s11 + $0x28] sm:$0xff] }
  0x13   : > { %3254 = vmatpush3.msra.mxu0 %v3849_v5  ;;  %v623_v22 = vsub.f32 %v3868_v11, %v3884_v15  ;;  %v301_v24 = vsel %vm296_vm0, %v270_v20, 0  ;;  %v304_v25 = vsel %vm296_vm0, %v271_v21, 0  ;;  %v3912_v32 = vand.u32 4294901760, %v298_v23  ;;  %v275_v37 = vld [vmem:[%s3890_s11 + $0x30] sm:$0xff]  ;;  %v276_v38 = vld [vmem:[%s3890_s11 + $0x38] sm:$0xff]  ;;  %v277_v63 = vld [vmem:[%s3890_s11 + $0x40] sm:$0xff] }
  0x14   : > { %v603_v29 = vand.u32 4294901760, %v602_v16  ;;  %v610_v30 = vand.u32 4294901760, %v609_v17  ;;  %v617_v31 = vand.u32 4294901760, %v616_v18  ;;  %3255 = vmatprep.subr.mxu0 %v3854_v7  ;;  %v3915_v34 = vand.u32 4294901760, %v301_v24  ;;  %v278_v16 = vld [vmem:[%s3890_s11 + $0x48] sm:$0xff]  ;;  %v279_v21 = vld [vmem:[%s3890_s11 + $0x50] sm:$0xff] }
  0x15   : > { %3256 = vmatpush3.msra.mxu0 %v3854_v7  ;;  %v624_v33 = vand.u32 4294901760, %v623_v22  ;;  %v3917_v35 = vand.u32 4294901760, %v304_v25  ;;  %v307_v36 = vsel %vm296_vm0, %v272_v26, 0  ;;  %v3923_v39 = vsub.f32 %v298_v23, %v3912_v32  ;;  %3289 = vmatprep.mubr.f32.mxu1 %v3912_v32  ;;  %v281_v26 = vld [vmem:[%s3890_s11 + $0x60] sm:$0xff] }
  0x16   : > { %3281 = vmatprep.subr.mxu1 %v603_v29  ;;  %v3926_v40 = vand.u32 4294901760, %v307_v36  ;;  %v310_v41 = vsel %vm296_vm0, %v273_v27, 0  ;;  %v313_v42 = vsel %vm296_vm0, %v274_v28, 0  ;;  %3313 = vmatprep.subr.mxu0 %v3858_v8  ;;  %v3932_v43 = vsub.f32 %v301_v24, %v3915_v34 }
  0x17   : > { %3282 = vmatpush3.msra.mxu1 %v603_v29  ;;  %v3935_v44 = vsub.f32 %v304_v25, %v3917_v35  ;;  %v3937_v45 = vand.u32 4294901760, %v310_v41  ;;  %v3939_v46 = vand.u32 4294901760, %v313_v42  ;;  %v416_v47 = vand.u32 4294901760, %v3923_v39  ;;  %v280_v25 = vld [vmem:[%s3890_s11 + $0x58] sm:$0xff] }
  0x18   : > { %3283 = vmatprep.subr.mxu1 %v610_v30  ;;  %v3943_v48 = vsub.f32 %v307_v36, %v3926_v40  ;;  %v316_v49 = vsel %vm296_vm0, %v275_v37, 0  ;;  %v319_v50 = vsel %vm296_vm0, %v276_v38, 0  ;;  %v426_v51 = vand.u32 4294901760, %v3932_v43  ;;  %v282_v38 = vld [vmem:[%s3890_s11 + $0x68] sm:$0xff] }
  0x19   : > { %3284 = vmatpush3.msra.mxu1 %v610_v30  ;;  %v436_v52 = vand.u32 4294901760, %v3935_v44  ;;  %v3950_v53 = vsub.f32 %v310_v41, %v3937_v45  ;;  %v3953_v54 = vsub.f32 %v313_v42, %v3939_v46  ;;  %v417_v55 = vsub.f32 %v3923_v39, %v416_v47 }
  0x1a   : > { %3285 = vmatprep.subr.mxu1 %v617_v31  ;;  %v446_v56 = vand.u32 4294901760, %v3943_v48  ;;  %v3959_v57 = vand.u32 4294901760, %v316_v49  ;;  %v3961_v58 = vand.u32 4294901760, %v319_v50  ;;  %v427_v59 = vsub.f32 %v3932_v43, %v426_v51 }
  0x1b   : > { %3286 = vmatpush3.msra.mxu1 %v617_v31  ;;  %v437_v60 = vsub.f32 %v3935_v44, %v436_v52  ;;  %v456_v61 = vand.u32 4294901760, %v3950_v53  ;;  %v466_v62 = vand.u32 4294901760, %v3953_v54  ;;  %v418_v0 = vand.u32 4294901760, %v417_v55 }
  0x1c   : > { %3287 = vmatprep.subr.mxu1 %v624_v33  ;;  %v447_v1 = vsub.f32 %v3943_v48, %v446_v56  ;;  %v3976_v2 = vsub.f32 %v316_v49, %v3959_v57  ;;  %v3979_v6 = vsub.f32 %v319_v50, %v3961_v58  ;;  %v428_v17 = vand.u32 4294901760, %v427_v59  ;;  %v283_v50 = vld [vmem:[%s3890_s11 + $0x70] sm:$0xff] }
  0x1d   : > { %3288 = vmatpush3.msra.mxu1 %v624_v33  ;;  %v438_v18 = vand.u32 4294901760, %v437_v60  ;;  %v457_v19 = vsub.f32 %v3950_v53, %v456_v61  ;;  %v467_v20 = vsub.f32 %v3953_v54, %v466_v62  ;;  %3257 = vmatprep.mubr.f32.mxu0 %v418_v0  ;;  %v322_v24 = vsel %vm296_vm0, %v277_v63, 0 }
  0x1e   : > { %3290 = vmatmul.mubr.f32.vlgmr.msra.gmra.mxu1 %v3915_v34  ;;  %v476_v22 = vand.u32 4294901760, %v3976_v2  ;;  %v486_v23 = vand.u32 4294901760, %v3979_v6  ;;  %3258 = vmatmul.mubr.f32.vlgmr.msra.gmra.mxu0 %v428_v17  ;;  %v448_v27 = vand.u32 4294901760, %v447_v1  ;;  %v3996_v29 = vand.u32 4294901760, %v322_v24 }
  0x1f   : > { %3345 = vmatprep.subr.mxu1 %v3845_v3  ;;  %v458_v28 = vand.u32 4294901760, %v457_v19  ;;  %v325_v30 = vsel %vm296_vm0, %v278_v16, 0  ;;  %3314 = vmatpush3.msra.mxu0 %v3858_v8  ;;  %v468_v31 = vand.u32 4294901760, %v467_v20  ;;  %v328_v37 = vsel %vm296_vm0, %v279_v21, 0 }
  0x20   : > { %3346 = vmatpush3.msra.mxu1 %v3845_v3  ;;  %v477_v33 = vsub.f32 %v3976_v2, %v476_v22  ;;  %v4004_v36 = vand.u32 4294901760, %v325_v30  ;;  %3260 = vmatprep.mubr.f32.mxu0 %v438_v18  ;;  %v4010_v41 = vsub.f32 %v322_v24, %v3996_v29  ;;  %v4012_v42 = vand.u32 4294901760, %v328_v37  ;;  %v284_v18 = vld [vmem:[%s3890_s11 + $0x78] sm:$0xff] }
  0x21   : > { %3292 = vmatprep.mubr.f32.mxu1 %v3917_v35  ;;  %v331_v8 = vsel %vm296_vm0, %v280_v25, 0  ;;  %v334_v49 = vsel %vm296_vm0, %v281_v26, 0  ;;  %3315 = vmatprep.subr.mxu0 %v3861_v9  ;;  %v487_v59 = vsub.f32 %v3979_v6, %v486_v23  ;;  %v337_v17 = vsel %vm296_vm0, %v282_v38, 0 }
  0x22   : > { %3293 = vmatmul.mubr.f32.gmra.mxu1 %v3926_v40  ;;  %v478_v55 = vand.u32 4294901760, %v477_v33  ;;  %v4023_v60 = vsub.f32 %v325_v30, %v4004_v36  ;;  %v4025_v63 = vand.u32 4294901760, %v331_v8  ;;  %3261 = vmatmul.mubr.f32.gmra.mxu0 %v448_v27  ;;  %v496_v0 = vand.u32 4294901760, %v4010_v41 }
  0x23   : > { %3295 = vmatprep.mubr.f32.mxu1 %v3937_v45  ;;  %v4030_v1 = vsub.f32 %v328_v37, %v4012_v42  ;;  %v4032_v16 = vand.u32 4294901760, %v334_v49  ;;  %3263 = vmatprep.mubr.f32.mxu0 %v458_v28  ;;  %v4041_v21 = vand.u32 4294901760, %v337_v17  ;;  %v340_v24 = vsel %vm296_vm0, %v283_v50, 0 }
  0x24   : > { %3316 = vmatpush3.msra.mxu0 %v3861_v9  ;;  %v506_v19 = vand.u32 4294901760, %v4023_v60  ;;  %v4039_v20 = vsub.f32 %v331_v8, %v4025_v63  ;;  %3347 = vmatprep.subr.mxu1 %v3847_v4  ;;  %v497_v25 = vsub.f32 %v4010_v41, %v496_v0  ;;  %v4053_v27 = vand.u32 4294901760, %v340_v24 }
  0x25   : > { %3317 = vmatprep.subr.mxu0 %v3864_v10  ;;  %v516_v26 = vand.u32 4294901760, %v4030_v1  ;;  %v4051_v9 = vsub.f32 %v334_v49, %v4032_v16  ;;  %v488_v28 = vand.u32 4294901760, %v487_v59  ;;  %v343_v30 = vsel %vm296_vm0, %v284_v18, 0  ;;  %3348 = vmatpush3.msra.mxu1 %v3847_v4 }
  0x26   : > { %3296 = vmatmul.mubr.f32.gmra.mxu1 %v3939_v46  ;;  %3318 = vmatpush3.msra.mxu0 %v3864_v10  ;;  %v498_v33 = vand.u32 4294901760, %v497_v25  ;;  %v507_v37 = vsub.f32 %v4023_v60, %v506_v19  ;;  %v526_v38 = vand.u32 4294901760, %v4039_v20  ;;  %v4064_v8 = vsub.f32 %v337_v17, %v4041_v21 }
  0x27   : > { %3264 = vmatmul.mubr.f32.gmra.mxu0 %v468_v31  ;;  %3298 = vmatprep.mubr.f32.mxu1 %v3959_v57  ;;  %v517_v10 = vsub.f32 %v4030_v1, %v516_v26  ;;  %v536_v31 = vand.u32 4294901760, %v4051_v9  ;;  %v4072_v49 = vsub.f32 %v340_v24, %v4053_v27  ;;  %v4074_v50 = vand.u32 4294901760, %v343_v30 }
  0x28   : > { %3266 = vmatprep.mubr.f32.mxu0 %v478_v55  ;;  %3349 = vmatprep.subr.mxu1 %v3849_v5  ;;  %v508_v55 = vand.u32 4294901760, %v507_v37  ;;  %v527_v59 = vsub.f32 %v4039_v20, %v526_v38  ;;  %v546_v17 = vand.u32 4294901760, %v4064_v8 }
  0x29   : > { %3319 = vmatprep.subr.mxu0 %v3868_v11  ;;  %v4086_v18 = vsub.f32 %v343_v30, %v4074_v50  ;;  %3350 = vmatpush3.msra.mxu1 %v3849_v5  ;;  %v518_v24 = vand.u32 4294901760, %v517_v10  ;;  %v556_v25 = vand.u32 4294901760, %v4072_v49 }
  0x2a   : > { %3299 = vmatmul.mubr.f32.gmra.mxu1 %v3961_v58  ;;  %3320 = vmatpush3.msra.mxu0 %v3868_v11  ;;  %v537_v11 = vsub.f32 %v4051_v9, %v536_v31  ;;  %v547_v30 = vsub.f32 %v4064_v8, %v546_v17 }
  0x2b   : > { %3267 = vmatmul.mubr.f32.gmra.mxu0 %v488_v28  ;;  %3301 = vmatprep.mubr.f32.mxu1 %v3996_v29  ;;  %v528_v28 = vand.u32 4294901760, %v527_v59  ;;  %v557_v10 = vsub.f32 %v4072_v49, %v556_v25 }
  0x2c   : > { %3269 = vmatprep.mubr.f32.mxu0 %v498_v33  ;;  %3351 = vmatprep.subr.mxu1 %v3854_v7  ;;  %v566_v33 = vand.u32 4294901760, %v4086_v18  ;;  %v538_v37 = vand.u32 4294901760, %v537_v11 }
  0x2d   : > { %3377 = vmatprep.subr.mxu0 %v3871_v12  ;;  %3352 = vmatpush3.msra.mxu1 %v3854_v7 }
  0x2e   : > { %3302 = vmatmul.mubr.f32.gmra.mxu1 %v4004_v36  ;;  %3409 = vmatprep.subr.mxu1 %v3845_v3  ;;  %v567_v59 = vsub.f32 %v4086_v18, %v566_v33 }
  0x2f   : > { %3270 = vmatmul.mubr.f32.gmra.mxu0 %v508_v55  ;;  %3304 = vmatprep.mubr.f32.mxu1 %v4012_v42  ;;  %v548_v55 = vand.u32 4294901760, %v547_v30  ;;  %v1511_v30 = vld [vmem:[%s5194_s3 + $0x20] sm:$0xff] }
  0x30   : > { %3272 = vmatprep.mubr.f32.mxu0 %v518_v24  ;;  %v558_v24 = vand.u32 4294901760, %v557_v10  ;;  %v568_v11 = vand.u32 4294901760, %v567_v59 }
  0x32   : > { %3305 = vmatmul.mubr.f32.gmra.mxu1 %v4025_v63 }
  0x33   : > { %3273 = vmatmul.mubr.f32.gmra.mxu0 %v528_v28  ;;  %3307 = vmatprep.mubr.f32.mxu1 %v4032_v16 }
  0x34   : > { %3275 = vmatprep.mubr.f32.mxu0 %v538_v37 }
  0x36   : > { %3308 = vmatmul.mubr.f32.gmra.mxu1 %v4041_v21 }
  0x37   : > { %3276 = vmatmul.mubr.f32.gmra.mxu0 %v548_v55  ;;  %3310 = vmatprep.mubr.f32.mxu1 %v4053_v27  ;;  %v4363_v55 = vand.u32 4294901760, %v1511_v30 }
  0x38   : > { %3278 = vmatprep.mubr.f32.mxu0 %v558_v24  ;;  %v1510_v24 = vld [vmem:[%s5194_s3 + $0x18] sm:$0xff] }
  0x39   : > { %5332 = vst [vmem:[#allocation33_spill] sm:$0xff] %v4363_v55 }
  0x3a   : > { %3311 = vmatmul.mubr.f32.gmra.mxu1 %v4074_v50 }
  0x3b   : > { %3279 = vmatmul.mubr.f32.gmra.mxu0 %v568_v11  ;;  %3353 = vmatprep.mubr.f32.mxu1 %v416_v47 }
  0x3c   : > { %3321 = vmatprep.mubr.f32.mxu0 %v3923_v39 }
  0x3e   : > { %3354 = vmatmul.mubr.f32.vlgmr.msra.gmra.mxu1 %v426_v51 }
  0x3f   : > { %3322 = vmatmul.mubr.f32.vlgmr.msra.gmra.mxu0 %v3932_v43  ;;  %3410 = vmatpush3.msra.mxu1 %v3845_v3  ;;  %v1522_v3 = vld [vmem:[%s5194_s3 + $0x78] sm:$0xff] }
  0x40   : > { %3378 = vmatpush3.msra.mxu0 %v3871_v12  ;;  %3324 = vmatprep.mubr.f32.mxu0 %v3935_v44  ;;  %v1518_v44 = vld [vmem:[%s5194_s3 + $0x58] sm:$0xff] }
  0x41   : > { %3356 = vmatprep.mubr.f32.mxu1 %v436_v52  ;;  %3379 = vmatprep.subr.mxu0 %v3875_v13  ;;  %v4263_v51 = vand.u32 4294901760, %v1518_v44  ;;  %v1517_v52 = vld [vmem:[%s5194_s3 + $0x50] sm:$0xff] }
  0x42   : > { %3357 = vmatmul.mubr.f32.gmra.mxu1 %v446_v56  ;;  %3380 = vmatpush3.msra.mxu0 %v3875_v13  ;;  %v1520_v13 = vld [vmem:[%s5194_s3 + $0x68] sm:$0xff] }
  0x43   : > { %3325 = vmatmul.mubr.f32.gmra.mxu0 %v3943_v48  ;;  %3359 = vmatprep.mubr.f32.mxu1 %v456_v61  ;;  %5312 = vst [vmem:[#allocation13_spill] sm:$0xff] %v4263_v51  ;;  %v1516_v61 = vld [vmem:[%s5194_s3 + $0x48] sm:$0xff] }
  0x44   : > { %3327 = vmatprep.mubr.f32.mxu0 %v3950_v53  ;;  %3411 = vmatprep.subr.mxu1 %v3847_v4 }
  0x45   : > { %3412 = vmatpush3.msra.mxu1 %v3847_v4  ;;  %3381 = vmatprep.subr.mxu0 %v3878_v14  ;;  %v4211_v4 = vand.u32 4294901760, %v1522_v3 }
  0x46   : > { %3360 = vmatmul.mubr.f32.gmra.mxu1 %v466_v62  ;;  %3382 = vmatpush3.msra.mxu0 %v3878_v14 }
  0x47   : > { %3328 = vmatmul.mubr.f32.gmra.mxu0 %v3953_v54  ;;  %3362 = vmatprep.mubr.f32.mxu1 %v476_v22  ;;  %5301 = vst [vmem:[#allocation2_spill] sm:$0xff] %v4211_v4  ;;  %v4288_v22 = vand.u32 4294901760, %v1516_v61 }
  0x48   : > { %3330 = vmatprep.mubr.f32.mxu0 %v3976_v2  ;;  %3413 = vmatprep.subr.mxu1 %v3849_v5 }
  0x49   : > { %3414 = vmatpush3.msra.mxu1 %v3849_v5  ;;  %3383 = vmatprep.subr.mxu0 %v3884_v15  ;;  %v1521_v5 = vld [vmem:[%s5194_s3 + $0x70] sm:$0xff]  ;;  %5317 = vst [vmem:[#allocation18_spill] sm:$0xff] %v4288_v22 }
  0x4a   : > { %3363 = vmatmul.mubr.f32.gmra.mxu1 %v486_v23  ;;  %3384 = vmatpush3.msra.mxu0 %v3884_v15  ;;  %v4219_v12 = vand.u32 4294901760, %v1521_v5 }
  0x4b   : > { %3331 = vmatmul.mubr.f32.gmra.mxu0 %v3979_v6  ;;  %3365 = vmatprep.mubr.f32.mxu1 %v496_v0  ;;  %v1514_v0 = vld [vmem:[%s5194_s3 + $0x38] sm:$0xff] }
  0x4c   : > { %3333 = vmatprep.mubr.f32.mxu0 %v4010_v41  ;;  %3415 = vmatprep.subr.mxu1 %v3854_v7  ;;  %5303 = vst [vmem:[#allocation4_spill] sm:$0xff] %v4219_v12  ;;  %v4230_v15 = vsub.f32 %v1521_v5, %v4219_v12  ;;  %v4377_v5 = vsub.f32 %v1511_v30, %v4363_v55 }
  0x4d   : > { %3416 = vmatpush3.msra.mxu1 %v3854_v7  ;;  %v4217_v7 = vsub.f32 %v1522_v3, %v4211_v4  ;;  %3441 = vmatprep.subr.mxu0 %v4211_v4 }
  0x4e   : > { %3366 = vmatmul.mubr.f32.gmra.mxu1 %v506_v19  ;;  %5305 = vst [vmem:[#allocation6_spill] sm:$0xff] %v4230_v15  ;;  %v4242_v39 = vand.u32 4294901760, %v4230_v15  ;;  %5335 = vst [vmem:[#allocation36_spill] sm:$0xff] %v4377_v5 }
  0x4f   : > { %3334 = vmatmul.mubr.f32.gmra.mxu0 %v4023_v60  ;;  %3368 = vmatprep.mubr.f32.mxu1 %v516_v26  ;;  %5302 = vst [vmem:[#allocation3_spill] sm:$0xff] %v4217_v7  ;;  %v4227_v14 = vand.u32 4294901760, %v4217_v7  ;;  %v1513_v26 = vld [vmem:[%s5194_s3 + $0x30] sm:$0xff] }
  0x50   : > { %3336 = vmatprep.mubr.f32.mxu0 %v4030_v1  ;;  %5307 = vst [vmem:[#allocation8_spill] sm:$0xff] %v4242_v39 }
  0x51   : > { %5304 = vst [vmem:[#allocation5_spill] sm:$0xff] %v4227_v14 }
  0x52   : > { %3369 = vmatmul.mubr.f32.gmra.mxu1 %v526_v38 }
  0x53   : > { %3337 = vmatmul.mubr.f32.gmra.mxu0 %v4039_v20  ;;  %3371 = vmatprep.mubr.f32.mxu1 %v536_v31  ;;  %v4321_v20 = vand.u32 4294901760, %v1514_v0  ;;  %v4337_v31 = vand.u32 4294901760, %v1513_v26 }
  0x54   : > { %3339 = vmatprep.mubr.f32.mxu0 %v4051_v9 }
  0x55   : > { %5324 = vst [vmem:[#allocation25_spill] sm:$0xff] %v4321_v20  ;;  %5327 = vst [vmem:[#allocation28_spill] sm:$0xff] %v4337_v31  ;;  %v4352_v28 = vsub.f32 %v1513_v26, %v4337_v31 }
  0x56   : > { %3372 = vmatmul.mubr.f32.gmra.mxu1 %v546_v17 }
  0x57   : > { %3340 = vmatmul.mubr.f32.gmra.mxu0 %v4064_v8  ;;  %3374 = vmatprep.mubr.f32.mxu1 %v556_v25  ;;  %v4334_v8 = vsub.f32 %v1514_v0, %v4321_v20  ;;  %5330 = vst [vmem:[#allocation31_spill] sm:$0xff] %v4352_v28  ;;  %v4367_v59 = vand.u32 4294901760, %v4352_v28 }
  0x58   : > { %3342 = vmatprep.mubr.f32.mxu0 %v4072_v49  ;;  %v1512_v49 = vld [vmem:[%s5194_s3 + $0x28] sm:$0xff] }
  0x59   : > { %5326 = vst [vmem:[#allocation27_spill] sm:$0xff] %v4334_v8  ;;  %v4348_v25 = vand.u32 4294901760, %v1512_v49  ;;  %5333 = vst [vmem:[#allocation34_spill] sm:$0xff] %v4367_v59 }
  0x5a   : > { %3375 = vmatmul.mubr.f32.gmra.mxu1 %v566_v33 }
  0x5b   : > { %3343 = vmatmul.mubr.f32.gmra.mxu0 %v4086_v18  ;;  %3417 = vmatprep.mubr.f32.mxu1 %v3912_v32  ;;  %v4346_v18 = vand.u32 4294901760, %v4334_v8  ;;  %5329 = vst [vmem:[#allocation30_spill] sm:$0xff] %v4348_v25  ;;  %v4361_v10 = vsub.f32 %v1512_v49, %v4348_v25 }
  0x5c   : > { %3385 = vmatprep.mubr.f32.mxu0 %v3912_v32  ;;  %v4232_v32 = vand.u32 4294901760, %v1520_v13 }
  0x5d   : > { %5328 = vst [vmem:[#allocation29_spill] sm:$0xff] %v4346_v18  ;;  %v1831_v37 = vsub.f32 %v4334_v8, %v4346_v18  ;;  %5331 = vst [vmem:[#allocation32_spill] sm:$0xff] %v4361_v10  ;;  %v4374_v3 = vand.u32 4294901760, %v4361_v10 }
  0x5e   : > { %3418 = vmatmul.mubr.f32.vlgmr.msra.gmra.mxu1 %v3915_v34  ;;  %5306 = vst [vmem:[#allocation7_spill] sm:$0xff] %v4232_v32 }
  0x5f   : > { %3386 = vmatmul.mubr.f32.vlgmr.msra.gmra.mxu0 %v3915_v34  ;;  %3420 = vmatprep.mubr.f32.mxu1 %v3917_v35  ;;  %v1519_v34 = vld [vmem:[%s5194_s3 + $0x60] sm:$0xff]  ;;  %v1832_v11 = vand.u32 4294901760, %v1831_v37  ;;  %5334 = vst [vmem:[#allocation35_spill] sm:$0xff] %v4374_v3 }
  0x60   : > { %3388 = vmatprep.mubr.f32.mxu0 %v3917_v35  ;;  %3442 = vmatpush3.msra.mxu0 %v4211_v4  ;;  %v1775_v35 = vsub.f32 %v4217_v7, %v4227_v14  ;;  %v4247_v43 = vand.u32 4294901760, %v1519_v34 }
  0x61   : > { %3443 = vmatprep.subr.mxu0 %v4219_v12 }
  0x62   : > { %3421 = vmatmul.mubr.f32.gmra.mxu1 %v3926_v40  ;;  %3444 = vmatpush3.msra.mxu0 %v4219_v12  ;;  %5309 = vst [vmem:[#allocation10_spill] sm:$0xff] %v4247_v43  ;;  %v4260_v48 = vsub.f32 %v1519_v34, %v4247_v43  ;;  %v1838_v34 = vsub.f32 %v4352_v28, %v4367_v59 }
  0x63   : > { %3389 = vmatmul.mubr.f32.gmra.mxu0 %v3926_v40  ;;  %3423 = vmatprep.mubr.f32.mxu1 %v3937_v45  ;;  %v4245_v40 = vsub.f32 %v1520_v13, %v4232_v32  ;;  %v4379_v13 = vand.u32 4294901760, %v1510_v24 }
  0x64   : > { %3391 = vmatprep.mubr.f32.mxu0 %v3937_v45  ;;  %3445 = vmatprep.subr.mxu0 %v4232_v32  ;;  %v1776_v45 = vand.u32 4294901760, %v1775_v35  ;;  %5311 = vst [vmem:[#allocation12_spill] sm:$0xff] %v4260_v48  ;;  %v4272_v56 = vand.u32 4294901760, %v4260_v48  ;;  %v1509_v35 = vld [vmem:[%s5194_s3 + $0x10] sm:$0xff] }
  0x65   : > { %5308 = vst [vmem:[#allocation9_spill] sm:$0xff] %v4245_v40  ;;  %3446 = vmatpush3.msra.mxu0 %v4232_v32  ;;  %v4257_v47 = vand.u32 4294901760, %v4245_v40  ;;  %5336 = vst [vmem:[#allocation37_spill] sm:$0xff] %v4379_v13 }
  0x66   : > { %3424 = vmatmul.mubr.f32.gmra.mxu1 %v3939_v46  ;;  %3447 = vmatprep.subr.mxu0 %v4247_v43  ;;  %5313 = vst [vmem:[#allocation14_spill] sm:$0xff] %v4272_v56  ;;  %v1796_v2 = vsub.f32 %v4260_v48, %v4272_v56 }
  0x67   : > { %3392 = vmatmul.mubr.f32.gmra.mxu0 %v3939_v46  ;;  %3426 = vmatprep.mubr.f32.mxu1 %v3959_v57  ;;  %v1782_v46 = vsub.f32 %v4230_v15, %v4242_v39  ;;  %5310 = vst [vmem:[#allocation11_spill] sm:$0xff] %v4257_v47  ;;  %v1789_v54 = vsub.f32 %v4245_v40, %v4257_v47 }
  0x68   : > { %3394 = vmatprep.mubr.f32.mxu0 %v3959_v57  ;;  %3448 = vmatpush3.msra.mxu0 %v4247_v43  ;;  %v4274_v57 = vand.u32 4294901760, %v1517_v52 }
  0x69   : > { %3497 = vmatprep.subr.mxu1 %v1776_v45  ;;  %v1783_v53 = vand.u32 4294901760, %v1782_v46  ;;  %3449 = vmatprep.subr.mxu0 %v4263_v51  ;;  %v1790_v62 = vand.u32 4294901760, %v1789_v54  ;;  %v4394_v46 = vsub.f32 %v1510_v24, %v4379_v13 }
  0x6a   : > { %3427 = vmatmul.mubr.f32.gmra.mxu1 %v3961_v58  ;;  %5314 = vst [vmem:[#allocation15_spill] sm:$0xff] %v4274_v57  ;;  %v4286_v6 = vsub.f32 %v1517_v52, %v4274_v57  ;;  %3450 = vmatpush3.msra.mxu0 %v4263_v51  ;;  %v4396_v52 = vand.u32 4294901760, %v1509_v35 }
  0x6b   : > { %3395 = vmatmul.mubr.f32.gmra.mxu0 %v3961_v58  ;;  %3429 = vmatprep.mubr.f32.mxu1 %v3996_v29  ;;  %v4277_v58 = vsub.f32 %v1518_v44, %v4263_v51  ;;  %v1845_v44 = vsub.f32 %v4361_v10, %v4374_v3  ;;  %5338 = vst [vmem:[#allocation39_spill] sm:$0xff] %v4394_v46 }
  0x6c   : > { %3397 = vmatprep.mubr.f32.mxu0 %v3996_v29  ;;  %3498 = vmatpush3.msra.mxu1 %v1776_v45  ;;  %5316 = vst [vmem:[#allocation17_spill] sm:$0xff] %v4286_v6  ;;  %v1515_v29 = vld [vmem:[%s5194_s3 + $0x40] sm:$0xff]  ;;  %v4299_v41 = vand.u32 4294901760, %v4286_v6  ;;  %v4391_v45 = vand.u32 4294901760, %v4377_v5  ;;  %5339 = vst [vmem:[#allocation40_spill] sm:$0xff] %v4396_v52 }
  0x6d   : > { %5315 = vst [vmem:[#allocation16_spill] sm:$0xff] %v4277_v58  ;;  %3499 = vmatprep.subr.mxu1 %v1783_v53  ;;  %v4292_v23 = vand.u32 4294901760, %v4277_v58  ;;  %3451 = vmatprep.subr.mxu0 %v4274_v57  ;;  %v4304_v60 = vand.u32 4294901760, %v1515_v29  ;;  %v1846_v54 = vand.u32 4294901760, %v1845_v44 }
  0x6e   : > { %3430 = vmatmul.mubr.f32.gmra.mxu1 %v4004_v36  ;;  %5319 = vst [vmem:[#allocation20_spill] sm:$0xff] %v4299_v41  ;;  %3452 = vmatpush3.msra.mxu0 %v4274_v57  ;;  %v1810_v1 = vsub.f32 %v4286_v6, %v4299_v41  ;;  %5337 = vst [vmem:[#allocation38_spill] sm:$0xff] %v4391_v45 }
  0x6f   : > { %3398 = vmatmul.mubr.f32.gmra.mxu0 %v4004_v36  ;;  %3432 = vmatprep.mubr.f32.mxu1 %v4012_v42  ;;  %5318 = vst [vmem:[#allocation19_spill] sm:$0xff] %v4292_v23  ;;  %v1797_v36 = vand.u32 4294901760, %v1796_v2  ;;  %5321 = vst [vmem:[#allocation22_spill] sm:$0xff] %v4304_v60  ;;  %v4319_v19 = vsub.f32 %v1515_v29, %v4304_v60  ;;  %v4406_v2 = vsub.f32 %v1509_v35, %v4396_v52  ;;  %v1508_v29 = vld [vmem:[%s5194_s3 + $0x8] sm:$0xff] }
  0x70   : > { %3400 = vmatprep.mubr.f32.mxu0 %v4012_v42  ;;  %3500 = vmatpush3.msra.mxu1 %v1783_v53  ;;  %v4302_v42 = vsub.f32 %v1516_v61, %v4288_v22  ;;  %v1811_v9 = vand.u32 4294901760, %v1810_v1  ;;  %v1839_v53 = vand.u32 4294901760, %v1838_v34  ;;  %v1852_v61 = vsub.f32 %v4377_v5, %v4391_v45 }
  0x71   : > { %3501 = vmatprep.subr.mxu1 %v1790_v62  ;;  %3453 = vmatprep.subr.mxu0 %v4288_v22  ;;  %5323 = vst [vmem:[#allocation24_spill] sm:$0xff] %v4319_v19  ;;  %v4331_v38 = vand.u32 4294901760, %v4319_v19  ;;  %5341 = vst [vmem:[#allocation42_spill] sm:$0xff] %v4406_v2  ;;  %v4418_v1 = vand.u32 4294901760, %v4406_v2 }
  0x72   : > { %3433 = vmatmul.mubr.f32.gmra.mxu1 %v4025_v63  ;;  %5320 = vst [vmem:[#allocation21_spill] sm:$0xff] %v4302_v42  ;;  %3454 = vmatpush3.msra.mxu0 %v4288_v22 }
  0x73   : > { %3401 = vmatmul.mubr.f32.gmra.mxu0 %v4025_v63  ;;  %3435 = vmatprep.mubr.f32.mxu1 %v4032_v16  ;;  %v1803_v63 = vsub.f32 %v4277_v58, %v4292_v23  ;;  %5325 = vst [vmem:[#allocation26_spill] sm:$0xff] %v4331_v38  ;;  %v1824_v17 = vsub.f32 %v4319_v19, %v4331_v38  ;;  %5343 = vst [vmem:[#allocation44_spill] sm:$0xff] %v4418_v1  ;;  %v2933_v58 = vld [vmem:[%s5193_s2] ss:$0 sm:$0xff] }
  0x74   : > { %3403 = vmatprep.mubr.f32.mxu0 %v4032_v16  ;;  %3502 = vmatpush3.msra.mxu1 %v1790_v62  ;;  %v4316_v16 = vand.u32 4294901760, %v4302_v42  ;;  %v4403_v62 = vand.u32 4294901760, %v4394_v46  ;;  %v1866_v49 = vsub.f32 %v4406_v2, %v4418_v1 }
  0x75   : > { %3503 = vmatprep.subr.mxu1 %v1797_v36  ;;  %3455 = vmatprep.subr.mxu0 %v4304_v60  ;;  %v1825_v33 = vand.u32 4294901760, %v1824_v17 }
  0x76   : > { %3436 = vmatmul.mubr.f32.gmra.mxu1 %v4041_v21  ;;  %5322 = vst [vmem:[#allocation23_spill] sm:$0xff] %v4316_v16  ;;  %3456 = vmatpush3.msra.mxu0 %v4304_v60  ;;  %5340 = vst [vmem:[#allocation41_spill] sm:$0xff] %v4403_v62  ;;  %v1859_v0 = vsub.f32 %v4394_v46, %v4403_v62  ;;  %v1867_v30 = vand.u32 4294901760, %v1866_v49 }
  0x77   : > { %3404 = vmatmul.mubr.f32.gmra.mxu0 %v4041_v21  ;;  %3438 = vmatprep.mubr.f32.mxu1 %v4053_v27  ;;  %v1804_v21 = vand.u32 4294901760, %v1803_v63  ;;  %v1853_v63 = vand.u32 4294901760, %v1852_v61 }
  0x78   : > { %3406 = vmatprep.mubr.f32.mxu0 %v4053_v27  ;;  %3504 = vmatpush3.msra.mxu1 %v1797_v36  ;;  %v1817_v27 = vsub.f32 %v4302_v42, %v4316_v16  ;;  %v4412_v36 = vand.u32 4294901760, %v1508_v29 }
  0x79   : > { %3505 = vmatprep.subr.mxu1 %v1804_v21  ;;  %3457 = vmatprep.subr.mxu0 %v4321_v20 }
  0x7a   : > { %3439 = vmatmul.mubr.f32.gmra.mxu1 %v4074_v50  ;;  %3458 = vmatpush3.msra.mxu0 %v4321_v20  ;;  %5342 = vst [vmem:[#allocation43_spill] sm:$0xff] %v4412_v36  ;;  %v4425_v26 = vsub.f32 %v1508_v29, %v4412_v36 }
  0x7b   : > { %3407 = vmatmul.mubr.f32.gmra.mxu0 %v4074_v50  ;;  %3506 = vmatpush3.msra.mxu1 %v1804_v21  ;;  %v1818_v50 = vand.u32 4294901760, %v1817_v27  ;;  %v1507_v21 = vld [vmem:[%s5194_s3] sm:$0xff]  ;;  %v1860_v27 = vand.u32 4294901760, %v1859_v0 }
  0x7c   : > { %3507 = vmatprep.subr.mxu1 %v1811_v9  ;;  %3459 = vmatprep.subr.mxu0 %v4337_v31  ;;  %5344 = vst [vmem:[#allocation45_spill] sm:$0xff] %v4425_v26 }
  0x7d   : > { %3508 = vmatpush3.msra.mxu1 %v1811_v9  ;;  %3460 = vmatpush3.msra.mxu0 %v4337_v31  ;;  %v4427_v9 = vand.u32 4294901760, %v1507_v21 }
  0x7e   : > { %3509 = vmatprep.subr.mxu1 %v1818_v50  ;;  %3461 = vmatprep.subr.mxu0 %v4348_v25 }
  0x7f   : > { %3510 = vmatpush3.msra.mxu1 %v1818_v50  ;;  %3462 = vmatpush3.msra.mxu0 %v4348_v25  ;;  %5345 = vst [vmem:[#allocation46_spill] sm:$0xff] %v4427_v9  ;;  %v4434_v50 = vand.u32 4294901760, %v4425_v26  ;;  %v4437_v17 = vsub.f32 %v1507_v21, %v4427_v9 }
  0x80   : > { %3511 = vmatprep.subr.mxu1 %v1825_v33  ;;  %3463 = vmatprep.subr.mxu0 %v4363_v55 }
  0x81   : > { %3512 = vmatpush3.msra.mxu1 %v1825_v33  ;;  %3464 = vmatpush3.msra.mxu0 %v4363_v55  ;;  %5346 = vst [vmem:[#allocation47_spill] sm:$0xff] %v4434_v50  ;;  %5347 = vst [vmem:[#allocation48_spill] sm:$0xff] %v4437_v17  ;;  %v1873_v33 = vsub.f32 %v4425_v26, %v4434_v50  ;;  %v4444_v37 = vand.u32 4294901760, %v4437_v17 }
  0x82   : > { %3513 = vmatprep.subr.mxu1 %v1832_v11  ;;  %3465 = vmatprep.subr.mxu0 %v4379_v13 }
  0x83   : > { %3514 = vmatpush3.msra.mxu1 %v1832_v11  ;;  %3466 = vmatpush3.msra.mxu0 %v4379_v13  ;;  %5348 = vst [vmem:[#allocation49_spill] sm:$0xff] %v4444_v37  ;;  %v1874_v24 = vand.u32 4294901760, %v1873_v33  ;;  %v1880_v11 = vsub.f32 %v4437_v17, %v4444_v37 }
  0x84   : > { %3515 = vmatprep.subr.mxu1 %v1839_v53  ;;  %3467 = vmatprep.subr.mxu0 %v4396_v52 }
  0x85   : > { %3516 = vmatpush3.msra.mxu1 %v1839_v53  ;;  %3468 = vmatpush3.msra.mxu0 %v4396_v52  ;;  %v1881_v34 = vand.u32 4294901760, %v1880_v11 }
  0x86   : > { %3517 = vmatprep.subr.mxu1 %v1846_v54  ;;  %3469 = vmatprep.subr.mxu0 %v4412_v36 }
  0x87   : > { %3518 = vmatpush3.msra.mxu1 %v1846_v54  ;;  %3470 = vmatpush3.msra.mxu0 %v4412_v36 }
  0x88   : > { %3519 = vmatprep.subr.mxu1 %v1853_v63  ;;  %3471 = vmatprep.subr.mxu0 %v4427_v9 }
  0x89   : > { %3520 = vmatpush3.msra.mxu1 %v1853_v63  ;;  %3472 = vmatpush3.msra.mxu0 %v4427_v9 }
  0x8a   : > { %3521 = vmatprep.subr.mxu1 %v1860_v27  ;;  %3553 = vmatprep.subr.mxu0 %v4217_v7 }
  0x8b   : > { %3522 = vmatpush3.msra.mxu1 %v1860_v27 }
  0x8c   : > { %3523 = vmatprep.subr.mxu1 %v1867_v30 }
  0x8d   : > { %3524 = vmatpush3.msra.mxu1 %v1867_v30 }
  0x8e   : > { %3525 = vmatprep.subr.mxu1 %v1874_v24 }
  0x8f   : > { %3526 = vmatpush3.msra.mxu1 %v1874_v24 }
  0x90   : > { %3527 = vmatprep.subr.mxu1 %v1881_v34 }
  0x91   : > { %3528 = vmatpush3.msra.mxu1 %v1881_v34 }
  0x92   : > { %3609 = vmatprep.subr.mxu1 %v4211_v4 }
  0xde   : > { %v4450_v35 = vpop.f32.mrf.mxu1  ;;  %v3259_v44 = vpop.f32.mrf.mxu0 }
  0xdf   : > { %v431_v40 = vadd.f32 %v3259_v44, %v2933_v58 }
  0xe0   : > { %v4452_v53 = vpop.f32.mrf.mxu1  ;;  %v420_v54 = vpop.f32.mrf.mxu0 }
  0xe1   : > { %v421_v51 = vadd.f32 %v2933_v58, %v420_v54 }
  0xe2   : > { %v4454_v61 = vpop.f32.mrf.mxu1  ;;  %v3262_v29 = vpop.f32.mrf.mxu0 }
  0xe3   : > { %v451_v43 = vadd.f32 %v3262_v29, %v2933_v58 }
  0xe4   : > { %v4456_v63 = vpop.f32.mrf.mxu1  ;;  %v440_v0 = vpop.f32.mrf.mxu0 }
  0xe5   : > { %v441_v32 = vadd.f32 %v2933_v58, %v440_v0  ;;  %v680_v29 = vadd.f32 %v4454_v61, %v451_v43 }
  0xe6   : > { %v4458_v21 = vpop.f32.mrf.mxu1 }
  0xe7   : > { %v3265_v27 = vpop.f32.mrf.mxu0  ;;  %v674_v0 = vadd.f32 %v4456_v63, %v441_v32 }
  0xe8   : > { %v4460_v49 = vpop.f32.mrf.mxu1  ;;  %v471_v12 = vadd.f32 %v3265_v27, %v2933_v58 }
  0xe9   : > { %v460_v30 = vpop.f32.mrf.mxu0 }
  0xea   : > { %v4462_v33 = vpop.f32.mrf.mxu1  ;;  %v692_v27 = vadd.f32 %v4458_v21, %v471_v12 }
  0xeb   : > { %v3268_v24 = vpop.f32.mrf.mxu0 }
  0xec   : > { %v4464_v11 = vpop.f32.mrf.mxu1 }
  0xed   : > { %v480_v34 = vpop.f32.mrf.mxu0 }
  0xee   : > { %v4466_v37 = vpop.f32.mrf.mxu1 }
  0xef   : > { %v3271_v50 = vpop.f32.mrf.mxu0 }
  0xf0   : > { %v4468_v1 = vpop.f32.mrf.mxu1 }
  0xf1   : > { %v500_v62 = vpop.f32.mrf.mxu0 }
  0xf2   : > { %v4470_v45 = vpop.f32.mrf.mxu1 }
  0xf3   : > { %v3274_v3 = vpop.f32.mrf.mxu0 }
  0xf4   : > { %v4472_v59 = vpop.f32.mrf.mxu1 }
  0xf5   : > { %v520_v18 = vpop.f32.mrf.mxu0 }
  0xf6   : > { %v4474_v38 = vpop.f32.mrf.mxu1 }
  0xf7   : > { %v3277_v16 = vpop.f32.mrf.mxu0 }
  0xf8   : > { %v4476_v41 = vpop.f32.mrf.mxu1 }
  0xf9   : > { %v540_v23 = vpop.f32.mrf.mxu0 }
  0xfa   : > { %v4478_v56 = vpop.f32.mrf.mxu1  ;;  %v541_v43 = vadd.f32 %v2933_v58, %v540_v23 }
  0xfb   : > { %v3280_v47 = vpop.f32.mrf.mxu0 }
  0xfc   : > { %v4480_v39 = vpop.f32.mrf.mxu1  ;;  %v571_v32 = vadd.f32 %v3280_v47, %v2933_v58 }
  0xfd   : > { %v4482_v14 = vpop.f32.mrf.mxu0 }
  0xfe   : > { %v3355_v17 = vpop.f32.mrf.mxu1 }
  0xff   : > { %v3323_v26 = vpop.f32.mrf.mxu0 }
 0x100   : > { %v4484_v2 = vpop.f32.mrf.mxu1 }
 0x101   : > { %v831_v46 = vpop.f32.mrf.mxu0 }
 0x102   : > { %v4486_v9 = vpop.f32.mrf.mxu1 }
 0x103   : > { %v3326_v5 = vpop.f32.mrf.mxu0 }
 0x104   : > { %v4488_v36 = vpop.f32.mrf.mxu1  ;;  %v853_v61 = vadd.f32 %v3326_v5, %v680_v29  ;;  %v734_v5 = vadd.f32 %v4476_v41, %v541_v43 }
 0x105   : > { %v845_v10 = vpop.f32.mrf.mxu0 }
 0x106   : > { %v4490_v52 = vpop.f32.mrf.mxu1 }
 0x107   : > { %v3329_v28 = vpop.f32.mrf.mxu0 }
 0x108   : > { %v4492_v13 = vpop.f32.mrf.mxu1 }
 0x109   : > { %v859_v8 = vpop.f32.mrf.mxu0 }
 0x10a   : > { %v4494_v55 = vpop.f32.mrf.mxu1 }
 0x10b   : > { %v3332_v19 = vpop.f32.mrf.mxu0 }
 0x10c   : > { %v4496_v25 = vpop.f32.mrf.mxu1 }
 0x10d   : > { %5349 = vst [vmem:[#allocation50_spill] sm:$0xff] %v4496_v25  ;;  %v4498_v42 = vpop.f32.mrf.mxu0  ;;  %v491_v25 = vadd.f32 %v3268_v24, %v2933_v58 }
 0x10e   : > { %v4500_v31 = vpop.f32.mrf.mxu1 }
 0x10f   : > { %5350 = vst [vmem:[#allocation51_spill] sm:$0xff] %v4500_v31  ;;  %v4502_v6 = vpop.f32.mrf.mxu0  ;;  %v461_v31 = vadd.f32 %v2933_v58, %v460_v30  ;;  %v704_v24 = vadd.f32 %v4462_v33, %v491_v25  ;;  %v561_v25 = vadd.f32 %v2933_v58, %v4482_v14  ;;  %v4552_v14 = vadd.f32 %v4478_v56, %v571_v32 }
 0x110   : > { %v4504_v20 = vpop.f32.mrf.mxu1 }
 0x111   : > { %5351 = vst [vmem:[#allocation52_spill] sm:$0xff] %v4504_v20  ;;  %v4509_v60 = vpop.f32.mrf.mxu0  ;;  %v668_v20 = vadd.f32 %v4450_v35, %v431_v40  ;;  %v501_v40 = vadd.f32 %v2933_v58, %v500_v62  ;;  %v686_v30 = vadd.f32 %v4460_v49, %v461_v31 }
 0x112   : > { %5352 = vst [vmem:[#allocation53_spill] sm:$0xff] %v4509_v60  ;;  %v4511_v48 = vpop.f32.mrf.mxu1 }
 0x113   : > { %5353 = vst [vmem:[#allocation54_spill] sm:$0xff] %v4511_v48  ;;  %v4513_v22 = vpop.f32.mrf.mxu0  ;;  %v839_v54 = vadd.f32 %v3323_v26, %v668_v20  ;;  %v521_v26 = vadd.f32 %v2933_v58, %v520_v18  ;;  %v710_v31 = vadd.f32 %v4468_v1, %v501_v40  ;;  %v860_v23 = vadd.f32 %v859_v8, %v686_v30 }
 0x114   : > { %5354 = vst [vmem:[#allocation55_spill] sm:$0xff] %v4513_v22  ;;  %v4515_v57 = vpop.f32.mrf.mxu1  ;;  %v481_v22 = vadd.f32 %v2933_v58, %v480_v34  ;;  %v531_v34 = vadd.f32 %v3274_v3, %v2933_v58  ;;  %v867_v3 = vadd.f32 %v3329_v28, %v692_v27  ;;  %v881_v1 = vadd.f32 %v3332_v19, %v704_v24  ;;  %v5360_v40 = vld [vmem:[#allocation50_spill] sm:$0xff] }
 0x115   : > { %5355 = vst [vmem:[#allocation56_spill] sm:$0xff] %v4515_v57  ;;  %v4517_v15 = vpop.f32.mrf.mxu0  ;;  %v662_v57 = vadd.f32 %v4452_v53, %v421_v51  ;;  %v1022_v62 = vadd.f32 %v3355_v17, %v839_v54  ;;  %v4556_v8 = vadd.f32 %v4480_v39, %v561_v25  ;;  %v1046_v41 = vadd.f32 %v4492_v13, %v860_v23 }
 0x116   : > { %5356 = vst [vmem:[#allocation57_spill] sm:$0xff] %v4517_v15  ;;  %v4519_v7 = vpop.f32.mrf.mxu1  ;;  %v511_v15 = vadd.f32 %v3271_v50, %v2933_v58  ;;  %v698_v20 = vadd.f32 %v4464_v11, %v481_v22  ;;  %v551_v50 = vadd.f32 %v3277_v16, %v2933_v58  ;;  %v728_v22 = vadd.f32 %v4470_v45, %v531_v34 }
 0x117   : > { %v4521_v4 = vpop.f32.mrf.mxu0  ;;  %v1038_v58 = vadd.f32 %v4486_v9, %v853_v61 }
 0x118   : > { %v4524_v48 = vpop.f32.mrf.mxu1  ;;  %v716_v12 = vadd.f32 %v4466_v37, %v511_v15  ;;  %v722_v15 = vadd.f32 %v4472_v59, %v521_v26  ;;  %v740_v47 = vadd.f32 %v4474_v38, %v551_v50  ;;  %v1054_v59 = vadd.f32 %v4490_v52, %v867_v3 }
 0x119   : > { %5357 = vst [vmem:[#allocation58_spill] sm:$0xff] %v4524_v48  ;;  %v4526_v44 = vpop.f32.mrf.mxu0  ;;  %v832_v48 = vadd.f32 %v831_v46, %v662_v57  ;;  %v846_v57 = vadd.f32 %v845_v10, %v674_v0  ;;  %v874_v38 = vadd.f32 %v4498_v42, %v698_v20  ;;  %v1070_v37 = vadd.f32 %v4494_v55, %v881_v1  ;;  %v5358_v52 = vld [vmem:[#allocation53_spill] sm:$0xff] }
 0x11a   : > { %v4529_v60 = vpop.f32.mrf.mxu1  ;;  %v888_v42 = vadd.f32 %v5358_v52, %v710_v31  ;;  %v923_v55 = vadd.f32 %v4521_v4, %v740_v47  ;;  %v5364_v25 = vld [vmem:[#allocation54_spill] sm:$0xff] }
 0x11b   : > { %v4534_v35 = vpop.f32.mrf.mxu0  ;;  %v1014_v16 = vadd.f32 %v4484_v2, %v832_v48  ;;  %v1030_v45 = vadd.f32 %v4488_v36, %v846_v57  ;;  %v895_v36 = vadd.f32 %v4502_v6, %v716_v12  ;;  %v5359_v49 = vld [vmem:[#allocation55_spill] sm:$0xff]  ;;  %v1062_v30 = vadd.f32 %v5360_v40, %v874_v38 }
 0x11c   : > { %v4538_v51 = vpop.f32.mrf.mxu1  ;;  %v909_v33 = vadd.f32 %v5359_v49, %v728_v22  ;;  %v916_v6 = vadd.f32 %v4526_v44, %v734_v5 }
 0x11d   : > { %v4541_v53 = vpop.f32.mrf.mxu0  ;;  %v5361_v24 = vld [vmem:[#allocation57_spill] sm:$0xff] }
 0x11e   : > { %v3419_v63 = vpop.f32.mrf.mxu1  ;;  %v902_v34 = vadd.f32 %v5361_v24, %v722_v15  ;;  %v4588_v57 = vadd.f32 %v5364_v25, %v909_v33  ;;  %v4602_v15 = vadd.f32 %v4519_v7, %v923_v55  ;;  %v5369_v33 = vld [vmem:[#allocation7_spill] sm:$0xff]  ;;  %v937_v24 = vadd.f32 %v4534_v35, %v4552_v14 }
 0x11f   : > { %v3387_v46 = vpop.f32.mrf.mxu0 }
 0x120   : > { %v1223_v18 = vadd.f32 %v3387_v46, %v1022_v62  ;;  %v1381_v21 = vpop.f32.mrf.mxu1  ;;  %v5362_v62 = vld [vmem:[#allocation51_spill] sm:$0xff] }
 0x121   : > { %v1216_v17 = vpop.f32.mrf.mxu0  ;;  %v1086_v61 = vadd.f32 %v5362_v62, %v895_v36 }
 0x122   : > { %v1388_v28 = vadd.f32 %v3419_v63, %v1223_v18  ;;  %v1217_v10 = vadd.f32 %v1216_v17, %v1014_v16  ;;  %v3422_v48 = vpop.f32.mrf.mxu1  ;;  %v5363_v63 = vld [vmem:[#allocation52_spill] sm:$0xff]  ;;  %v5366_v17 = vld [vmem:[#allocation58_spill] sm:$0xff] }
 0x123   : > { %v3390_v56 = vpop.f32.mrf.mxu0  ;;  %v1078_v31 = vadd.f32 %v5363_v63, %v888_v42  ;;  %v5365_v18 = vld [vmem:[#allocation56_spill] sm:$0xff] }
 0x124   : > { %v1476_v19 = vmax.f32 %v1388_v28, 0.0  ;;  %v1382_v2 = vadd.f32 %v1381_v21, %v1217_v10  ;;  %v1235_v9 = vadd.f32 %v3390_v56, %v1038_v58  ;;  %v1393_v39 = vpop.f32.mrf.mxu1  ;;  %v4599_v21 = vadd.f32 %v5365_v18, %v902_v34 }
 0x125   : > { %v1228_v11 = vpop.f32.mrf.mxu0  ;;  %v4606_v58 = vadd.f32 %v5366_v17, %v916_v6  ;;  %v5371_v17 = vld [vmem:[#allocation3_spill] sm:$0xff] }
 0x126   : > { %1492 = vst [vmem:[%s4565_s27 + $0x8] sm:$0xff] %v1476_v19  ;;  %v4573_v54 = vand.u32 4294901760, %v1476_v19  ;;  %v1475_v29 = vmax.f32 %v1382_v2, 0.0  ;;  %v1400_v0 = vadd.f32 %v3422_v48, %v1235_v9  ;;  %v1229_v13 = vadd.f32 %v1228_v11, %v1030_v45  ;;  %v3425_v27 = vpop.f32.mrf.mxu1  ;;  %v5367_v45 = vld [vmem:[#allocation2_spill] sm:$0xff] }
 0x127   : > { %v3393_v20 = vpop.f32.mrf.mxu0 }
 0x128   : > { %v4580_v26 = vsub.f32 %v1476_v19, %v4573_v54  ;;  %1491 = vst [vmem:[%s4565_s27] sm:$0xff] %v1475_v29  ;;  %v4583_v50 = vand.u32 4294901760, %v1475_v29  ;;  %v1478_v43 = vmax.f32 %v1400_v0, 0.0  ;;  %v1394_v12 = vadd.f32 %v1393_v39, %v1229_v13  ;;  %v1405_v32 = vpop.f32.mrf.mxu1  ;;  %v5368_v19 = vld [vmem:[#allocation4_spill] sm:$0xff] }
 0x129   : > { %v1247_v4 = vadd.f32 %v3393_v20, %v1054_v59  ;;  %v1240_v3 = vpop.f32.mrf.mxu0  ;;  %v5370_v20 = vld [vmem:[#allocation10_spill] sm:$0xff] }
 0x12a   : > { %v1623_v44 = vand.u32 4294901760, %v4580_v26  ;;  %v4592_v46 = vsub.f32 %v1475_v29, %v4583_v50  ;;  %1494 = vst [vmem:[%s4565_s27 + $0x18] sm:$0xff] %v1478_v43  ;;  %v4595_v22 = vand.u32 4294901760, %v1478_v43  ;;  %v1477_v16 = vmax.f32 %v1394_v12, 0.0  ;;  %3529 = vmatprep.mubr.f32.mxu1 %v4583_v50  ;;  %v3428_v23 = vpop.f32.mrf.mxu1 }
 0x12b   : > { %v1412_v47 = vadd.f32 %v3425_v27, %v1247_v4  ;;  %v1241_v5 = vadd.f32 %v1240_v3, %v1046_v41  ;;  %v3396_v1 = vpop.f32.mrf.mxu0  ;;  %3530 = vmatmul.mubr.f32.vlgmr.msra.gmra.mxu1 %v4573_v54 }
 0x12c   : > { %v4609_v28 = vsub.f32 %v1478_v43, %v4595_v22  ;;  %1493 = vst [vmem:[%s4565_s27 + $0x10] sm:$0xff] %v1477_v16  ;;  %v4612_v10 = vand.u32 4294901760, %v1477_v16  ;;  %v1259_v48 = vadd.f32 %v3396_v1, %v1070_v37  ;;  %3610 = vmatpush3.msra.mxu1 %v5367_v45  ;;  %v1417_v7 = vpop.f32.mrf.mxu1  ;;  %v1624_v59 = vsub.f32 %v4580_v26, %v1623_v44 }
 0x12d   : > { %v1480_v38 = vmax.f32 %v1412_v47, 0.0  ;;  %v1406_v56 = vadd.f32 %v1405_v32, %v1241_v5  ;;  %v1252_v41 = vpop.f32.mrf.mxu0  ;;  %3611 = vmatprep.subr.mxu1 %v5368_v19  ;;  %v1613_v2 = vand.u32 4294901760, %v4592_v46  ;;  %v1134_v5 = vadd.f32 %v4529_v60, %v937_v24 }
 0x12e   : > { %v4621_v9 = vsub.f32 %v1477_v16, %v4612_v10  ;;  %v1424_v39 = vadd.f32 %v3428_v23, %v1259_v48  ;;  %v1253_v36 = vadd.f32 %v1252_v41, %v1062_v30  ;;  %3532 = vmatprep.mubr.f32.mxu1 %v4612_v10  ;;  %3612 = vmatpush3.msra.mxu1 %v5368_v19  ;;  %v3431_v37 = vpop.f32.mrf.mxu1  ;;  %v1643_v29 = vand.u32 4294901760, %v4609_v28  ;;  %v5372_v48 = vld [vmem:[#allocation13_spill] sm:$0xff] }
 0x12f   : > { %1496 = vst [vmem:[%s4565_s27 + $0x28] sm:$0xff] %v1480_v38  ;;  %v4626_v52 = vand.u32 4294901760, %v1480_v38  ;;  %v1479_v42 = vmax.f32 %v1406_v56, 0.0  ;;  %v3399_v49 = vpop.f32.mrf.mxu0  ;;  %3533 = vmatmul.mubr.f32.gmra.mxu1 %v4595_v22  ;;  %3613 = vmatprep.subr.mxu1 %v5369_v33  ;;  %v1614_v11 = vsub.f32 %v4592_v46, %v1613_v2  ;;  %v1625_v12 = vand.u32 4294901760, %v1624_v59 }
 0x130   : > { %v1482_v0 = vmax.f32 %v1424_v39, 0.0  ;;  %v1418_v13 = vadd.f32 %v1417_v7, %v1253_v36  ;;  %v1271_v27 = vadd.f32 %v3399_v49, %v1086_v61  ;;  %3614 = vmatpush3.msra.mxu1 %v5369_v33  ;;  %v1429_v40 = vpop.f32.mrf.mxu1  ;;  %v1633_v30 = vand.u32 4294901760, %v4621_v9  ;;  %v5373_v39 = vld [vmem:[#allocation6_spill] sm:$0xff] }
 0x131   : > { %v4639_v34 = vsub.f32 %v1480_v38, %v4626_v52  ;;  %1495 = vst [vmem:[%s4565_s27 + $0x20] sm:$0xff] %v1479_v42  ;;  %v4642_v55 = vand.u32 4294901760, %v1479_v42  ;;  %v1264_v6 = vpop.f32.mrf.mxu0  ;;  %3615 = vmatprep.subr.mxu1 %v5370_v20  ;;  %v1615_v43 = vand.u32 4294901760, %v1614_v11  ;;  %v930_v56 = vadd.f32 %v4541_v53, %v4556_v8  ;;  %v5374_v53 = vld [vmem:[#allocation15_spill] sm:$0xff] }
 0x132   : > { %1498 = vst [vmem:[%s4565_s27 + $0x38] sm:$0xff] %v1482_v0  ;;  %v1481_v32 = vmax.f32 %v1418_v13, 0.0  ;;  %v1436_v62 = vadd.f32 %v3431_v37, %v1271_v27  ;;  %v1265_v61 = vadd.f32 %v1264_v6, %v1078_v31  ;;  %3616 = vmatpush3.msra.mxu1 %v5370_v20  ;;  %v3434_v63 = vpop.f32.mrf.mxu1  ;;  %v4650_v14 = vand.u32 4294901760, %v1482_v0 }
 0x133   : > { %v4648_v35 = vsub.f32 %v1479_v42, %v4642_v55  ;;  %3473 = vmatprep.mubr.f32.mxu0 %v1615_v43  ;;  %3535 = vmatprep.mubr.f32.mxu1 %v4642_v55  ;;  %v3402_v25 = vpop.f32.mrf.mxu0  ;;  %v1634_v4 = vsub.f32 %v4621_v9, %v1633_v30  ;;  %v1644_v31 = vsub.f32 %v4609_v28, %v1643_v29  ;;  %v1663_v47 = vand.u32 4294901760, %v4639_v34  ;;  %v5375_v43 = vld [vmem:[#allocation9_spill] sm:$0xff] }
 0x134   : > { %1497 = vst [vmem:[%s4565_s27 + $0x30] sm:$0xff] %v1481_v32  ;;  %v4660_v3 = vand.u32 4294901760, %v1481_v32  ;;  %v4662_v16 = vmax.f32 %v1436_v62, 0.0  ;;  %v1430_v23 = vadd.f32 %v1429_v40, %v1265_v61  ;;  %3474 = vmatmul.mubr.f32.vlgmr.msra.gmra.mxu0 %v1625_v12  ;;  %3536 = vmatmul.mubr.f32.gmra.mxu1 %v4626_v52  ;;  %v1441_v18 = vpop.f32.mrf.mxu1  ;;  %v1283_v1 = vadd.f32 %v3402_v25, %v4588_v57 }
 0x135   : > { %3554 = vmatpush3.msra.mxu0 %v5371_v17  ;;  %3617 = vmatprep.subr.mxu1 %v5372_v48  ;;  %v1276_v7 = vpop.f32.mrf.mxu0  ;;  %v1635_v59 = vand.u32 4294901760, %v1634_v4  ;;  %v1653_v38 = vand.u32 4294901760, %v4648_v35  ;;  %v4682_v37 = vsub.f32 %v1482_v0, %v4650_v14  ;;  %v1645_v49 = vand.u32 4294901760, %v1644_v31  ;;  %v5376_v4 = vld [vmem:[#allocation18_spill] sm:$0xff] }
 0x136   : > { %v4674_v41 = vsub.f32 %v1481_v32, %v4660_v3  ;;  %1500 = vst [vmem:[%s4565_s27 + $0x48] sm:$0xff] %v4662_v16  ;;  %v1483_v60 = vmax.f32 %v1430_v23, 0.0  ;;  %3555 = vmatprep.subr.mxu0 %v5373_v39  ;;  %3618 = vmatpush3.msra.mxu1 %v5372_v48  ;;  %v1277_v57 = vadd.f32 %v1276_v7, %v4599_v21  ;;  %v3437_v36 = vpop.f32.mrf.mxu1  ;;  %v4698_v24 = vand.u32 4294901760, %v4662_v16  ;;  %v5377_v7 = vld [vmem:[#allocation12_spill] sm:$0xff] }
 0x137   : > { %v1448_v42 = vadd.f32 %v3434_v63, %v1283_v1  ;;  %3556 = vmatpush3.msra.mxu0 %v5373_v39  ;;  %3619 = vmatprep.subr.mxu1 %v5374_v53  ;;  %v3405_v8 = vpop.f32.mrf.mxu0  ;;  %v1654_v11 = vsub.f32 %v4648_v35, %v1653_v38  ;;  %v1664_v40 = vsub.f32 %v4639_v34, %v1663_v47 }
 0x138   : > { %1499 = vst [vmem:[%s4565_s27 + $0x40] sm:$0xff] %v1483_v60  ;;  %v4690_v13 = vand.u32 4294901760, %v1483_v60  ;;  %v1442_v27 = vadd.f32 %v1441_v18, %v1277_v57  ;;  %3476 = vmatprep.mubr.f32.mxu0 %v1635_v59  ;;  %3538 = vmatprep.mubr.f32.mxu1 %v4660_v3  ;;  %v1295_v21 = vadd.f32 %v3405_v8, %v4602_v15  ;;  %v1453_v0 = vpop.f32.mrf.mxu1  ;;  %v1673_v62 = vand.u32 4294901760, %v4674_v41  ;;  %v5378_v57 = vld [vmem:[#allocation22_spill] sm:$0xff] }
 0x139   : > { %v1486_v6 = vmax.f32 %v1448_v42, 0.0  ;;  %3557 = vmatprep.subr.mxu0 %v5375_v43  ;;  %3620 = vmatpush3.msra.mxu1 %v5374_v53  ;;  %v1288_v12 = vpop.f32.mrf.mxu0  ;;  %v1655_v32 = vand.u32 4294901760, %v1654_v11  ;;  %v5300_v18 = vand.u32 4294901760, %v4682_v37  ;;  %v1126_v39 = vadd.f32 %v4538_v51, %v930_v56  ;;  %v5379_v56 = vld [vmem:[#allocation16_spill] sm:$0xff] }
 0x13a   : > { %v4704_v15 = vsub.f32 %v1483_v60, %v4690_v13  ;;  %v1485_v61 = vmax.f32 %v1442_v27, 0.0  ;;  %v1460_v63 = vadd.f32 %v3437_v36, %v1295_v21  ;;  %3477 = vmatmul.mubr.f32.gmra.mxu0 %v1645_v49  ;;  %3539 = vmatmul.mubr.f32.gmra.mxu1 %v4650_v14  ;;  %v1289_v25 = vadd.f32 %v1288_v12, %v4606_v58  ;;  %v3440_v60 = vpop.f32.mrf.mxu1  ;;  %v5380_v12 = vld [vmem:[#allocation25_spill] sm:$0xff] }
 0x13b   : > { %1502 = vst [vmem:[%s4565_s27 + $0x58] sm:$0xff] %v1486_v6  ;;  %3558 = vmatpush3.msra.mxu0 %v5375_v43  ;;  %3621 = vmatprep.subr.mxu1 %v5376_v4  ;;  %v3408_v31 = vpop.f32.mrf.mxu0  ;;  %v1674_v23 = vsub.f32 %v4674_v41, %v1673_v62  ;;  %v1665_v36 = vand.u32 4294901760, %v1664_v40  ;;  %v4727_v8 = vsub.f32 %v4662_v16, %v4698_v24  ;;  %v4738_v27 = vand.u32 4294901760, %v1486_v6 }
 0x13c   : > { %1501 = vst [vmem:[%s4565_s27 + $0x50] sm:$0xff] %v1485_v61  ;;  %v4716_v1 = vand.u32 4294901760, %v1485_v61  ;;  %v4718_v17 = vmax.f32 %v1460_v63, 0.0  ;;  %3559 = vmatprep.subr.mxu0 %v5377_v7  ;;  %3622 = vmatpush3.msra.mxu1 %v5376_v4  ;;  %v1454_v58 = vadd.f32 %v1453_v0, %v1289_v25  ;;  %v1307_v59 = vadd.f32 %v3408_v31, %v1134_v5  ;;  %v1465_v40 = vpop.f32.mrf.mxu1  ;;  %v5381_v25 = vld [vmem:[#allocation17_spill] sm:$0xff] }
 0x13d   : > { %3560 = vmatpush3.msra.mxu0 %v5377_v7  ;;  %3623 = vmatprep.subr.mxu1 %v5378_v57  ;;  %v1300_v42 = vpop.f32.mrf.mxu0  ;;  %v5296_v51 = vand.u32 4294901760, %v4704_v15  ;;  %v1684_v16 = vsub.f32 %v4682_v37, %v5300_v18  ;;  %v1675_v43 = vand.u32 4294901760, %v1674_v23  ;;  %v5295_v31 = vand.u32 4294901760, %v4727_v8  ;;  %v5382_v7 = vld [vmem:[#allocation28_spill] sm:$0xff] }
 0x13e   : > { %1504 = vst [vmem:[%s4565_s27 + $0x68] sm:$0xff] %v4718_v17  ;;  %v1487_v49 = vmax.f32 %v1454_v58, 0.0  ;;  %3479 = vmatprep.mubr.f32.mxu0 %v1655_v32  ;;  %3541 = vmatprep.mubr.f32.mxu1 %v4690_v13  ;;  %v1472_v5 = vadd.f32 %v3440_v60, %v1307_v59  ;;  %v1301_v11 = vadd.f32 %v1300_v42, %v1126_v39  ;;  %v5383_v39 = vld [vmem:[#allocation21_spill] sm:$0xff] }
 0x13f   : > { %3561 = vmatprep.subr.mxu0 %v5379_v56  ;;  %3624 = vmatpush3.msra.mxu1 %v5378_v57  ;;  %v4741_v21 = vsub.f32 %v1485_v61, %v4716_v1  ;;  %v1694_v61 = vsub.f32 %v4704_v15, %v5296_v51  ;;  %v4759_v58 = vsub.f32 %v1486_v6, %v4738_v27  ;;  %v1685_v59 = vand.u32 4294901760, %v1684_v16  ;;  %v5385_v16 = vld [vmem:[#allocation24_spill] sm:$0xff] }
 0x140   : > { %1503 = vst [vmem:[%s4565_s27 + $0x60] sm:$0xff] %v1487_v49  ;;  %v1490_v0 = vmax.f32 %v1472_v5, 0.0  ;;  %3480 = vmatmul.mubr.f32.gmra.mxu0 %v1665_v36  ;;  %3542 = vmatmul.mubr.f32.gmra.mxu1 %v4698_v24  ;;  %v1466_v32 = vadd.f32 %v1465_v40, %v1301_v11  ;;  %v4747_v63 = vand.u32 4294901760, %v1487_v49  ;;  %v4767_v36 = vand.u32 4294901760, %v4718_v17  ;;  %v5391_v51 = vld [vmem:[#allocation32_spill] sm:$0xff] }
 0x141   : > { %3562 = vmatpush3.msra.mxu0 %v5379_v56  ;;  %3625 = vmatprep.subr.mxu1 %v5380_v12  ;;  %v5293_v60 = vand.u32 4294901760, %v4741_v21  ;;  %v1695_v6 = vand.u32 4294901760, %v1694_v61  ;;  %v1704_v5 = vsub.f32 %v4727_v8, %v5295_v31  ;;  %v5384_v56 = vld [vmem:[#allocation30_spill] sm:$0xff]  ;;  %v5294_v40 = vand.u32 4294901760, %v4759_v58 }
 0x142   : > { %1506 = vst [vmem:[%s4565_s27 + $0x78] sm:$0xff] %v1490_v0  ;;  %3563 = vmatprep.subr.mxu0 %v5381_v25  ;;  %3626 = vmatpush3.msra.mxu1 %v5380_v12  ;;  %v1489_v23 = vmax.f32 %v1466_v32, 0.0  ;;  %v4770_v42 = vsub.f32 %v1487_v49, %v4747_v63  ;;  %v4790_v32 = vsub.f32 %v4718_v17, %v4767_v36 }
 0x143   : > { %3564 = vmatpush3.msra.mxu0 %v5381_v25  ;;  %3627 = vmatprep.subr.mxu1 %v5382_v7  ;;  %v1714_v49 = vsub.f32 %v4741_v21, %v5293_v60  ;;  %v1705_v25 = vand.u32 4294901760, %v1704_v5  ;;  %v5388_v5 = vld [vmem:[#allocation37_spill] sm:$0xff]  ;;  %v5389_v60 = vld [vmem:[#allocation31_spill] sm:$0xff] }
 0x144   : > { %3482 = vmatprep.mubr.f32.mxu0 %v1675_v43  ;;  %3544 = vmatprep.mubr.f32.mxu1 %v4716_v1  ;;  %1505 = vst [vmem:[%s4565_s27 + $0x70] sm:$0xff] %v1489_v23  ;;  %v4778_v11 = vand.u32 4294901760, %v1489_v23  ;;  %v5386_v43 = vld [vmem:[#allocation33_spill] sm:$0xff]  ;;  %v5297_v61 = vand.u32 4294901760, %v4770_v42 }
 0x145   : > { %3565 = vmatprep.subr.mxu0 %v5383_v39  ;;  %3628 = vmatpush3.msra.mxu1 %v5382_v7  ;;  %v1715_v17 = vand.u32 4294901760, %v1714_v49  ;;  %v5390_v49 = vld [vmem:[#allocation40_spill] sm:$0xff] }
 0x146   : > { %3483 = vmatmul.mubr.f32.gmra.mxu0 %v1685_v59  ;;  %3545 = vmatmul.mubr.f32.gmra.mxu1 %v4738_v27  ;;  %v5387_v59 = vld [vmem:[#allocation27_spill] sm:$0xff] }
 0x147   : > { %3566 = vmatpush3.msra.mxu0 %v5383_v39  ;;  %3629 = vmatprep.subr.mxu1 %v5384_v56  ;;  %v4796_v39 = vand.u32 4294901760, %v1490_v0 }
 0x148   : > { %3567 = vmatprep.subr.mxu0 %v5385_v16  ;;  %3630 = vmatpush3.msra.mxu1 %v5384_v56 }
 0x149   : > { %3568 = vmatpush3.msra.mxu0 %v5385_v16  ;;  %3631 = vmatprep.subr.mxu1 %v5386_v43  ;;  %v4799_v16 = vsub.f32 %v1489_v23, %v4778_v11  ;;  %v1734_v23 = vsub.f32 %v4770_v42, %v5297_v61 }
 0x14a   : > { %3485 = vmatprep.mubr.f32.mxu0 %v1695_v6  ;;  %3547 = vmatprep.mubr.f32.mxu1 %v4747_v63  ;;  %v1724_v6 = vsub.f32 %v4759_v58, %v5294_v40  ;;  %v4816_v40 = vsub.f32 %v1490_v0, %v4796_v39  ;;  %v5392_v0 = vld [vmem:[#allocation43_spill] sm:$0xff] }
 0x14b   : > { %3569 = vmatprep.subr.mxu0 %v5387_v59  ;;  %3632 = vmatpush3.msra.mxu1 %v5386_v43  ;;  %v5299_v31 = vand.u32 4294901760, %v4799_v16  ;;  %v1735_v61 = vand.u32 4294901760, %v1734_v23  ;;  %v5394_v23 = vld [vmem:[#allocation46_spill] sm:$0xff] }
 0x14c   : > { %3486 = vmatmul.mubr.f32.gmra.mxu0 %v1705_v25  ;;  %3548 = vmatmul.mubr.f32.gmra.mxu1 %v4767_v36  ;;  %v5298_v25 = vand.u32 4294901760, %v4790_v32 }
 0x14d   : > { %3570 = vmatpush3.msra.mxu0 %v5387_v59  ;;  %3633 = vmatprep.subr.mxu1 %v5388_v5  ;;  %v1725_v59 = vand.u32 4294901760, %v1724_v6  ;;  %v1754_v6 = vsub.f32 %v4799_v16, %v5299_v31 }
 0x14e   : > { %3571 = vmatprep.subr.mxu0 %v5389_v60  ;;  %3634 = vmatpush3.msra.mxu1 %v5388_v5 }
 0x14f   : > { %3572 = vmatpush3.msra.mxu0 %v5389_v60  ;;  %3635 = vmatprep.subr.mxu1 %v5390_v49  ;;  %v1744_v60 = vsub.f32 %v4790_v32, %v5298_v25  ;;  %v5395_v25 = vld [vmem:[#allocation39_spill] sm:$0xff]  ;;  %v1755_v31 = vand.u32 4294901760, %v1754_v6 }
 0x150   : > { %3488 = vmatprep.mubr.f32.mxu0 %v1715_v17  ;;  %3550 = vmatprep.mubr.f32.mxu1 %v4778_v11  ;;  %v5393_v17 = vld [vmem:[#allocation36_spill] sm:$0xff] }
 0x151   : > { %3573 = vmatprep.subr.mxu0 %v5391_v51  ;;  %3636 = vmatpush3.msra.mxu1 %v5390_v49 }
 0x152   : > { %3489 = vmatmul.mubr.f32.gmra.mxu0 %v1725_v59  ;;  %3551 = vmatmul.mubr.f32.gmra.mxu1 %v4796_v39  ;;  %v1763_v59 = vand.u32 4294901760, %v4816_v40 }
 0x153   : > { %3574 = vmatpush3.msra.mxu0 %v5391_v51  ;;  %3637 = vmatprep.subr.mxu1 %v5392_v0  ;;  %v1745_v51 = vand.u32 4294901760, %v1744_v60 }
 0x154   : > { %3575 = vmatprep.subr.mxu0 %v5393_v17  ;;  %3638 = vmatpush3.msra.mxu1 %v5392_v0  ;;  %v1764_v18 = vsub.f32 %v4816_v40, %v1763_v59 }
 0x155   : > { %3641 = vmatprep.mubr.f32.mxu1 %v1613_v2  ;;  %3576 = vmatpush3.msra.mxu0 %v5393_v17  ;;  %v5396_v2 = vld [vmem:[#allocation42_spill] sm:$0xff] }
 0x156   : > { %3639 = vmatprep.subr.mxu1 %v5394_v23  ;;  %3491 = vmatprep.mubr.f32.mxu0 %v1735_v61  ;;  %v5397_v61 = vld [vmem:[#allocation45_spill] sm:$0xff] }
 0x157   : > { %3577 = vmatprep.subr.mxu0 %v5395_v25  ;;  %3640 = vmatpush3.msra.mxu1 %v5394_v23 }
 0x158   : > { %3492 = vmatmul.mubr.f32.gmra.mxu0 %v1745_v51  ;;  %3642 = vmatmul.mubr.f32.vlgmr.msra.gmra.mxu1 %v1623_v44  ;;  %v1765_v44 = vand.u32 4294901760, %v1764_v18  ;;  %v5419_v18 = vld [vmem:[#allocation41_spill] sm:$0xff] }
 0x159   : > { %3578 = vmatpush3.msra.mxu0 %v5395_v25  ;;  %3721 = vmatprep.subr.mxu1 %v5367_v45 }
 0x15a   : > { %3579 = vmatprep.subr.mxu0 %v5396_v2  ;;  %3644 = vmatprep.mubr.f32.mxu1 %v1633_v30  ;;  %v5398_v30 = vld [vmem:[#allocation48_spill] sm:$0xff] }
 0x15b   : > { %3722 = vmatpush3.msra.mxu1 %v5367_v45  ;;  %3580 = vmatpush3.msra.mxu0 %v5396_v2  ;;  %v5399_v45 = vld [vmem:[#allocation5_spill] sm:$0xff] }
 0x15c   : > { %3723 = vmatprep.subr.mxu1 %v5368_v19  ;;  %3494 = vmatprep.mubr.f32.mxu0 %v1755_v31 }
 0x15d   : > { %3581 = vmatprep.subr.mxu0 %v5397_v61  ;;  %3724 = vmatpush3.msra.mxu1 %v5368_v19  ;;  %v5402_v19 = vand.u32 4294901760, %v4682_v37 }
 0x15e   : > { %3495 = vmatmul.mubr.f32.gmra.mxu0 %v1765_v44  ;;  %3645 = vmatmul.mubr.f32.gmra.mxu1 %v1643_v29  ;;  %v5406_v29 = vand.u32 4294901760, %v4727_v8 }
 0x15f   : > { %3582 = vmatpush3.msra.mxu0 %v5397_v61  ;;  %3725 = vmatprep.subr.mxu1 %v5369_v33 }
 0x160   : > { %3583 = vmatprep.subr.mxu0 %v5398_v30  ;;  %3585 = vmatprep.mubr.f32.mxu0 %v4592_v46  ;;  %v5400_v46 = vld [vmem:[#allocation8_spill] sm:$0xff] }
 0x161   : > { %3647 = vmatprep.mubr.f32.mxu1 %v1653_v38  ;;  %3726 = vmatpush3.msra.mxu1 %v5369_v33  ;;  %v5404_v33 = vld [vmem:[#allocation14_spill] sm:$0xff] }
 0x162   : > { %3584 = vmatpush3.msra.mxu0 %v5398_v30  ;;  %3727 = vmatprep.subr.mxu1 %v5370_v20  ;;  %v5412_v38 = vld [vmem:[#allocation26_spill] sm:$0xff] }
 0x163   : > { %3665 = vmatprep.subr.mxu0 %v5399_v45  ;;  %3728 = vmatpush3.msra.mxu1 %v5370_v20  ;;  %v5407_v20 = vand.u32 4294901760, %v4741_v21 }
 0x164   : > { %3586 = vmatmul.mubr.f32.vlgmr.msra.gmra.mxu0 %v4580_v26  ;;  %3648 = vmatmul.mubr.f32.gmra.mxu1 %v1663_v47  ;;  %v5401_v26 = vld [vmem:[#allocation11_spill] sm:$0xff]  ;;  %v5410_v47 = vand.u32 4294901760, %v4759_v58 }
 0x165   : > { %3666 = vmatpush3.msra.mxu0 %v5399_v45  ;;  %3729 = vmatprep.subr.mxu1 %v5372_v48 }
 0x166   : > { %3588 = vmatprep.mubr.f32.mxu0 %v4621_v9  ;;  %3650 = vmatprep.mubr.f32.mxu1 %v1673_v62  ;;  %v5403_v9 = vand.u32 4294901760, %v4704_v15  ;;  %v5416_v62 = vld [vmem:[#allocation34_spill] sm:$0xff] }
 0x167   : > { %3667 = vmatprep.subr.mxu0 %v5400_v46  ;;  %3730 = vmatpush3.msra.mxu1 %v5372_v48  ;;  %v5411_v48 = vand.u32 4294901760, %v4770_v42 }
 0x168   : > { %3668 = vmatpush3.msra.mxu0 %v5400_v46  ;;  %3731 = vmatprep.subr.mxu1 %v5374_v53 }
 0x169   : > { %3669 = vmatprep.subr.mxu0 %v5401_v26  ;;  %3732 = vmatpush3.msra.mxu1 %v5374_v53  ;;  %v5415_v53 = vand.u32 4294901760, %v4799_v16 }
 0x16a   : > { %3589 = vmatmul.mubr.f32.gmra.mxu0 %v4609_v28  ;;  %3651 = vmatmul.mubr.f32.gmra.mxu1 %v5402_v19  ;;  %v5405_v28 = vld [vmem:[#allocation19_spill] sm:$0xff] }
 0x16b   : > { %3670 = vmatpush3.msra.mxu0 %v5401_v26  ;;  %3733 = vmatprep.subr.mxu1 %v5376_v4 }
 0x16c   : > { %3591 = vmatprep.mubr.f32.mxu0 %v4648_v35  ;;  %3653 = vmatprep.mubr.f32.mxu1 %v5403_v9  ;;  %v5408_v35 = vld [vmem:[#allocation20_spill] sm:$0xff] }
 0x16d   : > { %3671 = vmatprep.subr.mxu0 %v5404_v33  ;;  %3734 = vmatpush3.msra.mxu1 %v5376_v4  ;;  %v5418_v4 = vld [vmem:[#allocation38_spill] sm:$0xff] }
 0x16e   : > { %3672 = vmatpush3.msra.mxu0 %v5404_v33  ;;  %3735 = vmatprep.subr.mxu1 %v5378_v57 }
 0x16f   : > { %3673 = vmatprep.subr.mxu0 %v5405_v28  ;;  %3736 = vmatpush3.msra.mxu1 %v5378_v57  ;;  %v5420_v57 = vld [vmem:[#allocation44_spill] sm:$0xff] }
 0x170   : > { %3592 = vmatmul.mubr.f32.gmra.mxu0 %v4639_v34  ;;  %3654 = vmatmul.mubr.f32.gmra.mxu1 %v5406_v29  ;;  %v5409_v34 = vld [vmem:[#allocation23_spill] sm:$0xff] }
 0x171   : > { %3674 = vmatpush3.msra.mxu0 %v5405_v28  ;;  %3737 = vmatprep.subr.mxu1 %v5380_v12 }
 0x172   : > { %3594 = vmatprep.mubr.f32.mxu0 %v4674_v41  ;;  %3656 = vmatprep.mubr.f32.mxu1 %v5407_v20  ;;  %v5413_v41 = vld [vmem:[#allocation29_spill] sm:$0xff] }
 0x173   : > { %3675 = vmatprep.subr.mxu0 %v5408_v35  ;;  %3738 = vmatpush3.msra.mxu1 %v5380_v12 }
 0x174   : > { %3676 = vmatpush3.msra.mxu0 %v5408_v35  ;;  %3739 = vmatprep.subr.mxu1 %v5382_v7 }
 0x175   : > { %3677 = vmatprep.subr.mxu0 %v5409_v34  ;;  %3740 = vmatpush3.msra.mxu1 %v5382_v7 }
 0x176   : > { %3595 = vmatmul.mubr.f32.gmra.mxu0 %v4682_v37  ;;  %3657 = vmatmul.mubr.f32.gmra.mxu1 %v5410_v47  ;;  %v5414_v37 = vand.u32 4294901760, %v4790_v32 }
 0x177   : > { %3678 = vmatpush3.msra.mxu0 %v5409_v34  ;;  %3741 = vmatprep.subr.mxu1 %v5384_v56 }
 0x178   : > { %3597 = vmatprep.mubr.f32.mxu0 %v4704_v15  ;;  %3659 = vmatprep.mubr.f32.mxu1 %v5411_v48  ;;  %v5417_v15 = vld [vmem:[#allocation35_spill] sm:$0xff] }
 0x179   : > { %3679 = vmatprep.subr.mxu0 %v5412_v38  ;;  %3742 = vmatpush3.msra.mxu1 %v5384_v56 }
 0x17a   : > { %3680 = vmatpush3.msra.mxu0 %v5412_v38  ;;  %3743 = vmatprep.subr.mxu1 %v5386_v43 }
 0x17b   : > { %3681 = vmatprep.subr.mxu0 %v5413_v41  ;;  %3744 = vmatpush3.msra.mxu1 %v5386_v43 }
 0x17c   : > { %3598 = vmatmul.mubr.f32.gmra.mxu0 %v4727_v8  ;;  %3660 = vmatmul.mubr.f32.gmra.mxu1 %v5414_v37  ;;  %v5421_v8 = vld [vmem:[#allocation47_spill] sm:$0xff] }
 0x17d   : > { %3682 = vmatpush3.msra.mxu0 %v5413_v41  ;;  %3745 = vmatprep.subr.mxu1 %v5388_v5 }
 0x17e   : > { %3600 = vmatprep.mubr.f32.mxu0 %v4741_v21  ;;  %3662 = vmatprep.mubr.f32.mxu1 %v5415_v53  ;;  %v5422_v21 = vld [vmem:[#allocation49_spill] sm:$0xff]  ;;  %v5081_v53 = vld [vmem:[%s5195_s4] ss:$0 sm:$0xff] }
 0x17f   : > { %3683 = vmatprep.subr.mxu0 %v5416_v62  ;;  %3746 = vmatpush3.msra.mxu1 %v5388_v5 }
 0x180   : > { %3684 = vmatpush3.msra.mxu0 %v5416_v62  ;;  %3747 = vmatprep.subr.mxu1 %v5390_v49 }
 0x181   : > { %3685 = vmatprep.subr.mxu0 %v5417_v15  ;;  %3748 = vmatpush3.msra.mxu1 %v5390_v49 }
 0x182   : > { %3601 = vmatmul.mubr.f32.gmra.mxu0 %v4759_v58  ;;  %3663 = vmatmul.mubr.f32.gmra.mxu1 %v1763_v59 }
 0x183   : > { %3686 = vmatpush3.msra.mxu0 %v5417_v15  ;;  %3749 = vmatprep.subr.mxu1 %v5392_v0 }
 0x184   : > { %3603 = vmatprep.mubr.f32.mxu0 %v4770_v42  ;;  %3687 = vmatprep.subr.mxu0 %v5418_v4 }
 0x185   : > { %3750 = vmatpush3.msra.mxu1 %v5392_v0  ;;  %3753 = vmatprep.mubr.f32.mxu1 %v4583_v50 }
 0x186   : > { %3688 = vmatpush3.msra.mxu0 %v5418_v4  ;;  %3751 = vmatprep.subr.mxu1 %v5394_v23 }
 0x187   : > { %3689 = vmatprep.subr.mxu0 %v5419_v18  ;;  %3752 = vmatpush3.msra.mxu1 %v5394_v23 }
 0x188   : > { %3604 = vmatmul.mubr.f32.gmra.mxu0 %v4790_v32  ;;  %3754 = vmatmul.mubr.f32.vlgmr.msra.gmra.mxu1 %v4573_v54 }
 0x189   : > { %3690 = vmatpush3.msra.mxu0 %v5419_v18  ;;  %3606 = vmatprep.mubr.f32.mxu0 %v4799_v16 }
 0x18a   : > { %3691 = vmatprep.subr.mxu0 %v5420_v57  ;;  %3756 = vmatprep.mubr.f32.mxu1 %v4612_v10 }
 0x18b   : > { %3692 = vmatpush3.msra.mxu0 %v5420_v57 }
 0x18c   : > { %3693 = vmatprep.subr.mxu0 %v5421_v8  ;;  %3607 = vmatmul.mubr.f32.gmra.mxu0 %v4816_v40 }
 0x18d   : > { %3694 = vmatpush3.msra.mxu0 %v5421_v8  ;;  %3757 = vmatmul.mubr.f32.gmra.mxu1 %v4595_v22 }
 0x18e   : > { %3695 = vmatprep.subr.mxu0 %v5422_v21  ;;  %3697 = vmatprep.mubr.f32.mxu0 %v4583_v50 }
 0x18f   : > { %3759 = vmatprep.mubr.f32.mxu1 %v4642_v55  ;;  %3696 = vmatpush3.msra.mxu0 %v5422_v21 }
 0x190   : > { %3698 = vmatmul.mubr.f32.vlgmr.msra.gmra.mxu0 %v4573_v54 }
 0x191   : > { %3760 = vmatmul.mubr.f32.gmra.mxu1 %v4626_v52  ;;  %3700 = vmatprep.mubr.f32.mxu0 %v4612_v10 }
 0x192   : > { %3762 = vmatprep.mubr.f32.mxu1 %v4660_v3 }
 0x194   : > { %3701 = vmatmul.mubr.f32.gmra.mxu0 %v4595_v22 }
 0x195   : > { %3763 = vmatmul.mubr.f32.gmra.mxu1 %v4650_v14  ;;  %3703 = vmatprep.mubr.f32.mxu0 %v4642_v55 }
 0x196   : > { %3765 = vmatprep.mubr.f32.mxu1 %v4690_v13 }
 0x198   : > { %3704 = vmatmul.mubr.f32.gmra.mxu0 %v4626_v52 }
 0x199   : > { %3766 = vmatmul.mubr.f32.gmra.mxu1 %v4698_v24  ;;  %3706 = vmatprep.mubr.f32.mxu0 %v4660_v3 }
 0x19a   : > { %3768 = vmatprep.mubr.f32.mxu1 %v4716_v1 }
 0x19c   : > { %3707 = vmatmul.mubr.f32.gmra.mxu0 %v4650_v14 }
 0x19d   : > { %3769 = vmatmul.mubr.f32.gmra.mxu1 %v4738_v27  ;;  %3709 = vmatprep.mubr.f32.mxu0 %v4690_v13 }
 0x19e   : > { %3771 = vmatprep.mubr.f32.mxu1 %v4747_v63 }
 0x1a0   : > { %3710 = vmatmul.mubr.f32.gmra.mxu0 %v4698_v24 }
 0x1a1   : > { %3772 = vmatmul.mubr.f32.gmra.mxu1 %v4767_v36  ;;  %3712 = vmatprep.mubr.f32.mxu0 %v4716_v1 }
 0x1a2   : > { %3774 = vmatprep.mubr.f32.mxu1 %v4778_v11 }
 0x1a4   : > { %3713 = vmatmul.mubr.f32.gmra.mxu0 %v4738_v27 }
 0x1a5   : > { %3775 = vmatmul.mubr.f32.gmra.mxu1 %v4796_v39  ;;  %3715 = vmatprep.mubr.f32.mxu0 %v4747_v63 }
 0x1a8   : > { %3716 = vmatmul.mubr.f32.gmra.mxu0 %v4767_v36 }
 0x1a9   : > { %3718 = vmatprep.mubr.f32.mxu0 %v4778_v11 }
 0x1ac   : > { %3719 = vmatmul.mubr.f32.gmra.mxu0 %v4796_v39 }
 0x1eb   : > { %v4992_v54 = vpop.f32.mrf.mxu1 }
 0x1ed   : > { %v4994_v50 = vpop.f32.mrf.mxu1 }
 0x1ef   : > { %v4996_v22 = vpop.f32.mrf.mxu1 }
 0x1f1   : > { %v4998_v10 = vpop.f32.mrf.mxu1 }
 0x1f4   : > { %v3475_v52 = vpop.f32.mrf.mxu0  ;;  %v5000_v55 = vpop.f32.mrf.mxu1 }
 0x1f5   : > { %v1628_v57 = vadd.f32 %v3475_v52, %v5081_v53 }
 0x1f6   : > { %v1617_v14 = vpop.f32.mrf.mxu0  ;;  %v5002_v3 = vpop.f32.mrf.mxu1 }
 0x1f7   : > { %v1618_v8 = vadd.f32 %v5081_v53, %v1617_v14 }
 0x1fa   : > { %v3478_v13 = vpop.f32.mrf.mxu0  ;;  %v5004_v24 = vpop.f32.mrf.mxu1 }
 0x1fc   : > { %v1637_v1 = vpop.f32.mrf.mxu0  ;;  %v5006_v27 = vpop.f32.mrf.mxu1 }
 0x200   : > { %v3481_v12 = vpop.f32.mrf.mxu0  ;;  %v5008_v63 = vpop.f32.mrf.mxu1 }
 0x201   : > { %v1668_v52 = vadd.f32 %v3481_v12, %v5081_v53 }
 0x202   : > { %v5010_v31 = vpop.f32.mrf.mxu0  ;;  %v5012_v7 = vpop.f32.mrf.mxu1 }
 0x206   : > { %v5014_v58 = vpop.f32.mrf.mxu0  ;;  %v5016_v36 = vpop.f32.mrf.mxu1 }
 0x208   : > { %v5018_v42 = vpop.f32.mrf.mxu0  ;;  %v5020_v56 = vpop.f32.mrf.mxu1 }
 0x20c   : > { %v5022_v11 = vpop.f32.mrf.mxu0  ;;  %v5024_v40 = vpop.f32.mrf.mxu1 }
 0x20e   : > { %v5026_v43 = vpop.f32.mrf.mxu0  ;;  %v5028_v32 = vpop.f32.mrf.mxu1 }
 0x20f   : > { %5423 = vst [vmem:[#allocation53_spill] sm:$0xff] %v5028_v32  ;;  %v1919_v32 = vadd.f32 %v4994_v50, %v1618_v8  ;;  %v1688_v50 = vadd.f32 %v5014_v58, %v5081_v53 }
 0x212   : > { %v5030_v39 = vpop.f32.mrf.mxu0  ;;  %v5032_v16 = vpop.f32.mrf.mxu1 }
 0x213   : > { %5424 = vst [vmem:[#allocation55_spill] sm:$0xff] %v5032_v16 }
 0x214   : > { %v5034_v5 = vpop.f32.mrf.mxu0  ;;  %v5036_v25 = vpop.f32.mrf.mxu1 }
 0x215   : > { %5425 = vst [vmem:[#allocation50_spill] sm:$0xff] %v5036_v25  ;;  %v1925_v25 = vadd.f32 %v4992_v54, %v1628_v57  ;;  %v1658_v54 = vadd.f32 %v5081_v53, %v5010_v31  ;;  %v1678_v31 = vadd.f32 %v5081_v53, %v5018_v42  ;;  %v1961_v42 = vadd.f32 %v5004_v24, %v1688_v50 }
 0x218   : > { %v5038_v49 = vpop.f32.mrf.mxu0  ;;  %v3643_v60 = vpop.f32.mrf.mxu1 }
 0x21a   : > { %v5040_v0 = vpop.f32.mrf.mxu0  ;;  %v2306_v17 = vpop.f32.mrf.mxu1 }
 0x21e   : > { %v5042_v6 = vpop.f32.mrf.mxu0  ;;  %v5044_v59 = vpop.f32.mrf.mxu1 }
 0x220   : > { %v5046_v23 = vpop.f32.mrf.mxu0  ;;  %v5048_v51 = vpop.f32.mrf.mxu1 }
 0x221   : > { %5426 = vst [vmem:[#allocation57_spill] sm:$0xff] %v5046_v23 }
 0x224   : > { %v3587_v2 = vpop.f32.mrf.mxu0  ;;  %v5050_v44 = vpop.f32.mrf.mxu1 }
 0x226   : > { %v2112_v61 = vpop.f32.mrf.mxu0  ;;  %v5052_v30 = vpop.f32.mrf.mxu1 }
 0x227   : > { %v2113_v14 = vadd.f32 %v2112_v61, %v1919_v32  ;;  %v1949_v32 = vadd.f32 %v5000_v55, %v1668_v52 }
 0x22a   : > { %v3590_v45 = vpop.f32.mrf.mxu0  ;;  %v5054_v46 = vpop.f32.mrf.mxu1 }
 0x22c   : > { %v2126_v26 = vpop.f32.mrf.mxu0  ;;  %v5056_v19 = vpop.f32.mrf.mxu1 }
 0x230   : > { %v3593_v9 = vpop.f32.mrf.mxu0  ;;  %v5058_v33 = vpop.f32.mrf.mxu1 }
 0x231   : > { %v2148_v58 = vadd.f32 %v3593_v9, %v1949_v32 }
 0x232   : > { %v2140_v28 = vpop.f32.mrf.mxu0  ;;  %v5060_v29 = vpop.f32.mrf.mxu1 }
 0x236   : > { %v5062_v20 = vpop.f32.mrf.mxu0  ;;  %v5064_v35 = vpop.f32.mrf.mxu1 }
 0x237   : > { %5427 = vst [vmem:[#allocation51_spill] sm:$0xff] %v5064_v35  ;;  %v2120_v35 = vadd.f32 %v3587_v2, %v1925_v25 }
 0x238   : > { %v5066_v34 = vpop.f32.mrf.mxu0  ;;  %v5068_v47 = vpop.f32.mrf.mxu1 }
 0x239   : > { %5428 = vst [vmem:[#allocation52_spill] sm:$0xff] %v5068_v47  ;;  %v2315_v2 = vadd.f32 %v3643_v60, %v2120_v35 }
 0x23c   : > { %v5070_v48 = vpop.f32.mrf.mxu0  ;;  %v5072_v38 = vpop.f32.mrf.mxu1 }
 0x23d   : > { %5429 = vst [vmem:[#allocation54_spill] sm:$0xff] %v5072_v38  ;;  %v1648_v38 = vadd.f32 %v3478_v13, %v5081_v53 }
 0x23e   : > { %v5074_v41 = vpop.f32.mrf.mxu0  ;;  %v5076_v37 = vpop.f32.mrf.mxu1 }
 0x23f   : > { %5430 = vst [vmem:[#allocation56_spill] sm:$0xff] %v5076_v37 }
 0x242   : > { %v5083_v62 = vpop.f32.mrf.mxu0  ;;  %v5085_v15 = vpop.f32.mrf.mxu1 }
 0x243   : > { %5431 = vst [vmem:[#allocation58_spill] sm:$0xff] %v5085_v15  ;;  %v1638_v15 = vadd.f32 %v5081_v53, %v1637_v1 }
 0x244   : > { %v5087_v4 = vpop.f32.mrf.mxu0  ;;  %v5089_v18 = vpop.f32.mrf.mxu1 }
 0x245   : > { %5432 = vst [vmem:[#allocation2_spill] sm:$0xff] %v5089_v18  ;;  %v1931_v1 = vadd.f32 %v4998_v10, %v1638_v15 }
 0x247   : > { %v2127_v12 = vadd.f32 %v2126_v26, %v1931_v1 }
 0x248   : > { %v5093_v21 = vpop.f32.mrf.mxu0  ;;  %v3755_v37 = vpop.f32.mrf.mxu1 }
 0x249   : > { %5433 = vst [vmem:[#allocation4_spill] sm:$0xff] %v5093_v21  ;;  %v1937_v21 = vadd.f32 %v4996_v22, %v1648_v38  ;;  %v2307_v38 = vadd.f32 %v2306_v17, %v2113_v14  ;;  %v1708_v17 = vadd.f32 %v5022_v11, %v5081_v53  ;;  %v2323_v9 = vadd.f32 %v5048_v51, %v2127_v12 }
 0x24a   : > { %v5097_v47 = vpop.f32.mrf.mxu0  ;;  %v2722_v16 = vpop.f32.mrf.mxu1  ;;  %v1955_v14 = vadd.f32 %v5006_v27, %v1678_v31  ;;  %v1748_v12 = vadd.f32 %v5038_v49, %v5081_v53 }
 0x24b   : > { %v2134_v57 = vadd.f32 %v3590_v45, %v1937_v21  ;;  %v1973_v51 = vadd.f32 %v5008_v63, %v1708_v17 }
 0x24c   : > { %v5101_v18 = vpop.f32.mrf.mxu0 }
 0x24d   : > { %v3758_v23 = vpop.f32.mrf.mxu1  ;;  %v2331_v26 = vadd.f32 %v5044_v59, %v2134_v57 }
 0x24e   : > { %v5107_v13 = vpop.f32.mrf.mxu0 }
 0x24f   : > { %5434 = vst [vmem:[#allocation7_spill] sm:$0xff] %v5107_v13  ;;  %v2734_v25 = vpop.f32.mrf.mxu1  ;;  %v1943_v13 = vadd.f32 %v5002_v3, %v1658_v54  ;;  %v2162_v54 = vadd.f32 %v5062_v20, %v1961_v42  ;;  %v5436_v42 = vld [vmem:[#allocation53_spill] sm:$0xff] }
 0x250   : > { %v3699_v8 = vpop.f32.mrf.mxu0 }
 0x251   : > { %v2552_v22 = vadd.f32 %v3699_v8, %v2315_v2  ;;  %v3761_v61 = vpop.f32.mrf.mxu1  ;;  %v2141_v35 = vadd.f32 %v2140_v28, %v1943_v13  ;;  %v1728_v13 = vadd.f32 %v5030_v39, %v5081_v53  ;;  %v1718_v2 = vadd.f32 %v5081_v53, %v5034_v5 }
 0x252   : > { %v2545_v10 = vpop.f32.mrf.mxu0  ;;  %v2176_v39 = vadd.f32 %v5070_v48, %v1973_v51 }
 0x253   : > { %v2729_v60 = vadd.f32 %v3755_v37, %v2552_v22  ;;  %v2546_v45 = vadd.f32 %v2545_v10, %v2307_v38  ;;  %v2746_v55 = vpop.f32.mrf.mxu1  ;;  %v1698_v37 = vadd.f32 %v5081_v53, %v5026_v43  ;;  %v2155_v43 = vadd.f32 %v5066_v34, %v1955_v14 }
 0x254   : > { %v3702_v3 = vpop.f32.mrf.mxu0  ;;  %v1738_v38 = vadd.f32 %v5081_v53, %v5040_v0 }
 0x255   : > { %2817 = vst [vmem:[%s5120_s9 + $0x8] sm:$0xff] %v2729_v60  ;;  %v2723_v15 = vadd.f32 %v2722_v16, %v2546_v45  ;;  %v2564_v21 = vadd.f32 %v3702_v3, %v2331_v26  ;;  %v3764_v52 = vpop.f32.mrf.mxu1  ;;  %v2347_v16 = vadd.f32 %v5050_v44, %v2148_v58  ;;  %v1967_v44 = vadd.f32 %v5012_v7, %v1698_v37  ;;  %v5435_v26 = vld [vmem:[#allocation57_spill] sm:$0xff] }
 0x256   : > { %v2557_v59 = vpop.f32.mrf.mxu0  ;;  %v1768_v58 = vadd.f32 %v5042_v6, %v5081_v53  ;;  %v1997_v60 = vadd.f32 %v5024_v40, %v1748_v12  ;;  %v1758_v17 = vadd.f32 %v5081_v53, %v5435_v26 }
 0x257   : > { %2816 = vst [vmem:[%s5120_s9] sm:$0xff] %v2723_v15  ;;  %v2741_v11 = vadd.f32 %v3758_v23, %v2564_v21  ;;  %v2558_v24 = vadd.f32 %v2557_v59, %v2323_v9  ;;  %v2758_v28 = vpop.f32.mrf.mxu1  ;;  %v2339_v23 = vadd.f32 %v5052_v30, %v2141_v35  ;;  %v1985_v30 = vadd.f32 %v5016_v36, %v1728_v13  ;;  %v5437_v35 = vld [vmem:[#allocation4_spill] sm:$0xff]  ;;  %v5438_v21 = vld [vmem:[#allocation51_spill] sm:$0xff] }
 0x258   : > { %v3705_v57 = vpop.f32.mrf.mxu0  ;;  %v2169_v5 = vadd.f32 %v5074_v41, %v1967_v44  ;;  %v2379_v41 = vadd.f32 %v5058_v33, %v2176_v39  ;;  %v1991_v33 = vadd.f32 %v5436_v42, %v1738_v38  ;;  %v2204_v6 = vadd.f32 %v5437_v35, %v1997_v60 }
 0x259   : > { %2819 = vst [vmem:[%s5120_s9 + $0x18] sm:$0xff] %v2741_v11  ;;  %v2735_v27 = vadd.f32 %v2734_v25, %v2558_v24  ;;  %v2576_v1 = vadd.f32 %v3705_v57, %v2347_v16  ;;  %v3767_v20 = vpop.f32.mrf.mxu1  ;;  %v2363_v25 = vadd.f32 %v5054_v46, %v2162_v54  ;;  %v1979_v46 = vadd.f32 %v5020_v56, %v1718_v2  ;;  %v5440_v54 = vld [vmem:[#allocation52_spill] sm:$0xff]  ;;  %v5441_v24 = vld [vmem:[#allocation50_spill] sm:$0xff] }
 0x25a   : > { %v2569_v50 = vpop.f32.mrf.mxu0  ;;  %v2190_v49 = vadd.f32 %v5083_v62, %v1985_v30  ;;  %v2371_v62 = vadd.f32 %v5060_v29, %v2169_v5  ;;  %v2197_v29 = vadd.f32 %v5097_v47, %v1991_v33  ;;  %v5443_v47 = vld [vmem:[#allocation7_spill] sm:$0xff] }
 0x25b   : > { %2818 = vst [vmem:[%s5120_s9 + $0x10] sm:$0xff] %v2735_v27  ;;  %v2753_v63 = vadd.f32 %v3761_v61, %v2576_v1  ;;  %v2570_v8 = vadd.f32 %v2569_v50, %v2339_v23  ;;  %v2770_v34 = vpop.f32.mrf.mxu1  ;;  %v2355_v61 = vadd.f32 %v5056_v19, %v2155_v43  ;;  %v2183_v0 = vadd.f32 %v5087_v4, %v1979_v46  ;;  %v5442_v43 = vld [vmem:[#allocation54_spill] sm:$0xff]  ;;  %v5444_v50 = vld [vmem:[#allocation56_spill] sm:$0xff] }
 0x25c   : > { %v3708_v32 = vpop.f32.mrf.mxu0  ;;  %v2395_v4 = vadd.f32 %v5438_v21, %v2190_v49  ;;  %v2411_v27 = vadd.f32 %v5442_v43, %v2204_v6  ;;  %v2403_v39 = vadd.f32 %v5444_v50, %v2197_v29 }
 0x25d   : > { %2821 = vst [vmem:[%s5120_s9 + $0x28] sm:$0xff] %v2753_v63  ;;  %v2747_v7 = vadd.f32 %v2746_v55, %v2570_v8  ;;  %v2588_v22 = vadd.f32 %v3708_v32, %v2363_v25  ;;  %v3770_v48 = vpop.f32.mrf.mxu1  ;;  %v2387_v11 = vadd.f32 %v5440_v54, %v2183_v0 }
 0x25e   : > { %v2581_v31 = vpop.f32.mrf.mxu0 }
 0x25f   : > { %2820 = vst [vmem:[%s5120_s9 + $0x20] sm:$0xff] %v2747_v7  ;;  %v2765_v36 = vadd.f32 %v3764_v52, %v2588_v22  ;;  %v2582_v10 = vadd.f32 %v2581_v31, %v2355_v61  ;;  %v2782_v19 = vpop.f32.mrf.mxu1  ;;  %v5439_v52 = vld [vmem:[#allocation55_spill] sm:$0xff]  ;;  %v5446_v7 = vld [vmem:[#allocation2_spill] sm:$0xff] }
 0x260   : > { %v3711_v45 = vpop.f32.mrf.mxu0  ;;  %v2009_v9 = vadd.f32 %v5439_v52, %v1768_v58 }
 0x261   : > { %2823 = vst [vmem:[%s5120_s9 + $0x38] sm:$0xff] %v2765_v36  ;;  %v2759_v56 = vadd.f32 %v2758_v28, %v2582_v10  ;;  %v2600_v55 = vadd.f32 %v3711_v45, %v2379_v41  ;;  %v3773_v37 = vpop.f32.mrf.mxu1  ;;  %v2003_v28 = vadd.f32 %v5441_v24, %v1758_v17 }
 0x262   : > { %v2593_v3 = vpop.f32.mrf.mxu0  ;;  %v2218_v13 = vadd.f32 %v5101_v18, %v2009_v9 }
 0x263   : > { %2822 = vst [vmem:[%s5120_s9 + $0x30] sm:$0xff] %v2759_v56  ;;  %v2777_v40 = vadd.f32 %v3767_v20, %v2600_v55  ;;  %v2594_v15 = vadd.f32 %v2593_v3, %v2371_v62  ;;  %v2794_v1 = vpop.f32.mrf.mxu1  ;;  %v2211_v23 = vadd.f32 %v5443_v47, %v2003_v28 }
 0x264   : > { %v3714_v14 = vpop.f32.mrf.mxu0 }
 0x265   : > { %2825 = vst [vmem:[%s5120_s9 + $0x48] sm:$0xff] %v2777_v40  ;;  %v2771_v53 = vadd.f32 %v2770_v34, %v2594_v15  ;;  %v2612_v59 = vadd.f32 %v3714_v14, %v2395_v4  ;;  %v5445_v34 = vld [vmem:[#allocation58_spill] sm:$0xff]  ;;  %v3776_v12 = vpop.f32.mrf.mxu1  ;;  %v2419_v22 = vadd.f32 %v5446_v7, %v2211_v23 }
 0x266   : > { %v2605_v16 = vpop.f32.mrf.mxu0  ;;  %v2427_v25 = vadd.f32 %v5445_v34, %v2218_v13 }
 0x267   : > { %2824 = vst [vmem:[%s5120_s9 + $0x40] sm:$0xff] %v2771_v53  ;;  %v2789_v51 = vadd.f32 %v3770_v48, %v2612_v59  ;;  %v2606_v57 = vadd.f32 %v2605_v16, %v2387_v11  ;;  %v2806_v46 = vpop.f32.mrf.mxu1 }
 0x268   : > { %v3717_v20 = vpop.f32.mrf.mxu0 }
 0x269   : > { %2827 = vst [vmem:[%s5120_s9 + $0x58] sm:$0xff] %v2789_v51  ;;  %v2783_v2 = vadd.f32 %v2782_v19, %v2606_v57  ;;  %v2624_v44 = vadd.f32 %v3717_v20, %v2411_v27 }
 0x26a   : > { %v2617_v63 = vpop.f32.mrf.mxu0 }
 0x26b   : > { %2826 = vst [vmem:[%s5120_s9 + $0x50] sm:$0xff] %v2783_v2  ;;  %v2801_v18 = vadd.f32 %v3773_v37, %v2624_v44  ;;  %v2618_v8 = vadd.f32 %v2617_v63, %v2403_v39 }
 0x26c   : > { %v3720_v30 = vpop.f32.mrf.mxu0 }
 0x26d   : > { %2829 = vst [vmem:[%s5120_s9 + $0x68] sm:$0xff] %v2801_v18  ;;  %v2795_v32 = vadd.f32 %v2794_v1, %v2618_v8  ;;  %v2636_v5 = vadd.f32 %v3720_v30, %v2427_v25 }
 0x26e   : > { %v2629_v48 = vpop.f32.mrf.mxu0 }
 0x26f   : > { %2828 = vst [vmem:[%s5120_s9 + $0x60] sm:$0xff] %v2795_v32  ;;  %v2813_v61 = vadd.f32 %v3776_v12, %v2636_v5  ;;  %v2630_v38 = vadd.f32 %v2629_v48, %v2419_v22 }
 0x271   : > { %2831 = vst [vmem:[%s5120_s9 + $0x78] sm:$0xff] %v2813_v61  ;;  %v2807_v31 = vadd.f32 %v2806_v46, %v2630_v38 }
 0x273   : > { %2830 = vst [vmem:[%s5120_s9 + $0x70] sm:$0xff] %v2807_v31 }
 0x274 PF: > { %s17_s21 = sadd.s32 1, %s3791_s21  }
 0x275   : > { %p14_p4 = scmp.ge.s32.totalorder %s17_s21, 4  }
 0x277   :  { %16 = sbr.rel (!%p14_p4) target bundleno = 1 (0x1), region = 82 }

// kernel: _forward_impl.1
= control target key start
LH: loop header
LB: loop body
LE: loop exit
PB: predicated region body
PF: predicated region fallthrough
CT: control target
= control target key end

     0   :  { %s3828_s21 = smov 0   ;;  %s5191_s0 = inlined_call_operand.vmem [shape: f32[256,32], index: 0, kind: input, shape index: {}]   ;;  %s5192_s1 = inlined_call_operand.vmem [shape: f32[32,128], index: 1, kind: input, shape index: {}]   ;;  %s5193_s2 = inlined_call_operand.vmem [shape: f32[1,128], index: 2, kind: input, shape index: {}]   ;;  %s5194_s3 = inlined_call_operand.vmem [shape: f32[128,128], index: 3, kind: input, shape index: {}]   ;;  %s5195_s4 = inlined_call_operand.vmem [shape: f32[1,128], index: 4, kind: input, shape index: {}]   ;;  %s5196_s5 = inlined_call_operand.vmem [shape: f32[256,128], index: 5, kind: output, shape index: {0}]   ;;  %s5197_s6 = inlined_call_operand.vmem [shape: f32[256,128], index: 6, kind: output, shape index: {1}]  }
   0x1 LB: > { %s2922_s22 = sadd.s32 4294967295, %s3791_s21   ;;  %p2926_p0 = scmp.ge.s32.totalorder %s3791_s21, 1  ;;  %s3791_s21 = sphi %s3828_s21, %s17_s21  }
   0x2   : > { %p216_p1 = scmp.lt.s32.totalorder %s3791_s21, 3 }
   0x4   : > { %p217_p2 = pnand %p2926_p0, %p216_p1 }
   0x6   : > { %220 = sbr.rel (%p217_p2) target bundleno = 628 (0x274), region = 40 }
   0xb   : > { %v288_v0 = vld [vmem:[%s5192_s1 + $0x18] sm:$0xff]  ;;  %v287_v1 = vld [vmem:[%s5192_s1 + $0x10] sm:$0xff]  ;;  %v286_v2 = vld [vmem:[%s5192_s1 + $0x8] sm:$0xff]  ;;  %s2927_s29 = sshll.u32 %s2922_s22, 4  ;;  %vm296_vm0 = vcmask 261120  }
   0xc   : > { %v3845_v3 = vand.u32 4294901760, %v288_v0  ;;  %v3847_v4 = vand.u32 4294901760, %v287_v1  ;;  %v3849_v5 = vand.u32 4294901760, %v286_v2  ;;  %v285_v6 = vld [vmem:[%s5192_s1] sm:$0xff]  ;;  %p252_p3 = scmp.lt.s32.totalorder %s2927_s29, 31 }
   0xd   : > { %v3854_v7 = vand.u32 4294901760, %v285_v6 }
   0xe   : > { %3249 = vmatprep.subr.mxu0 %v3845_v3  ;;  %v3858_v8 = vsub.f32 %v288_v0, %v3845_v3  ;;  %v3861_v9 = vsub.f32 %v287_v1, %v3847_v4  ;;  %v3864_v10 = vsub.f32 %v286_v2, %v3849_v5  ;;  %s5448_s29 = smov (!%p252_p3, %s2927_s29), 31 }
   0xf   : > { %3250 = vmatpush3.msra.mxu0 %v3845_v3  ;;  %v3868_v11 = vsub.f32 %v285_v6, %v3854_v7  ;;  %s3880_s8 = sshll.u32 %s5448_s29, 3 }
  0x10   : > { %v3871_v12 = vand.u32 4294901760, %v3858_v8  ;;  %3251 = vmatprep.subr.mxu0 %v3847_v4  ;;  %v3875_v13 = vand.u32 4294901760, %v3861_v9  ;;  %v3878_v14 = vand.u32 4294901760, %v3864_v10  ;;  %s3890_s11 = scalar_lea.vmem %s5191_s0, %s3880_s8  ;;  %s4565_s27 = scalar_lea.vmem %s5197_s6, %s3880_s8 }
  0x11   : > { %3252 = vmatpush3.msra.mxu0 %v3847_v4  ;;  %v3884_v15 = vand.u32 4294901760, %v3868_v11  ;;  %v269_v19 = vld [vmem:[%s3890_s11] sm:$0xff]  ;;  %v270_v20 = vld [vmem:[%s3890_s11 + $0x8] sm:$0xff]  ;;  %v271_v21 = vld [vmem:[%s3890_s11 + $0x10] sm:$0xff]  ;;  %s5120_s9 = scalar_lea.vmem %s5196_s5, %s3880_s8 }
  0x12   : > { %v602_v16 = vsub.f32 %v3858_v8, %v3871_v12  ;;  %v609_v17 = vsub.f32 %v3861_v9, %v3875_v13  ;;  %3253 = vmatprep.subr.mxu0 %v3849_v5  ;;  %v616_v18 = vsub.f32 %v3864_v10, %v3878_v14  ;;  %v298_v23 = vsel %vm296_vm0, %v269_v19, 0  ;;  %v272_v26 = vld [vmem:[%s3890_s11 + $0x18] sm:$0xff]  ;;  %v273_v27 = vld [vmem:[%s3890_s11 + $0x20] sm:$0xff]  ;;  %v274_v28 = vld [vmem:[%s3890_s11 + $0x28] sm:$0xff] }
  0x13   : > { %3254 = vmatpush3.msra.mxu0 %v3849_v5  ;;  %v623_v22 = vsub.f32 %v3868_v11, %v3884_v15  ;;  %v301_v24 = vsel %vm296_vm0, %v270_v20, 0  ;;  %v304_v25 = vsel %vm296_vm0, %v271_v21, 0  ;;  %v3912_v32 = vand.u32 4294901760, %v298_v23  ;;  %v275_v37 = vld [vmem:[%s3890_s11 + $0x30] sm:$0xff]  ;;  %v276_v38 = vld [vmem:[%s3890_s11 + $0x38] sm:$0xff]  ;;  %v277_v63 = vld [vmem:[%s3890_s11 + $0x40] sm:$0xff] }
  0x14   : > { %v603_v29 = vand.u32 4294901760, %v602_v16  ;;  %v610_v30 = vand.u32 4294901760, %v609_v17  ;;  %v617_v31 = vand.u32 4294901760, %v616_v18  ;;  %3255 = vmatprep.subr.mxu0 %v3854_v7  ;;  %v3915_v34 = vand.u32 4294901760, %v301_v24  ;;  %v278_v16 = vld [vmem:[%s3890_s11 + $0x48] sm:$0xff]  ;;  %v279_v21 = vld [vmem:[%s3890_s11 + $0x50] sm:$0xff] }
  0x15   : > { %3256 = vmatpush3.msra.mxu0 %v3854_v7  ;;  %v624_v33 = vand.u32 4294901760, %v623_v22  ;;  %v3917_v35 = vand.u32 4294901760, %v304_v25  ;;  %v307_v36 = vsel %vm296_vm0, %v272_v26, 0  ;;  %v3923_v39 = vsub.f32 %v298_v23, %v3912_v32  ;;  %3289 = vmatprep.mubr.f32.mxu1 %v3912_v32  ;;  %v281_v26 = vld [vmem:[%s3890_s11 + $0x60] sm:$0xff] }
  0x16   : > { %3281 = vmatprep.subr.mxu1 %v603_v29  ;;  %v3926_v40 = vand.u32 4294901760, %v307_v36  ;;  %v310_v41 = vsel %vm296_vm0, %v273_v27, 0  ;;  %v313_v42 = vsel %vm296_vm0, %v274_v28, 0  ;;  %3313 = vmatprep.subr.mxu0 %v3858_v8  ;;  %v3932_v43 = vsub.f32 %v301_v24, %v3915_v34 }
  0x17   : > { %3282 = vmatpush3.msra.mxu1 %v603_v29  ;;  %v3935_v44 = vsub.f32 %v304_v25, %v3917_v35  ;;  %v3937_v45 = vand.u32 4294901760, %v310_v41  ;;  %v3939_v46 = vand.u32 4294901760, %v313_v42  ;;  %v416_v47 = vand.u32 4294901760, %v3923_v39  ;;  %v280_v25 = vld [vmem:[%s3890_s11 + $0x58] sm:$0xff] }
  0x18   : > { %3283 = vmatprep.subr.mxu1 %v610_v30  ;;  %v3943_v48 = vsub.f32 %v307_v36, %v3926_v40  ;;  %v316_v49 = vsel %vm296_vm0, %v275_v37, 0  ;;  %v319_v50 = vsel %vm296_vm0, %v276_v38, 0  ;;  %v426_v51 = vand.u32 4294901760, %v3932_v43  ;;  %v282_v38 = vld [vmem:[%s3890_s11 + $0x68] sm:$0xff] }
  0x19   : > { %3284 = vmatpush3.msra.mxu1 %v610_v30  ;;  %v436_v52 = vand.u32 4294901760, %v3935_v44  ;;  %v3950_v53 = vsub.f32 %v310_v41, %v3937_v45  ;;  %v3953_v54 = vsub.f32 %v313_v42, %v3939_v46  ;;  %v417_v55 = vsub.f32 %v3923_v39, %v416_v47 }
  0x1a   : > { %3285 = vmatprep.subr.mxu1 %v617_v31  ;;  %v446_v56 = vand.u32 4294901760, %v3943_v48  ;;  %v3959_v57 = vand.u32 4294901760, %v316_v49  ;;  %v3961_v58 = vand.u32 4294901760, %v319_v50  ;;  %v427_v59 = vsub.f32 %v3932_v43, %v426_v51 }
  0x1b   : > { %3286 = vmatpush3.msra.mxu1 %v617_v31  ;;  %v437_v60 = vsub.f32 %v3935_v44, %v436_v52  ;;  %v456_v61 = vand.u32 4294901760, %v3950_v53  ;;  %v466_v62 = vand.u32 4294901760, %v3953_v54  ;;  %v418_v0 = vand.u32 4294901760, %v417_v55 }
  0x1c   : > { %3287 = vmatprep.subr.mxu1 %v624_v33  ;;  %v447_v1 = vsub.f32 %v3943_v48, %v446_v56  ;;  %v3976_v2 = vsub.f32 %v316_v49, %v3959_v57  ;;  %v3979_v6 = vsub.f32 %v319_v50, %v3961_v58  ;;  %v428_v17 = vand.u32 4294901760, %v427_v59  ;;  %v283_v50 = vld [vmem:[%s3890_s11 + $0x70] sm:$0xff] }
  0x1d   : > { %3288 = vmatpush3.msra.mxu1 %v624_v33  ;;  %v438_v18 = vand.u32 4294901760, %v437_v60  ;;  %v457_v19 = vsub.f32 %v3950_v53, %v456_v61  ;;  %v467_v20 = vsub.f32 %v3953_v54, %v466_v62  ;;  %3257 = vmatprep.mubr.f32.mxu0 %v418_v0  ;;  %v322_v24 = vsel %vm296_vm0, %v277_v63, 0 }
  0x1e   : > { %3290 = vmatmul.mubr.f32.vlgmr.msra.gmra.mxu1 %v3915_v34  ;;  %v476_v22 = vand.u32 4294901760, %v3976_v2  ;;  %v486_v23 = vand.u32 4294901760, %v3979_v6  ;;  %3258 = vmatmul.mubr.f32.vlgmr.msra.gmra.mxu0 %v428_v17  ;;  %v448_v27 = vand.u32 4294901760, %v447_v1  ;;  %v3996_v29 = vand.u32 4294901760, %v322_v24 }
  0x1f   : > { %3345 = vmatprep.subr.mxu1 %v3845_v3  ;;  %v458_v28 = vand.u32 4294901760, %v457_v19  ;;  %v325_v30 = vsel %vm296_vm0, %v278_v16, 0  ;;  %3314 = vmatpush3.msra.mxu0 %v3858_v8  ;;  %v468_v31 = vand.u32 4294901760, %v467_v20  ;;  %v328_v37 = vsel %vm296_vm0, %v279_v21, 0 }
  0x20   : > { %3346 = vmatpush3.msra.mxu1 %v3845_v3  ;;  %v477_v33 = vsub.f32 %v3976_v2, %v476_v22  ;;  %v4004_v36 = vand.u32 4294901760, %v325_v30  ;;  %3260 = vmatprep.mubr.f32.mxu0 %v438_v18  ;;  %v4010_v41 = vsub.f32 %v322_v24, %v3996_v29  ;;  %v4012_v42 = vand.u32 4294901760, %v328_v37  ;;  %v284_v18 = vld [vmem:[%s3890_s11 + $0x78] sm:$0xff] }
  0x21   : > { %3292 = vmatprep.mubr.f32.mxu1 %v3917_v35  ;;  %v331_v8 = vsel %vm296_vm0, %v280_v25, 0  ;;  %v334_v49 = vsel %vm296_vm0, %v281_v26, 0  ;;  %3315 = vmatprep.subr.mxu0 %v3861_v9  ;;  %v487_v59 = vsub.f32 %v3979_v6, %v486_v23  ;;  %v337_v17 = vsel %vm296_vm0, %v282_v38, 0 }
  0x22   : > { %3293 = vmatmul.mubr.f32.gmra.mxu1 %v3926_v40  ;;  %v478_v55 = vand.u32 4294901760, %v477_v33  ;;  %v4023_v60 = vsub.f32 %v325_v30, %v4004_v36  ;;  %v4025_v63 = vand.u32 4294901760, %v331_v8  ;;  %3261 = vmatmul.mubr.f32.gmra.mxu0 %v448_v27  ;;  %v496_v0 = vand.u32 4294901760, %v4010_v41 }
  0x23   : > { %3295 = vmatprep.mubr.f32.mxu1 %v3937_v45  ;;  %v4030_v1 = vsub.f32 %v328_v37, %v4012_v42  ;;  %v4032_v16 = vand.u32 4294901760, %v334_v49  ;;  %3263 = vmatprep.mubr.f32.mxu0 %v458_v28  ;;  %v4041_v21 = vand.u32 4294901760, %v337_v17  ;;  %v340_v24 = vsel %vm296_vm0, %v283_v50, 0 }
  0x24   : > { %3316 = vmatpush3.msra.mxu0 %v3861_v9  ;;  %v506_v19 = vand.u32 4294901760, %v4023_v60  ;;  %v4039_v20 = vsub.f32 %v331_v8, %v4025_v63  ;;  %3347 = vmatprep.subr.mxu1 %v3847_v4  ;;  %v497_v25 = vsub.f32 %v4010_v41, %v496_v0  ;;  %v4053_v27 = vand.u32 4294901760, %v340_v24 }
  0x25   : > { %3317 = vmatprep.subr.mxu0 %v3864_v10  ;;  %v516_v26 = vand.u32 4294901760, %v4030_v1  ;;  %v4051_v9 = vsub.f32 %v334_v49, %v4032_v16  ;;  %v488_v28 = vand.u32 4294901760, %v487_v59  ;;  %v343_v30 = vsel %vm296_vm0, %v284_v18, 0  ;;  %3348 = vmatpush3.msra.mxu1 %v3847_v4 }
  0x26   : > { %3296 = vmatmul.mubr.f32.gmra.mxu1 %v3939_v46  ;;  %3318 = vmatpush3.msra.mxu0 %v3864_v10  ;;  %v498_v33 = vand.u32 4294901760, %v497_v25  ;;  %v507_v37 = vsub.f32 %v4023_v60, %v506_v19  ;;  %v526_v38 = vand.u32 4294901760, %v4039_v20  ;;  %v4064_v8 = vsub.f32 %v337_v17, %v4041_v21 }
  0x27   : > { %3264 = vmatmul.mubr.f32.gmra.mxu0 %v468_v31  ;;  %3298 = vmatprep.mubr.f32.mxu1 %v3959_v57  ;;  %v517_v10 = vsub.f32 %v4030_v1, %v516_v26  ;;  %v536_v31 = vand.u32 4294901760, %v4051_v9  ;;  %v4072_v49 = vsub.f32 %v340_v24, %v4053_v27  ;;  %v4074_v50 = vand.u32 4294901760, %v343_v30 }
  0x28   : > { %3266 = vmatprep.mubr.f32.mxu0 %v478_v55  ;;  %3349 = vmatprep.subr.mxu1 %v3849_v5  ;;  %v508_v55 = vand.u32 4294901760, %v507_v37  ;;  %v527_v59 = vsub.f32 %v4039_v20, %v526_v38  ;;  %v546_v17 = vand.u32 4294901760, %v4064_v8 }
  0x29   : > { %3319 = vmatprep.subr.mxu0 %v3868_v11  ;;  %v4086_v18 = vsub.f32 %v343_v30, %v4074_v50  ;;  %3350 = vmatpush3.msra.mxu1 %v3849_v5  ;;  %v518_v24 = vand.u32 4294901760, %v517_v10  ;;  %v556_v25 = vand.u32 4294901760, %v4072_v49 }
  0x2a   : > { %3299 = vmatmul.mubr.f32.gmra.mxu1 %v3961_v58  ;;  %3320 = vmatpush3.msra.mxu0 %v3868_v11  ;;  %v537_v11 = vsub.f32 %v4051_v9, %v536_v31  ;;  %v547_v30 = vsub.f32 %v4064_v8, %v546_v17 }
  0x2b   : > { %3267 = vmatmul.mubr.f32.gmra.mxu0 %v488_v28  ;;  %3301 = vmatprep.mubr.f32.mxu1 %v3996_v29  ;;  %v528_v28 = vand.u32 4294901760, %v527_v59  ;;  %v557_v10 = vsub.f32 %v4072_v49, %v556_v25 }
  0x2c   : > { %3269 = vmatprep.mubr.f32.mxu0 %v498_v33  ;;  %3351 = vmatprep.subr.mxu1 %v3854_v7  ;;  %v566_v33 = vand.u32 4294901760, %v4086_v18  ;;  %v538_v37 = vand.u32 4294901760, %v537_v11 }
  0x2d   : > { %3377 = vmatprep.subr.mxu0 %v3871_v12  ;;  %3352 = vmatpush3.msra.mxu1 %v3854_v7 }
  0x2e   : > { %3302 = vmatmul.mubr.f32.gmra.mxu1 %v4004_v36  ;;  %3409 = vmatprep.subr.mxu1 %v3845_v3  ;;  %v567_v59 = vsub.f32 %v4086_v18, %v566_v33 }
  0x2f   : > { %3270 = vmatmul.mubr.f32.gmra.mxu0 %v508_v55  ;;  %3304 = vmatprep.mubr.f32.mxu1 %v4012_v42  ;;  %v548_v55 = vand.u32 4294901760, %v547_v30  ;;  %v1511_v30 = vld [vmem:[%s5194_s3 + $0x20] sm:$0xff] }
  0x30   : > { %3272 = vmatprep.mubr.f32.mxu0 %v518_v24  ;;  %v558_v24 = vand.u32 4294901760, %v557_v10  ;;  %v568_v11 = vand.u32 4294901760, %v567_v59 }
  0x32   : > { %3305 = vmatmul.mubr.f32.gmra.mxu1 %v4025_v63 }
  0x33   : > { %3273 = vmatmul.mubr.f32.gmra.mxu0 %v528_v28  ;;  %3307 = vmatprep.mubr.f32.mxu1 %v4032_v16 }
  0x34   : > { %3275 = vmatprep.mubr.f32.mxu0 %v538_v37 }
  0x36   : > { %3308 = vmatmul.mubr.f32.gmra.mxu1 %v4041_v21 }
  0x37   : > { %3276 = vmatmul.mubr.f32.gmra.mxu0 %v548_v55  ;;  %3310 = vmatprep.mubr.f32.mxu1 %v4053_v27  ;;  %v4363_v55 = vand.u32 4294901760, %v1511_v30 }
  0x38   : > { %3278 = vmatprep.mubr.f32.mxu0 %v558_v24  ;;  %v1510_v24 = vld [vmem:[%s5194_s3 + $0x18] sm:$0xff] }
  0x39   : > { %5332 = vst [vmem:[#allocation33_spill] sm:$0xff] %v4363_v55 }
  0x3a   : > { %3311 = vmatmul.mubr.f32.gmra.mxu1 %v4074_v50 }
  0x3b   : > { %3279 = vmatmul.mubr.f32.gmra.mxu0 %v568_v11  ;;  %3353 = vmatprep.mubr.f32.mxu1 %v416_v47 }
  0x3c   : > { %3321 = vmatprep.mubr.f32.mxu0 %v3923_v39 }
  0x3e   : > { %3354 = vmatmul.mubr.f32.vlgmr.msra.gmra.mxu1 %v426_v51 }
  0x3f   : > { %3322 = vmatmul.mubr.f32.vlgmr.msra.gmra.mxu0 %v3932_v43  ;;  %3410 = vmatpush3.msra.mxu1 %v3845_v3  ;;  %v1522_v3 = vld [vmem:[%s5194_s3 + $0x78] sm:$0xff] }
  0x40   : > { %3378 = vmatpush3.msra.mxu0 %v3871_v12  ;;  %3324 = vmatprep.mubr.f32.mxu0 %v3935_v44  ;;  %v1518_v44 = vld [vmem:[%s5194_s3 + $0x58] sm:$0xff] }
  0x41   : > { %3356 = vmatprep.mubr.f32.mxu1 %v436_v52  ;;  %3379 = vmatprep.subr.mxu0 %v3875_v13  ;;  %v4263_v51 = vand.u32 4294901760, %v1518_v44  ;;  %v1517_v52 = vld [vmem:[%s5194_s3 + $0x50] sm:$0xff] }
  0x42   : > { %3357 = vmatmul.mubr.f32.gmra.mxu1 %v446_v56  ;;  %3380 = vmatpush3.msra.mxu0 %v3875_v13  ;;  %v1520_v13 = vld [vmem:[%s5194_s3 + $0x68] sm:$0xff] }
  0x43   : > { %3325 = vmatmul.mubr.f32.gmra.mxu0 %v3943_v48  ;;  %3359 = vmatprep.mubr.f32.mxu1 %v456_v61  ;;  %5312 = vst [vmem:[#allocation13_spill] sm:$0xff] %v4263_v51  ;;  %v1516_v61 = vld [vmem:[%s5194_s3 + $0x48] sm:$0xff] }
  0x44   : > { %3327 = vmatprep.mubr.f32.mxu0 %v3950_v53  ;;  %3411 = vmatprep.subr.mxu1 %v3847_v4 }
  0x45   : > { %3412 = vmatpush3.msra.mxu1 %v3847_v4  ;;  %3381 = vmatprep.subr.mxu0 %v3878_v14  ;;  %v4211_v4 = vand.u32 4294901760, %v1522_v3 }
  0x46   : > { %3360 = vmatmul.mubr.f32.gmra.mxu1 %v466_v62  ;;  %3382 = vmatpush3.msra.mxu0 %v3878_v14 }
  0x47   : > { %3328 = vmatmul.mubr.f32.gmra.mxu0 %v3953_v54  ;;  %3362 = vmatprep.mubr.f32.mxu1 %v476_v22  ;;  %5301 = vst [vmem:[#allocation2_spill] sm:$0xff] %v4211_v4  ;;  %v4288_v22 = vand.u32 4294901760, %v1516_v61 }
  0x48   : > { %3330 = vmatprep.mubr.f32.mxu0 %v3976_v2  ;;  %3413 = vmatprep.subr.mxu1 %v3849_v5 }
  0x49   : > { %3414 = vmatpush3.msra.mxu1 %v3849_v5  ;;  %3383 = vmatprep.subr.mxu0 %v3884_v15  ;;  %v1521_v5 = vld [vmem:[%s5194_s3 + $0x70] sm:$0xff]  ;;  %5317 = vst [vmem:[#allocation18_spill] sm:$0xff] %v4288_v22 }
  0x4a   : > { %3363 = vmatmul.mubr.f32.gmra.mxu1 %v486_v23  ;;  %3384 = vmatpush3.msra.mxu0 %v3884_v15  ;;  %v4219_v12 = vand.u32 4294901760, %v1521_v5 }
  0x4b   : > { %3331 = vmatmul.mubr.f32.gmra.mxu0 %v3979_v6  ;;  %3365 = vmatprep.mubr.f32.mxu1 %v496_v0  ;;  %v1514_v0 = vld [vmem:[%s5194_s3 + $0x38] sm:$0xff] }
  0x4c   : > { %3333 = vmatprep.mubr.f32.mxu0 %v4010_v41  ;;  %3415 = vmatprep.subr.mxu1 %v3854_v7  ;;  %5303 = vst [vmem:[#allocation4_spill] sm:$0xff] %v4219_v12  ;;  %v4230_v15 = vsub.f32 %v1521_v5, %v4219_v12  ;;  %v4377_v5 = vsub.f32 %v1511_v30, %v4363_v55 }
  0x4d   : > { %3416 = vmatpush3.msra.mxu1 %v3854_v7  ;;  %v4217_v7 = vsub.f32 %v1522_v3, %v4211_v4  ;;  %3441 = vmatprep.subr.mxu0 %v4211_v4 }
  0x4e   : > { %3366 = vmatmul.mubr.f32.gmra.mxu1 %v506_v19  ;;  %5305 = vst [vmem:[#allocation6_spill] sm:$0xff] %v4230_v15  ;;  %v4242_v39 = vand.u32 4294901760, %v4230_v15  ;;  %5335 = vst [vmem:[#allocation36_spill] sm:$0xff] %v4377_v5 }
  0x4f   : > { %3334 = vmatmul.mubr.f32.gmra.mxu0 %v4023_v60  ;;  %3368 = vmatprep.mubr.f32.mxu1 %v516_v26  ;;  %5302 = vst [vmem:[#allocation3_spill] sm:$0xff] %v4217_v7  ;;  %v4227_v14 = vand.u32 4294901760, %v4217_v7  ;;  %v1513_v26 = vld [vmem:[%s5194_s3 + $0x30] sm:$0xff] }
  0x50   : > { %3336 = vmatprep.mubr.f32.mxu0 %v4030_v1  ;;  %5307 = vst [vmem:[#allocation8_spill] sm:$0xff] %v4242_v39 }
  0x51   : > { %5304 = vst [vmem:[#allocation5_spill] sm:$0xff] %v4227_v14 }
  0x52   : > { %3369 = vmatmul.mubr.f32.gmra.mxu1 %v526_v38 }
  0x53   : > { %3337 = vmatmul.mubr.f32.gmra.mxu0 %v4039_v20  ;;  %3371 = vmatprep.mubr.f32.mxu1 %v536_v31  ;;  %v4321_v20 = vand.u32 4294901760, %v1514_v0  ;;  %v4337_v31 = vand.u32 4294901760, %v1513_v26 }
  0x54   : > { %3339 = vmatprep.mubr.f32.mxu0 %v4051_v9 }
  0x55   : > { %5324 = vst [vmem:[#allocation25_spill] sm:$0xff] %v4321_v20  ;;  %5327 = vst [vmem:[#allocation28_spill] sm:$0xff] %v4337_v31  ;;  %v4352_v28 = vsub.f32 %v1513_v26, %v4337_v31 }
  0x56   : > { %3372 = vmatmul.mubr.f32.gmra.mxu1 %v546_v17 }
  0x57   : > { %3340 = vmatmul.mubr.f32.gmra.mxu0 %v4064_v8  ;;  %3374 = vmatprep.mubr.f32.mxu1 %v556_v25  ;;  %v4334_v8 = vsub.f32 %v1514_v0, %v4321_v20  ;;  %5330 = vst [vmem:[#allocation31_spill] sm:$0xff] %v4352_v28  ;;  %v4367_v59 = vand.u32 4294901760, %v4352_v28 }
  0x58   : > { %3342 = vmatprep.mubr.f32.mxu0 %v4072_v49  ;;  %v1512_v49 = vld [vmem:[%s5194_s3 + $0x28] sm:$0xff] }
  0x59   : > { %5326 = vst [vmem:[#allocation27_spill] sm:$0xff] %v4334_v8  ;;  %v4348_v25 = vand.u32 4294901760, %v1512_v49  ;;  %5333 = vst [vmem:[#allocation34_spill] sm:$0xff] %v4367_v59 }
  0x5a   : > { %3375 = vmatmul.mubr.f32.gmra.mxu1 %v566_v33 }
  0x5b   : > { %3343 = vmatmul.mubr.f32.gmra.mxu0 %v4086_v18  ;;  %3417 = vmatprep.mubr.f32.mxu1 %v3912_v32  ;;  %v4346_v18 = vand.u32 4294901760, %v4334_v8  ;;  %5329 = vst [vmem:[#allocation30_spill] sm:$0xff] %v4348_v25  ;;  %v4361_v10 = vsub.f32 %v1512_v49, %v4348_v25 }
  0x5c   : > { %3385 = vmatprep.mubr.f32.mxu0 %v3912_v32  ;;  %v4232_v32 = vand.u32 4294901760, %v1520_v13 }
  0x5d   : > { %5328 = vst [vmem:[#allocation29_spill] sm:$0xff] %v4346_v18  ;;  %v1831_v37 = vsub.f32 %v4334_v8, %v4346_v18  ;;  %5331 = vst [vmem:[#allocation32_spill] sm:$0xff] %v4361_v10  ;;  %v4374_v3 = vand.u32 4294901760, %v4361_v10 }
  0x5e   : > { %3418 = vmatmul.mubr.f32.vlgmr.msra.gmra.mxu1 %v3915_v34  ;;  %5306 = vst [vmem:[#allocation7_spill] sm:$0xff] %v4232_v32 }
  0x5f   : > { %3386 = vmatmul.mubr.f32.vlgmr.msra.gmra.mxu0 %v3915_v34  ;;  %3420 = vmatprep.mubr.f32.mxu1 %v3917_v35  ;;  %v1519_v34 = vld [vmem:[%s5194_s3 + $0x60] sm:$0xff]  ;;  %v1832_v11 = vand.u32 4294901760, %v1831_v37  ;;  %5334 = vst [vmem:[#allocation35_spill] sm:$0xff] %v4374_v3 }
  0x60   : > { %3388 = vmatprep.mubr.f32.mxu0 %v3917_v35  ;;  %3442 = vmatpush3.msra.mxu0 %v4211_v4  ;;  %v1775_v35 = vsub.f32 %v4217_v7, %v4227_v14  ;;  %v4247_v43 = vand.u32 4294901760, %v1519_v34 }
  0x61   : > { %3443 = vmatprep.subr.mxu0 %v4219_v12 }
  0x62   : > { %3421 = vmatmul.mubr.f32.gmra.mxu1 %v3926_v40  ;;  %3444 = vmatpush3.msra.mxu0 %v4219_v12  ;;  %5309 = vst [vmem:[#allocation10_spill] sm:$0xff] %v4247_v43  ;;  %v4260_v48 = vsub.f32 %v1519_v34, %v4247_v43  ;;  %v1838_v34 = vsub.f32 %v4352_v28, %v4367_v59 }
  0x63   : > { %3389 = vmatmul.mubr.f32.gmra.mxu0 %v3926_v40  ;;  %3423 = vmatprep.mubr.f32.mxu1 %v3937_v45  ;;  %v4245_v40 = vsub.f32 %v1520_v13, %v4232_v32  ;;  %v4379_v13 = vand.u32 4294901760, %v1510_v24 }
  0x64   : > { %3391 = vmatprep.mubr.f32.mxu0 %v3937_v45  ;;  %3445 = vmatprep.subr.mxu0 %v4232_v32  ;;  %v1776_v45 = vand.u32 4294901760, %v1775_v35  ;;  %5311 = vst [vmem:[#allocation12_spill] sm:$0xff] %v4260_v48  ;;  %v4272_v56 = vand.u32 4294901760, %v4260_v48  ;;  %v1509_v35 = vld [vmem:[%s5194_s3 + $0x10] sm:$0xff] }
  0x65   : > { %5308 = vst [vmem:[#allocation9_spill] sm:$0xff] %v4245_v40  ;;  %3446 = vmatpush3.msra.mxu0 %v4232_v32  ;;  %v4257_v47 = vand.u32 4294901760, %v4245_v40  ;;  %5336 = vst [vmem:[#allocation37_spill] sm:$0xff] %v4379_v13 }
  0x66   : > { %3424 = vmatmul.mubr.f32.gmra.mxu1 %v3939_v46  ;;  %3447 = vmatprep.subr.mxu0 %v4247_v43  ;;  %5313 = vst [vmem:[#allocation14_spill] sm:$0xff] %v4272_v56  ;;  %v1796_v2 = vsub.f32 %v4260_v48, %v4272_v56 }
  0x67   : > { %3392 = vmatmul.mubr.f32.gmra.mxu0 %v3939_v46  ;;  %3426 = vmatprep.mubr.f32.mxu1 %v3959_v57  ;;  %v1782_v46 = vsub.f32 %v4230_v15, %v4242_v39  ;;  %5310 = vst [vmem:[#allocation11_spill] sm:$0xff] %v4257_v47  ;;  %v1789_v54 = vsub.f32 %v4245_v40, %v4257_v47 }
  0x68   : > { %3394 = vmatprep.mubr.f32.mxu0 %v3959_v57  ;;  %3448 = vmatpush3.msra.mxu0 %v4247_v43  ;;  %v4274_v57 = vand.u32 4294901760, %v1517_v52 }
  0x69   : > { %3497 = vmatprep.subr.mxu1 %v1776_v45  ;;  %v1783_v53 = vand.u32 4294901760, %v1782_v46  ;;  %3449 = vmatprep.subr.mxu0 %v4263_v51  ;;  %v1790_v62 = vand.u32 4294901760, %v1789_v54  ;;  %v4394_v46 = vsub.f32 %v1510_v24, %v4379_v13 }
  0x6a   : > { %3427 = vmatmul.mubr.f32.gmra.mxu1 %v3961_v58  ;;  %5314 = vst [vmem:[#allocation15_spill] sm:$0xff] %v4274_v57  ;;  %v4286_v6 = vsub.f32 %v1517_v52, %v4274_v57  ;;  %3450 = vmatpush3.msra.mxu0 %v4263_v51  ;;  %v4396_v52 = vand.u32 4294901760, %v1509_v35 }
  0x6b   : > { %3395 = vmatmul.mubr.f32.gmra.mxu0 %v3961_v58  ;;  %3429 = vmatprep.mubr.f32.mxu1 %v3996_v29  ;;  %v4277_v58 = vsub.f32 %v1518_v44, %v4263_v51  ;;  %v1845_v44 = vsub.f32 %v4361_v10, %v4374_v3  ;;  %5338 = vst [vmem:[#allocation39_spill] sm:$0xff] %v4394_v46 }
  0x6c   : > { %3397 = vmatprep.mubr.f32.mxu0 %v3996_v29  ;;  %3498 = vmatpush3.msra.mxu1 %v1776_v45  ;;  %5316 = vst [vmem:[#allocation17_spill] sm:$0xff] %v4286_v6  ;;  %v1515_v29 = vld [vmem:[%s5194_s3 + $0x40] sm:$0xff]  ;;  %v4299_v41 = vand.u32 4294901760, %v4286_v6  ;;  %v4391_v45 = vand.u32 4294901760, %v4377_v5  ;;  %5339 = vst [vmem:[#allocation40_spill] sm:$0xff] %v4396_v52 }
  0x6d   : > { %5315 = vst [vmem:[#allocation16_spill] sm:$0xff] %v4277_v58  ;;  %3499 = vmatprep.subr.mxu1 %v1783_v53  ;;  %v4292_v23 = vand.u32 4294901760, %v4277_v58  ;;  %3451 = vmatprep.subr.mxu0 %v4274_v57  ;;  %v4304_v60 = vand.u32 4294901760, %v1515_v29  ;;  %v1846_v54 = vand.u32 4294901760, %v1845_v44 }
  0x6e   : > { %3430 = vmatmul.mubr.f32.gmra.mxu1 %v4004_v36  ;;  %5319 = vst [vmem:[#allocation20_spill] sm:$0xff] %v4299_v41  ;;  %3452 = vmatpush3.msra.mxu0 %v4274_v57  ;;  %v1810_v1 = vsub.f32 %v4286_v6, %v4299_v41  ;;  %5337 = vst [vmem:[#allocation38_spill] sm:$0xff] %v4391_v45 }
  0x6f   : > { %3398 = vmatmul.mubr.f32.gmra.mxu0 %v4004_v36  ;;  %3432 = vmatprep.mubr.f32.mxu1 %v4012_v42  ;;  %5318 = vst [vmem:[#allocation19_spill] sm:$0xff] %v4292_v23  ;;  %v1797_v36 = vand.u32 4294901760, %v1796_v2  ;;  %5321 = vst [vmem:[#allocation22_spill] sm:$0xff] %v4304_v60  ;;  %v4319_v19 = vsub.f32 %v1515_v29, %v4304_v60  ;;  %v4406_v2 = vsub.f32 %v1509_v35, %v4396_v52  ;;  %v1508_v29 = vld [vmem:[%s5194_s3 + $0x8] sm:$0xff] }
  0x70   : > { %3400 = vmatprep.mubr.f32.mxu0 %v4012_v42  ;;  %3500 = vmatpush3.msra.mxu1 %v1783_v53  ;;  %v4302_v42 = vsub.f32 %v1516_v61, %v4288_v22  ;;  %v1811_v9 = vand.u32 4294901760, %v1810_v1  ;;  %v1839_v53 = vand.u32 4294901760, %v1838_v34  ;;  %v1852_v61 = vsub.f32 %v4377_v5, %v4391_v45 }
  0x71   : > { %3501 = vmatprep.subr.mxu1 %v1790_v62  ;;  %3453 = vmatprep.subr.mxu0 %v4288_v22  ;;  %5323 = vst [vmem:[#allocation24_spill] sm:$0xff] %v4319_v19  ;;  %v4331_v38 = vand.u32 4294901760, %v4319_v19  ;;  %5341 = vst [vmem:[#allocation42_spill] sm:$0xff] %v4406_v2  ;;  %v4418_v1 = vand.u32 4294901760, %v4406_v2 }
  0x72   : > { %3433 = vmatmul.mubr.f32.gmra.mxu1 %v4025_v63  ;;  %5320 = vst [vmem:[#allocation21_spill] sm:$0xff] %v4302_v42  ;;  %3454 = vmatpush3.msra.mxu0 %v4288_v22 }
  0x73   : > { %3401 = vmatmul.mubr.f32.gmra.mxu0 %v4025_v63  ;;  %3435 = vmatprep.mubr.f32.mxu1 %v4032_v16  ;;  %v1803_v63 = vsub.f32 %v4277_v58, %v4292_v23  ;;  %5325 = vst [vmem:[#allocation26_spill] sm:$0xff] %v4331_v38  ;;  %v1824_v17 = vsub.f32 %v4319_v19, %v4331_v38  ;;  %5343 = vst [vmem:[#allocation44_spill] sm:$0xff] %v4418_v1  ;;  %v2933_v58 = vld [vmem:[%s5193_s2] ss:$0 sm:$0xff] }
  0x74   : > { %3403 = vmatprep.mubr.f32.mxu0 %v4032_v16  ;;  %3502 = vmatpush3.msra.mxu1 %v1790_v62  ;;  %v4316_v16 = vand.u32 4294901760, %v4302_v42  ;;  %v4403_v62 = vand.u32 4294901760, %v4394_v46  ;;  %v1866_v49 = vsub.f32 %v4406_v2, %v4418_v1 }
  0x75   : > { %3503 = vmatprep.subr.mxu1 %v1797_v36  ;;  %3455 = vmatprep.subr.mxu0 %v4304_v60  ;;  %v1825_v33 = vand.u32 4294901760, %v1824_v17 }
  0x76   : > { %3436 = vmatmul.mubr.f32.gmra.mxu1 %v4041_v21  ;;  %5322 = vst [vmem:[#allocation23_spill] sm:$0xff] %v4316_v16  ;;  %3456 = vmatpush3.msra.mxu0 %v4304_v60  ;;  %5340 = vst [vmem:[#allocation41_spill] sm:$0xff] %v4403_v62  ;;  %v1859_v0 = vsub.f32 %v4394_v46, %v4403_v62  ;;  %v1867_v30 = vand.u32 4294901760, %v1866_v49 }
  0x77   : > { %3404 = vmatmul.mubr.f32.gmra.mxu0 %v4041_v21  ;;  %3438 = vmatprep.mubr.f32.mxu1 %v4053_v27  ;;  %v1804_v21 = vand.u32 4294901760, %v1803_v63  ;;  %v1853_v63 = vand.u32 4294901760, %v1852_v61 }
  0x78   : > { %3406 = vmatprep.mubr.f32.mxu0 %v4053_v27  ;;  %3504 = vmatpush3.msra.mxu1 %v1797_v36  ;;  %v1817_v27 = vsub.f32 %v4302_v42, %v4316_v16  ;;  %v4412_v36 = vand.u32 4294901760, %v1508_v29 }
  0x79   : > { %3505 = vmatprep.subr.mxu1 %v1804_v21  ;;  %3457 = vmatprep.subr.mxu0 %v4321_v20 }
  0x7a   : > { %3439 = vmatmul.mubr.f32.gmra.mxu1 %v4074_v50  ;;  %3458 = vmatpush3.msra.mxu0 %v4321_v20  ;;  %5342 = vst [vmem:[#allocation43_spill] sm:$0xff] %v4412_v36  ;;  %v4425_v26 = vsub.f32 %v1508_v29, %v4412_v36 }
  0x7b   : > { %3407 = vmatmul.mubr.f32.gmra.mxu0 %v4074_v50  ;;  %3506 = vmatpush3.msra.mxu1 %v1804_v21  ;;  %v1818_v50 = vand.u32 4294901760, %v1817_v27  ;;  %v1507_v21 = vld [vmem:[%s5194_s3] sm:$0xff]  ;;  %v1860_v27 = vand.u32 4294901760, %v1859_v0 }
  0x7c   : > { %3507 = vmatprep.subr.mxu1 %v1811_v9  ;;  %3459 = vmatprep.subr.mxu0 %v4337_v31  ;;  %5344 = vst [vmem:[#allocation45_spill] sm:$0xff] %v4425_v26 }
  0x7d   : > { %3508 = vmatpush3.msra.mxu1 %v1811_v9  ;;  %3460 = vmatpush3.msra.mxu0 %v4337_v31  ;;  %v4427_v9 = vand.u32 4294901760, %v1507_v21 }
  0x7e   : > { %3509 = vmatprep.subr.mxu1 %v1818_v50  ;;  %3461 = vmatprep.subr.mxu0 %v4348_v25 }
  0x7f   : > { %3510 = vmatpush3.msra.mxu1 %v1818_v50  ;;  %3462 = vmatpush3.msra.mxu0 %v4348_v25  ;;  %5345 = vst [vmem:[#allocation46_spill] sm:$0xff] %v4427_v9  ;;  %v4434_v50 = vand.u32 4294901760, %v4425_v26  ;;  %v4437_v17 = vsub.f32 %v1507_v21, %v4427_v9 }
  0x80   : > { %3511 = vmatprep.subr.mxu1 %v1825_v33  ;;  %3463 = vmatprep.subr.mxu0 %v4363_v55 }
  0x81   : > { %3512 = vmatpush3.msra.mxu1 %v1825_v33  ;;  %3464 = vmatpush3.msra.mxu0 %v4363_v55  ;;  %5346 = vst [vmem:[#allocation47_spill] sm:$0xff] %v4434_v50  ;;  %5347 = vst [vmem:[#allocation48_spill] sm:$0xff] %v4437_v17  ;;  %v1873_v33 = vsub.f32 %v4425_v26, %v4434_v50  ;;  %v4444_v37 = vand.u32 4294901760, %v4437_v17 }
  0x82   : > { %3513 = vmatprep.subr.mxu1 %v1832_v11  ;;  %3465 = vmatprep.subr.mxu0 %v4379_v13 }
  0x83   : > { %3514 = vmatpush3.msra.mxu1 %v1832_v11  ;;  %3466 = vmatpush3.msra.mxu0 %v4379_v13  ;;  %5348 = vst [vmem:[#allocation49_spill] sm:$0xff] %v4444_v37  ;;  %v1874_v24 = vand.u32 4294901760, %v1873_v33  ;;  %v1880_v11 = vsub.f32 %v4437_v17, %v4444_v37 }
  0x84   : > { %3515 = vmatprep.subr.mxu1 %v1839_v53  ;;  %3467 = vmatprep.subr.mxu0 %v4396_v52 }
  0x85   : > { %3516 = vmatpush3.msra.mxu1 %v1839_v53  ;;  %3468 = vmatpush3.msra.mxu0 %v4396_v52  ;;  %v1881_v34 = vand.u32 4294901760, %v1880_v11 }
  0x86   : > { %3517 = vmatprep.subr.mxu1 %v1846_v54  ;;  %3469 = vmatprep.subr.mxu0 %v4412_v36 }
  0x87   : > { %3518 = vmatpush3.msra.mxu1 %v1846_v54  ;;  %3470 = vmatpush3.msra.mxu0 %v4412_v36 }
  0x88   : > { %3519 = vmatprep.subr.mxu1 %v1853_v63  ;;  %3471 = vmatprep.subr.mxu0 %v4427_v9 }
  0x89   : > { %3520 = vmatpush3.msra.mxu1 %v1853_v63  ;;  %3472 = vmatpush3.msra.mxu0 %v4427_v9 }
  0x8a   : > { %3521 = vmatprep.subr.mxu1 %v1860_v27  ;;  %3553 = vmatprep.subr.mxu0 %v4217_v7 }
  0x8b   : > { %3522 = vmatpush3.msra.mxu1 %v1860_v27 }
  0x8c   : > { %3523 = vmatprep.subr.mxu1 %v1867_v30 }
  0x8d   : > { %3524 = vmatpush3.msra.mxu1 %v1867_v30 }
  0x8e   : > { %3525 = vmatprep.subr.mxu1 %v1874_v24 }
  0x8f   : > { %3526 = vmatpush3.msra.mxu1 %v1874_v24 }
  0x90   : > { %3527 = vmatprep.subr.mxu1 %v1881_v34 }
  0x91   : > { %3528 = vmatpush3.msra.mxu1 %v1881_v34 }
  0x92   : > { %3609 = vmatprep.subr.mxu1 %v4211_v4 }
  0xde   : > { %v4450_v35 = vpop.f32.mrf.mxu1  ;;  %v3259_v44 = vpop.f32.mrf.mxu0 }
  0xdf   : > { %v431_v40 = vadd.f32 %v3259_v44, %v2933_v58 }
  0xe0   : > { %v4452_v53 = vpop.f32.mrf.mxu1  ;;  %v420_v54 = vpop.f32.mrf.mxu0 }
  0xe1   : > { %v421_v51 = vadd.f32 %v2933_v58, %v420_v54 }
  0xe2   : > { %v4454_v61 = vpop.f32.mrf.mxu1  ;;  %v3262_v29 = vpop.f32.mrf.mxu0 }
  0xe3   : > { %v451_v43 = vadd.f32 %v3262_v29, %v2933_v58 }
  0xe4   : > { %v4456_v63 = vpop.f32.mrf.mxu1  ;;  %v440_v0 = vpop.f32.mrf.mxu0 }
  0xe5   : > { %v441_v32 = vadd.f32 %v2933_v58, %v440_v0  ;;  %v680_v29 = vadd.f32 %v4454_v61, %v451_v43 }
  0xe6   : > { %v4458_v21 = vpop.f32.mrf.mxu1 }
  0xe7   : > { %v3265_v27 = vpop.f32.mrf.mxu0  ;;  %v674_v0 = vadd.f32 %v4456_v63, %v441_v32 }
  0xe8   : > { %v4460_v49 = vpop.f32.mrf.mxu1  ;;  %v471_v12 = vadd.f32 %v3265_v27, %v2933_v58 }
  0xe9   : > { %v460_v30 = vpop.f32.mrf.mxu0 }
  0xea   : > { %v4462_v33 = vpop.f32.mrf.mxu1  ;;  %v692_v27 = vadd.f32 %v4458_v21, %v471_v12 }
  0xeb   : > { %v3268_v24 = vpop.f32.mrf.mxu0 }
  0xec   : > { %v4464_v11 = vpop.f32.mrf.mxu1 }
  0xed   : > { %v480_v34 = vpop.f32.mrf.mxu0 }
  0xee   : > { %v4466_v37 = vpop.f32.mrf.mxu1 }
  0xef   : > { %v3271_v50 = vpop.f32.mrf.mxu0 }
  0xf0   : > { %v4468_v1 = vpop.f32.mrf.mxu1 }
  0xf1   : > { %v500_v62 = vpop.f32.mrf.mxu0 }
  0xf2   : > { %v4470_v45 = vpop.f32.mrf.mxu1 }
  0xf3   : > { %v3274_v3 = vpop.f32.mrf.mxu0 }
  0xf4   : > { %v4472_v59 = vpop.f32.mrf.mxu1 }
  0xf5   : > { %v520_v18 = vpop.f32.mrf.mxu0 }
  0xf6   : > { %v4474_v38 = vpop.f32.mrf.mxu1 }
  0xf7   : > { %v3277_v16 = vpop.f32.mrf.mxu0 }
  0xf8   : > { %v4476_v41 = vpop.f32.mrf.mxu1 }
  0xf9   : > { %v540_v23 = vpop.f32.mrf.mxu0 }
  0xfa   : > { %v4478_v56 = vpop.f32.mrf.mxu1  ;;  %v541_v43 = vadd.f32 %v2933_v58, %v540_v23 }
  0xfb   : > { %v3280_v47 = vpop.f32.mrf.mxu0 }
  0xfc   : > { %v4480_v39 = vpop.f32.mrf.mxu1  ;;  %v571_v32 = vadd.f32 %v3280_v47, %v2933_v58 }
  0xfd   : > { %v4482_v14 = vpop.f32.mrf.mxu0 }
  0xfe   : > { %v3355_v17 = vpop.f32.mrf.mxu1 }
  0xff   : > { %v3323_v26 = vpop.f32.mrf.mxu0 }
 0x100   : > { %v4484_v2 = vpop.f32.mrf.mxu1 }
 0x101   : > { %v831_v46 = vpop.f32.mrf.mxu0 }
 0x102   : > { %v4486_v9 = vpop.f32.mrf.mxu1 }
 0x103   : > { %v3326_v5 = vpop.f32.mrf.mxu0 }
 0x104   : > { %v4488_v36 = vpop.f32.mrf.mxu1  ;;  %v853_v61 = vadd.f32 %v3326_v5, %v680_v29  ;;  %v734_v5 = vadd.f32 %v4476_v41, %v541_v43 }
 0x105   : > { %v845_v10 = vpop.f32.mrf.mxu0 }
 0x106   : > { %v4490_v52 = vpop.f32.mrf.mxu1 }
 0x107   : > { %v3329_v28 = vpop.f32.mrf.mxu0 }
 0x108   : > { %v4492_v13 = vpop.f32.mrf.mxu1 }
 0x109   : > { %v859_v8 = vpop.f32.mrf.mxu0 }
 0x10a   : > { %v4494_v55 = vpop.f32.mrf.mxu1 }
 0x10b   : > { %v3332_v19 = vpop.f32.mrf.mxu0 }
 0x10c   : > { %v4496_v25 = vpop.f32.mrf.mxu1 }
 0x10d   : > { %5349 = vst [vmem:[#allocation50_spill] sm:$0xff] %v4496_v25  ;;  %v4498_v42 = vpop.f32.mrf.mxu0  ;;  %v491_v25 = vadd.f32 %v3268_v24, %v2933_v58 }
 0x10e   : > { %v4500_v31 = vpop.f32.mrf.mxu1 }
 0x10f   : > { %5350 = vst [vmem:[#allocation51_spill] sm:$0xff] %v4500_v31  ;;  %v4502_v6 = vpop.f32.mrf.mxu0  ;;  %v461_v31 = vadd.f32 %v2933_v58, %v460_v30  ;;  %v704_v24 = vadd.f32 %v4462_v33, %v491_v25  ;;  %v561_v25 = vadd.f32 %v2933_v58, %v4482_v14  ;;  %v4552_v14 = vadd.f32 %v4478_v56, %v571_v32 }
 0x110   : > { %v4504_v20 = vpop.f32.mrf.mxu1 }
 0x111   : > { %5351 = vst [vmem:[#allocation52_spill] sm:$0xff] %v4504_v20  ;;  %v4509_v60 = vpop.f32.mrf.mxu0  ;;  %v668_v20 = vadd.f32 %v4450_v35, %v431_v40  ;;  %v501_v40 = vadd.f32 %v2933_v58, %v500_v62  ;;  %v686_v30 = vadd.f32 %v4460_v49, %v461_v31 }
 0x112   : > { %5352 = vst [vmem:[#allocation53_spill] sm:$0xff] %v4509_v60  ;;  %v4511_v48 = vpop.f32.mrf.mxu1 }
 0x113   : > { %5353 = vst [vmem:[#allocation54_spill] sm:$0xff] %v4511_v48  ;;  %v4513_v22 = vpop.f32.mrf.mxu0  ;;  %v839_v54 = vadd.f32 %v3323_v26, %v668_v20  ;;  %v521_v26 = vadd.f32 %v2933_v58, %v520_v18  ;;  %v710_v31 = vadd.f32 %v4468_v1, %v501_v40  ;;  %v860_v23 = vadd.f32 %v859_v8, %v686_v30 }
 0x114   : > { %5354 = vst [vmem:[#allocation55_spill] sm:$0xff] %v4513_v22  ;;  %v4515_v57 = vpop.f32.mrf.mxu1  ;;  %v481_v22 = vadd.f32 %v2933_v58, %v480_v34  ;;  %v531_v34 = vadd.f32 %v3274_v3, %v2933_v58  ;;  %v867_v3 = vadd.f32 %v3329_v28, %v692_v27  ;;  %v881_v1 = vadd.f32 %v3332_v19, %v704_v24  ;;  %v5360_v40 = vld [vmem:[#allocation50_spill] sm:$0xff] }
 0x115   : > { %5355 = vst [vmem:[#allocation56_spill] sm:$0xff] %v4515_v57  ;;  %v4517_v15 = vpop.f32.mrf.mxu0  ;;  %v662_v57 = vadd.f32 %v4452_v53, %v421_v51  ;;  %v1022_v62 = vadd.f32 %v3355_v17, %v839_v54  ;;  %v4556_v8 = vadd.f32 %v4480_v39, %v561_v25  ;;  %v1046_v41 = vadd.f32 %v4492_v13, %v860_v23 }
 0x116   : > { %5356 = vst [vmem:[#allocation57_spill] sm:$0xff] %v4517_v15  ;;  %v4519_v7 = vpop.f32.mrf.mxu1  ;;  %v511_v15 = vadd.f32 %v3271_v50, %v2933_v58  ;;  %v698_v20 = vadd.f32 %v4464_v11, %v481_v22  ;;  %v551_v50 = vadd.f32 %v3277_v16, %v2933_v58  ;;  %v728_v22 = vadd.f32 %v4470_v45, %v531_v34 }
 0x117   : > { %v4521_v4 = vpop.f32.mrf.mxu0  ;;  %v1038_v58 = vadd.f32 %v4486_v9, %v853_v61 }
 0x118   : > { %v4524_v48 = vpop.f32.mrf.mxu1  ;;  %v716_v12 = vadd.f32 %v4466_v37, %v511_v15  ;;  %v722_v15 = vadd.f32 %v4472_v59, %v521_v26  ;;  %v740_v47 = vadd.f32 %v4474_v38, %v551_v50  ;;  %v1054_v59 = vadd.f32 %v4490_v52, %v867_v3 }
 0x119   : > { %5357 = vst [vmem:[#allocation58_spill] sm:$0xff] %v4524_v48  ;;  %v4526_v44 = vpop.f32.mrf.mxu0  ;;  %v832_v48 = vadd.f32 %v831_v46, %v662_v57  ;;  %v846_v57 = vadd.f32 %v845_v10, %v674_v0  ;;  %v874_v38 = vadd.f32 %v4498_v42, %v698_v20  ;;  %v1070_v37 = vadd.f32 %v4494_v55, %v881_v1  ;;  %v5358_v52 = vld [vmem:[#allocation53_spill] sm:$0xff] }
 0x11a   : > { %v4529_v60 = vpop.f32.mrf.mxu1  ;;  %v888_v42 = vadd.f32 %v5358_v52, %v710_v31  ;;  %v923_v55 = vadd.f32 %v4521_v4, %v740_v47  ;;  %v5364_v25 = vld [vmem:[#allocation54_spill] sm:$0xff] }
 0x11b   : > { %v4534_v35 = vpop.f32.mrf.mxu0  ;;  %v1014_v16 = vadd.f32 %v4484_v2, %v832_v48  ;;  %v1030_v45 = vadd.f32 %v4488_v36, %v846_v57  ;;  %v895_v36 = vadd.f32 %v4502_v6, %v716_v12  ;;  %v5359_v49 = vld [vmem:[#allocation55_spill] sm:$0xff]  ;;  %v1062_v30 = vadd.f32 %v5360_v40, %v874_v38 }
 0x11c   : > { %v4538_v51 = vpop.f32.mrf.mxu1  ;;  %v909_v33 = vadd.f32 %v5359_v49, %v728_v22  ;;  %v916_v6 = vadd.f32 %v4526_v44, %v734_v5 }
 0x11d   : > { %v4541_v53 = vpop.f32.mrf.mxu0  ;;  %v5361_v24 = vld [vmem:[#allocation57_spill] sm:$0xff] }
 0x11e   : > { %v3419_v63 = vpop.f32.mrf.mxu1  ;;  %v902_v34 = vadd.f32 %v5361_v24, %v722_v15  ;;  %v4588_v57 = vadd.f32 %v5364_v25, %v909_v33  ;;  %v4602_v15 = vadd.f32 %v4519_v7, %v923_v55  ;;  %v5369_v33 = vld [vmem:[#allocation7_spill] sm:$0xff]  ;;  %v937_v24 = vadd.f32 %v4534_v35, %v4552_v14 }
 0x11f   : > { %v3387_v46 = vpop.f32.mrf.mxu0 }
 0x120   : > { %v1223_v18 = vadd.f32 %v3387_v46, %v1022_v62  ;;  %v1381_v21 = vpop.f32.mrf.mxu1  ;;  %v5362_v62 = vld [vmem:[#allocation51_spill] sm:$0xff] }
 0x121   : > { %v1216_v17 = vpop.f32.mrf.mxu0  ;;  %v1086_v61 = vadd.f32 %v5362_v62, %v895_v36 }
 0x122   : > { %v1388_v28 = vadd.f32 %v3419_v63, %v1223_v18  ;;  %v1217_v10 = vadd.f32 %v1216_v17, %v1014_v16  ;;  %v3422_v48 = vpop.f32.mrf.mxu1  ;;  %v5363_v63 = vld [vmem:[#allocation52_spill] sm:$0xff]  ;;  %v5366_v17 = vld [vmem:[#allocation58_spill] sm:$0xff] }
 0x123   : > { %v3390_v56 = vpop.f32.mrf.mxu0  ;;  %v1078_v31 = vadd.f32 %v5363_v63, %v888_v42  ;;  %v5365_v18 = vld [vmem:[#allocation56_spill] sm:$0xff] }
 0x124   : > { %v1476_v19 = vmax.f32 %v1388_v28, 0.0  ;;  %v1382_v2 = vadd.f32 %v1381_v21, %v1217_v10  ;;  %v1235_v9 = vadd.f32 %v3390_v56, %v1038_v58  ;;  %v1393_v39 = vpop.f32.mrf.mxu1  ;;  %v4599_v21 = vadd.f32 %v5365_v18, %v902_v34 }
 0x125   : > { %v1228_v11 = vpop.f32.mrf.mxu0  ;;  %v4606_v58 = vadd.f32 %v5366_v17, %v916_v6  ;;  %v5371_v17 = vld [vmem:[#allocation3_spill] sm:$0xff] }
 0x126   : > { %1492 = vst [vmem:[%s4565_s27 + $0x8] sm:$0xff] %v1476_v19  ;;  %v4573_v54 = vand.u32 4294901760, %v1476_v19  ;;  %v1475_v29 = vmax.f32 %v1382_v2, 0.0  ;;  %v1400_v0 = vadd.f32 %v3422_v48, %v1235_v9  ;;  %v1229_v13 = vadd.f32 %v1228_v11, %v1030_v45  ;;  %v3425_v27 = vpop.f32.mrf.mxu1  ;;  %v5367_v45 = vld [vmem:[#allocation2_spill] sm:$0xff] }
 0x127   : > { %v3393_v20 = vpop.f32.mrf.mxu0 }
 0x128   : > { %v4580_v26 = vsub.f32 %v1476_v19, %v4573_v54  ;;  %1491 = vst [vmem:[%s4565_s27] sm:$0xff] %v1475_v29  ;;  %v4583_v50 = vand.u32 4294901760, %v1475_v29  ;;  %v1478_v43 = vmax.f32 %v1400_v0, 0.0  ;;  %v1394_v12 = vadd.f32 %v1393_v39, %v1229_v13  ;;  %v1405_v32 = vpop.f32.mrf.mxu1  ;;  %v5368_v19 = vld [vmem:[#allocation4_spill] sm:$0xff] }
 0x129   : > { %v1247_v4 = vadd.f32 %v3393_v20, %v1054_v59  ;;  %v1240_v3 = vpop.f32.mrf.mxu0  ;;  %v5370_v20 = vld [vmem:[#allocation10_spill] sm:$0xff] }
 0x12a   : > { %v1623_v44 = vand.u32 4294901760, %v4580_v26  ;;  %v4592_v46 = vsub.f32 %v1475_v29, %v4583_v50  ;;  %1494 = vst [vmem:[%s4565_s27 + $0x18] sm:$0xff] %v1478_v43  ;;  %v4595_v22 = vand.u32 4294901760, %v1478_v43  ;;  %v1477_v16 = vmax.f32 %v1394_v12, 0.0  ;;  %3529 = vmatprep.mubr.f32.mxu1 %v4583_v50  ;;  %v3428_v23 = vpop.f32.mrf.mxu1 }
 0x12b   : > { %v1412_v47 = vadd.f32 %v3425_v27, %v1247_v4  ;;  %v1241_v5 = vadd.f32 %v1240_v3, %v1046_v41  ;;  %v3396_v1 = vpop.f32.mrf.mxu0  ;;  %3530 = vmatmul.mubr.f32.vlgmr.msra.gmra.mxu1 %v4573_v54 }
 0x12c   : > { %v4609_v28 = vsub.f32 %v1478_v43, %v4595_v22  ;;  %1493 = vst [vmem:[%s4565_s27 + $0x10] sm:$0xff] %v1477_v16  ;;  %v4612_v10 = vand.u32 4294901760, %v1477_v16  ;;  %v1259_v48 = vadd.f32 %v3396_v1, %v1070_v37  ;;  %3610 = vmatpush3.msra.mxu1 %v5367_v45  ;;  %v1417_v7 = vpop.f32.mrf.mxu1  ;;  %v1624_v59 = vsub.f32 %v4580_v26, %v1623_v44 }
 0x12d   : > { %v1480_v38 = vmax.f32 %v1412_v47, 0.0  ;;  %v1406_v56 = vadd.f32 %v1405_v32, %v1241_v5  ;;  %v1252_v41 = vpop.f32.mrf.mxu0  ;;  %3611 = vmatprep.subr.mxu1 %v5368_v19  ;;  %v1613_v2 = vand.u32 4294901760, %v4592_v46  ;;  %v1134_v5 = vadd.f32 %v4529_v60, %v937_v24 }
 0x12e   : > { %v4621_v9 = vsub.f32 %v1477_v16, %v4612_v10  ;;  %v1424_v39 = vadd.f32 %v3428_v23, %v1259_v48  ;;  %v1253_v36 = vadd.f32 %v1252_v41, %v1062_v30  ;;  %3532 = vmatprep.mubr.f32.mxu1 %v4612_v10  ;;  %3612 = vmatpush3.msra.mxu1 %v5368_v19  ;;  %v3431_v37 = vpop.f32.mrf.mxu1  ;;  %v1643_v29 = vand.u32 4294901760, %v4609_v28  ;;  %v5372_v48 = vld [vmem:[#allocation13_spill] sm:$0xff] }
 0x12f   : > { %1496 = vst [vmem:[%s4565_s27 + $0x28] sm:$0xff] %v1480_v38  ;;  %v4626_v52 = vand.u32 4294901760, %v1480_v38  ;;  %v1479_v42 = vmax.f32 %v1406_v56, 0.0  ;;  %v3399_v49 = vpop.f32.mrf.mxu0  ;;  %3533 = vmatmul.mubr.f32.gmra.mxu1 %v4595_v22  ;;  %3613 = vmatprep.subr.mxu1 %v5369_v33  ;;  %v1614_v11 = vsub.f32 %v4592_v46, %v1613_v2  ;;  %v1625_v12 = vand.u32 4294901760, %v1624_v59 }
 0x130   : > { %v1482_v0 = vmax.f32 %v1424_v39, 0.0  ;;  %v1418_v13 = vadd.f32 %v1417_v7, %v1253_v36  ;;  %v1271_v27 = vadd.f32 %v3399_v49, %v1086_v61  ;;  %3614 = vmatpush3.msra.mxu1 %v5369_v33  ;;  %v1429_v40 = vpop.f32.mrf.mxu1  ;;  %v1633_v30 = vand.u32 4294901760, %v4621_v9  ;;  %v5373_v39 = vld [vmem:[#allocation6_spill] sm:$0xff] }
 0x131   : > { %v4639_v34 = vsub.f32 %v1480_v38, %v4626_v52  ;;  %1495 = vst [vmem:[%s4565_s27 + $0x20] sm:$0xff] %v1479_v42  ;;  %v4642_v55 = vand.u32 4294901760, %v1479_v42  ;;  %v1264_v6 = vpop.f32.mrf.mxu0  ;;  %3615 = vmatprep.subr.mxu1 %v5370_v20  ;;  %v1615_v43 = vand.u32 4294901760, %v1614_v11  ;;  %v930_v56 = vadd.f32 %v4541_v53, %v4556_v8  ;;  %v5374_v53 = vld [vmem:[#allocation15_spill] sm:$0xff] }
 0x132   : > { %1498 = vst [vmem:[%s4565_s27 + $0x38] sm:$0xff] %v1482_v0  ;;  %v1481_v32 = vmax.f32 %v1418_v13, 0.0  ;;  %v1436_v62 = vadd.f32 %v3431_v37, %v1271_v27  ;;  %v1265_v61 = vadd.f32 %v1264_v6, %v1078_v31  ;;  %3616 = vmatpush3.msra.mxu1 %v5370_v20  ;;  %v3434_v63 = vpop.f32.mrf.mxu1  ;;  %v4650_v14 = vand.u32 4294901760, %v1482_v0 }
 0x133   : > { %v4648_v35 = vsub.f32 %v1479_v42, %v4642_v55  ;;  %3473 = vmatprep.mubr.f32.mxu0 %v1615_v43  ;;  %3535 = vmatprep.mubr.f32.mxu1 %v4642_v55  ;;  %v3402_v25 = vpop.f32.mrf.mxu0  ;;  %v1634_v4 = vsub.f32 %v4621_v9, %v1633_v30  ;;  %v1644_v31 = vsub.f32 %v4609_v28, %v1643_v29  ;;  %v1663_v47 = vand.u32 4294901760, %v4639_v34  ;;  %v5375_v43 = vld [vmem:[#allocation9_spill] sm:$0xff] }
 0x134   : > { %1497 = vst [vmem:[%s4565_s27 + $0x30] sm:$0xff] %v1481_v32  ;;  %v4660_v3 = vand.u32 4294901760, %v1481_v32  ;;  %v4662_v16 = vmax.f32 %v1436_v62, 0.0  ;;  %v1430_v23 = vadd.f32 %v1429_v40, %v1265_v61  ;;  %3474 = vmatmul.mubr.f32.vlgmr.msra.gmra.mxu0 %v1625_v12  ;;  %3536 = vmatmul.mubr.f32.gmra.mxu1 %v4626_v52  ;;  %v1441_v18 = vpop.f32.mrf.mxu1  ;;  %v1283_v1 = vadd.f32 %v3402_v25, %v4588_v57 }
 0x135   : > { %3554 = vmatpush3.msra.mxu0 %v5371_v17  ;;  %3617 = vmatprep.subr.mxu1 %v5372_v48  ;;  %v1276_v7 = vpop.f32.mrf.mxu0  ;;  %v1635_v59 = vand.u32 4294901760, %v1634_v4  ;;  %v1653_v38 = vand.u32 4294901760, %v4648_v35  ;;  %v4682_v37 = vsub.f32 %v1482_v0, %v4650_v14  ;;  %v1645_v49 = vand.u32 4294901760, %v1644_v31  ;;  %v5376_v4 = vld [vmem:[#allocation18_spill] sm:$0xff] }
 0x136   : > { %v4674_v41 = vsub.f32 %v1481_v32, %v4660_v3  ;;  %1500 = vst [vmem:[%s4565_s27 + $0x48] sm:$0xff] %v4662_v16  ;;  %v1483_v60 = vmax.f32 %v1430_v23, 0.0  ;;  %3555 = vmatprep.subr.mxu0 %v5373_v39  ;;  %3618 = vmatpush3.msra.mxu1 %v5372_v48  ;;  %v1277_v57 = vadd.f32 %v1276_v7, %v4599_v21  ;;  %v3437_v36 = vpop.f32.mrf.mxu1  ;;  %v4698_v24 = vand.u32 4294901760, %v4662_v16  ;;  %v5377_v7 = vld [vmem:[#allocation12_spill] sm:$0xff] }
 0x137   : > { %v1448_v42 = vadd.f32 %v3434_v63, %v1283_v1  ;;  %3556 = vmatpush3.msra.mxu0 %v5373_v39  ;;  %3619 = vmatprep.subr.mxu1 %v5374_v53  ;;  %v3405_v8 = vpop.f32.mrf.mxu0  ;;  %v1654_v11 = vsub.f32 %v4648_v35, %v1653_v38  ;;  %v1664_v40 = vsub.f32 %v4639_v34, %v1663_v47 }
 0x138   : > { %1499 = vst [vmem:[%s4565_s27 + $0x40] sm:$0xff] %v1483_v60  ;;  %v4690_v13 = vand.u32 4294901760, %v1483_v60  ;;  %v1442_v27 = vadd.f32 %v1441_v18, %v1277_v57  ;;  %3476 = vmatprep.mubr.f32.mxu0 %v1635_v59  ;;  %3538 = vmatprep.mubr.f32.mxu1 %v4660_v3  ;;  %v1295_v21 = vadd.f32 %v3405_v8, %v4602_v15  ;;  %v1453_v0 = vpop.f32.mrf.mxu1  ;;  %v1673_v62 = vand.u32 4294901760, %v4674_v41  ;;  %v5378_v57 = vld [vmem:[#allocation22_spill] sm:$0xff] }
 0x139   : > { %v1486_v6 = vmax.f32 %v1448_v42, 0.0  ;;  %3557 = vmatprep.subr.mxu0 %v5375_v43  ;;  %3620 = vmatpush3.msra.mxu1 %v5374_v53  ;;  %v1288_v12 = vpop.f32.mrf.mxu0  ;;  %v1655_v32 = vand.u32 4294901760, %v1654_v11  ;;  %v5300_v18 = vand.u32 4294901760, %v4682_v37  ;;  %v1126_v39 = vadd.f32 %v4538_v51, %v930_v56  ;;  %v5379_v56 = vld [vmem:[#allocation16_spill] sm:$0xff] }
 0x13a   : > { %v4704_v15 = vsub.f32 %v1483_v60, %v4690_v13  ;;  %v1485_v61 = vmax.f32 %v1442_v27, 0.0  ;;  %v1460_v63 = vadd.f32 %v3437_v36, %v1295_v21  ;;  %3477 = vmatmul.mubr.f32.gmra.mxu0 %v1645_v49  ;;  %3539 = vmatmul.mubr.f32.gmra.mxu1 %v4650_v14  ;;  %v1289_v25 = vadd.f32 %v1288_v12, %v4606_v58  ;;  %v3440_v60 = vpop.f32.mrf.mxu1  ;;  %v5380_v12 = vld [vmem:[#allocation25_spill] sm:$0xff] }
 0x13b   : > { %1502 = vst [vmem:[%s4565_s27 + $0x58] sm:$0xff] %v1486_v6  ;;  %3558 = vmatpush3.msra.mxu0 %v5375_v43  ;;  %3621 = vmatprep.subr.mxu1 %v5376_v4  ;;  %v3408_v31 = vpop.f32.mrf.mxu0  ;;  %v1674_v23 = vsub.f32 %v4674_v41, %v1673_v62  ;;  %v1665_v36 = vand.u32 4294901760, %v1664_v40  ;;  %v4727_v8 = vsub.f32 %v4662_v16, %v4698_v24  ;;  %v4738_v27 = vand.u32 4294901760, %v1486_v6 }
 0x13c   : > { %1501 = vst [vmem:[%s4565_s27 + $0x50] sm:$0xff] %v1485_v61  ;;  %v4716_v1 = vand.u32 4294901760, %v1485_v61  ;;  %v4718_v17 = vmax.f32 %v1460_v63, 0.0  ;;  %3559 = vmatprep.subr.mxu0 %v5377_v7  ;;  %3622 = vmatpush3.msra.mxu1 %v5376_v4  ;;  %v1454_v58 = vadd.f32 %v1453_v0, %v1289_v25  ;;  %v1307_v59 = vadd.f32 %v3408_v31, %v1134_v5  ;;  %v1465_v40 = vpop.f32.mrf.mxu1  ;;  %v5381_v25 = vld [vmem:[#allocation17_spill] sm:$0xff] }
 0x13d   : > { %3560 = vmatpush3.msra.mxu0 %v5377_v7  ;;  %3623 = vmatprep.subr.mxu1 %v5378_v57  ;;  %v1300_v42 = vpop.f32.mrf.mxu0  ;;  %v5296_v51 = vand.u32 4294901760, %v4704_v15  ;;  %v1684_v16 = vsub.f32 %v4682_v37, %v5300_v18  ;;  %v1675_v43 = vand.u32 4294901760, %v1674_v23  ;;  %v5295_v31 = vand.u32 4294901760, %v4727_v8  ;;  %v5382_v7 = vld [vmem:[#allocation28_spill] sm:$0xff] }
 0x13e   : > { %1504 = vst [vmem:[%s4565_s27 + $0x68] sm:$0xff] %v4718_v17  ;;  %v1487_v49 = vmax.f32 %v1454_v58, 0.0  ;;  %3479 = vmatprep.mubr.f32.mxu0 %v1655_v32  ;;  %3541 = vmatprep.mubr.f32.mxu1 %v4690_v13  ;;  %v1472_v5 = vadd.f32 %v3440_v60, %v1307_v59  ;;  %v1301_v11 = vadd.f32 %v1300_v42, %v1126_v39  ;;  %v5383_v39 = vld [vmem:[#allocation21_spill] sm:$0xff] }
 0x13f   : > { %3561 = vmatprep.subr.mxu0 %v5379_v56  ;;  %3624 = vmatpush3.msra.mxu1 %v5378_v57  ;;  %v4741_v21 = vsub.f32 %v1485_v61, %v4716_v1  ;;  %v1694_v61 = vsub.f32 %v4704_v15, %v5296_v51  ;;  %v4759_v58 = vsub.f32 %v1486_v6, %v4738_v27  ;;  %v1685_v59 = vand.u32 4294901760, %v1684_v16  ;;  %v5385_v16 = vld [vmem:[#allocation24_spill] sm:$0xff] }
 0x140   : > { %1503 = vst [vmem:[%s4565_s27 + $0x60] sm:$0xff] %v1487_v49  ;;  %v1490_v0 = vmax.f32 %v1472_v5, 0.0  ;;  %3480 = vmatmul.mubr.f32.gmra.mxu0 %v1665_v36  ;;  %3542 = vmatmul.mubr.f32.gmra.mxu1 %v4698_v24  ;;  %v1466_v32 = vadd.f32 %v1465_v40, %v1301_v11  ;;  %v4747_v63 = vand.u32 4294901760, %v1487_v49  ;;  %v4767_v36 = vand.u32 4294901760, %v4718_v17  ;;  %v5391_v51 = vld [vmem:[#allocation32_spill] sm:$0xff] }
 0x141   : > { %3562 = vmatpush3.msra.mxu0 %v5379_v56  ;;  %3625 = vmatprep.subr.mxu1 %v5380_v12  ;;  %v5293_v60 = vand.u32 4294901760, %v4741_v21  ;;  %v1695_v6 = vand.u32 4294901760, %v1694_v61  ;;  %v1704_v5 = vsub.f32 %v4727_v8, %v5295_v31  ;;  %v5384_v56 = vld [vmem:[#allocation30_spill] sm:$0xff]  ;;  %v5294_v40 = vand.u32 4294901760, %v4759_v58 }
 0x142   : > { %1506 = vst [vmem:[%s4565_s27 + $0x78] sm:$0xff] %v1490_v0  ;;  %3563 = vmatprep.subr.mxu0 %v5381_v25  ;;  %3626 = vmatpush3.msra.mxu1 %v5380_v12  ;;  %v1489_v23 = vmax.f32 %v1466_v32, 0.0  ;;  %v4770_v42 = vsub.f32 %v1487_v49, %v4747_v63  ;;  %v4790_v32 = vsub.f32 %v4718_v17, %v4767_v36 }
 0x143   : > { %3564 = vmatpush3.msra.mxu0 %v5381_v25  ;;  %3627 = vmatprep.subr.mxu1 %v5382_v7  ;;  %v1714_v49 = vsub.f32 %v4741_v21, %v5293_v60  ;;  %v1705_v25 = vand.u32 4294901760, %v1704_v5  ;;  %v5388_v5 = vld [vmem:[#allocation37_spill] sm:$0xff]  ;;  %v5389_v60 = vld [vmem:[#allocation31_spill] sm:$0xff] }
 0x144   : > { %3482 = vmatprep.mubr.f32.mxu0 %v1675_v43  ;;  %3544 = vmatprep.mubr.f32.mxu1 %v4716_v1  ;;  %1505 = vst [vmem:[%s4565_s27 + $0x70] sm:$0xff] %v1489_v23  ;;  %v4778_v11 = vand.u32 4294901760, %v1489_v23  ;;  %v5386_v43 = vld [vmem:[#allocation33_spill] sm:$0xff]  ;;  %v5297_v61 = vand.u32 4294901760, %v4770_v42 }
 0x145   : > { %3565 = vmatprep.subr.mxu0 %v5383_v39  ;;  %3628 = vmatpush3.msra.mxu1 %v5382_v7  ;;  %v1715_v17 = vand.u32 4294901760, %v1714_v49  ;;  %v5390_v49 = vld [vmem:[#allocation40_spill] sm:$0xff] }
 0x146   : > { %3483 = vmatmul.mubr.f32.gmra.mxu0 %v1685_v59  ;;  %3545 = vmatmul.mubr.f32.gmra.mxu1 %v4738_v27  ;;  %v5387_v59 = vld [vmem:[#allocation27_spill] sm:$0xff] }
 0x147   : > { %3566 = vmatpush3.msra.mxu0 %v5383_v39  ;;  %3629 = vmatprep.subr.mxu1 %v5384_v56  ;;  %v4796_v39 = vand.u32 4294901760, %v1490_v0 }
 0x148   : > { %3567 = vmatprep.subr.mxu0 %v5385_v16  ;;  %3630 = vmatpush3.msra.mxu1 %v5384_v56 }
 0x149   : > { %3568 = vmatpush3.msra.mxu0 %v5385_v16  ;;  %3631 = vmatprep.subr.mxu1 %v5386_v43  ;;  %v4799_v16 = vsub.f32 %v1489_v23, %v4778_v11  ;;  %v1734_v23 = vsub.f32 %v4770_v42, %v5297_v61 }
 0x14a   : > { %3485 = vmatprep.mubr.f32.mxu0 %v1695_v6  ;;  %3547 = vmatprep.mubr.f32.mxu1 %v4747_v63  ;;  %v1724_v6 = vsub.f32 %v4759_v58, %v5294_v40  ;;  %v4816_v40 = vsub.f32 %v1490_v0, %v4796_v39  ;;  %v5392_v0 = vld [vmem:[#allocation43_spill] sm:$0xff] }
 0x14b   : > { %3569 = vmatprep.subr.mxu0 %v5387_v59  ;;  %3632 = vmatpush3.msra.mxu1 %v5386_v43  ;;  %v5299_v31 = vand.u32 4294901760, %v4799_v16  ;;  %v1735_v61 = vand.u32 4294901760, %v1734_v23  ;;  %v5394_v23 = vld [vmem:[#allocation46_spill] sm:$0xff] }
 0x14c   : > { %3486 = vmatmul.mubr.f32.gmra.mxu0 %v1705_v25  ;;  %3548 = vmatmul.mubr.f32.gmra.mxu1 %v4767_v36  ;;  %v5298_v25 = vand.u32 4294901760, %v4790_v32 }
 0x14d   : > { %3570 = vmatpush3.msra.mxu0 %v5387_v59  ;;  %3633 = vmatprep.subr.mxu1 %v5388_v5  ;;  %v1725_v59 = vand.u32 4294901760, %v1724_v6  ;;  %v1754_v6 = vsub.f32 %v4799_v16, %v5299_v31 }
 0x14e   : > { %3571 = vmatprep.subr.mxu0 %v5389_v60  ;;  %3634 = vmatpush3.msra.mxu1 %v5388_v5 }
 0x14f   : > { %3572 = vmatpush3.msra.mxu0 %v5389_v60  ;;  %3635 = vmatprep.subr.mxu1 %v5390_v49  ;;  %v1744_v60 = vsub.f32 %v4790_v32, %v5298_v25  ;;  %v5395_v25 = vld [vmem:[#allocation39_spill] sm:$0xff]  ;;  %v1755_v31 = vand.u32 4294901760, %v1754_v6 }
 0x150   : > { %3488 = vmatprep.mubr.f32.mxu0 %v1715_v17  ;;  %3550 = vmatprep.mubr.f32.mxu1 %v4778_v11  ;;  %v5393_v17 = vld [vmem:[#allocation36_spill] sm:$0xff] }
 0x151   : > { %3573 = vmatprep.subr.mxu0 %v5391_v51  ;;  %3636 = vmatpush3.msra.mxu1 %v5390_v49 }
 0x152   : > { %3489 = vmatmul.mubr.f32.gmra.mxu0 %v1725_v59  ;;  %3551 = vmatmul.mubr.f32.gmra.mxu1 %v4796_v39  ;;  %v1763_v59 = vand.u32 4294901760, %v4816_v40 }
 0x153   : > { %3574 = vmatpush3.msra.mxu0 %v5391_v51  ;;  %3637 = vmatprep.subr.mxu1 %v5392_v0  ;;  %v1745_v51 = vand.u32 4294901760, %v1744_v60 }
 0x154   : > { %3575 = vmatprep.subr.mxu0 %v5393_v17  ;;  %3638 = vmatpush3.msra.mxu1 %v5392_v0  ;;  %v1764_v18 = vsub.f32 %v4816_v40, %v1763_v59 }
 0x155   : > { %3641 = vmatprep.mubr.f32.mxu1 %v1613_v2  ;;  %3576 = vmatpush3.msra.mxu0 %v5393_v17  ;;  %v5396_v2 = vld [vmem:[#allocation42_spill] sm:$0xff] }
 0x156   : > { %3639 = vmatprep.subr.mxu1 %v5394_v23  ;;  %3491 = vmatprep.mubr.f32.mxu0 %v1735_v61  ;;  %v5397_v61 = vld [vmem:[#allocation45_spill] sm:$0xff] }
 0x157   : > { %3577 = vmatprep.subr.mxu0 %v5395_v25  ;;  %3640 = vmatpush3.msra.mxu1 %v5394_v23 }
 0x158   : > { %3492 = vmatmul.mubr.f32.gmra.mxu0 %v1745_v51  ;;  %3642 = vmatmul.mubr.f32.vlgmr.msra.gmra.mxu1 %v1623_v44  ;;  %v1765_v44 = vand.u32 4294901760, %v1764_v18  ;;  %v5419_v18 = vld [vmem:[#allocation41_spill] sm:$0xff] }
 0x159   : > { %3578 = vmatpush3.msra.mxu0 %v5395_v25  ;;  %3721 = vmatprep.subr.mxu1 %v5367_v45 }
 0x15a   : > { %3579 = vmatprep.subr.mxu0 %v5396_v2  ;;  %3644 = vmatprep.mubr.f32.mxu1 %v1633_v30  ;;  %v5398_v30 = vld [vmem:[#allocation48_spill] sm:$0xff] }
 0x15b   : > { %3722 = vmatpush3.msra.mxu1 %v5367_v45  ;;  %3580 = vmatpush3.msra.mxu0 %v5396_v2  ;;  %v5399_v45 = vld [vmem:[#allocation5_spill] sm:$0xff] }
 0x15c   : > { %3723 = vmatprep.subr.mxu1 %v5368_v19  ;;  %3494 = vmatprep.mubr.f32.mxu0 %v1755_v31 }
 0x15d   : > { %3581 = vmatprep.subr.mxu0 %v5397_v61  ;;  %3724 = vmatpush3.msra.mxu1 %v5368_v19  ;;  %v5402_v19 = vand.u32 4294901760, %v4682_v37 }
 0x15e   : > { %3495 = vmatmul.mubr.f32.gmra.mxu0 %v1765_v44  ;;  %3645 = vmatmul.mubr.f32.gmra.mxu1 %v1643_v29  ;;  %v5406_v29 = vand.u32 4294901760, %v4727_v8 }
 0x15f   : > { %3582 = vmatpush3.msra.mxu0 %v5397_v61  ;;  %3725 = vmatprep.subr.mxu1 %v5369_v33 }
 0x160   : > { %3583 = vmatprep.subr.mxu0 %v5398_v30  ;;  %3585 = vmatprep.mubr.f32.mxu0 %v4592_v46  ;;  %v5400_v46 = vld [vmem:[#allocation8_spill] sm:$0xff] }
 0x161   : > { %3647 = vmatprep.mubr.f32.mxu1 %v1653_v38  ;;  %3726 = vmatpush3.msra.mxu1 %v5369_v33  ;;  %v5404_v33 = vld [vmem:[#allocation14_spill] sm:$0xff] }
 0x162   : > { %3584 = vmatpush3.msra.mxu0 %v5398_v30  ;;  %3727 = vmatprep.subr.mxu1 %v5370_v20  ;;  %v5412_v38 = vld [vmem:[#allocation26_spill] sm:$0xff] }
 0x163   : > { %3665 = vmatprep.subr.mxu0 %v5399_v45  ;;  %3728 = vmatpush3.msra.mxu1 %v5370_v20  ;;  %v5407_v20 = vand.u32 4294901760, %v4741_v21 }
 0x164   : > { %3586 = vmatmul.mubr.f32.vlgmr.msra.gmra.mxu0 %v4580_v26  ;;  %3648 = vmatmul.mubr.f32.gmra.mxu1 %v1663_v47  ;;  %v5401_v26 = vld [vmem:[#allocation11_spill] sm:$0xff]  ;;  %v5410_v47 = vand.u32 4294901760, %v4759_v58 }
 0x165   : > { %3666 = vmatpush3.msra.mxu0 %v5399_v45  ;;  %3729 = vmatprep.subr.mxu1 %v5372_v48 }
 0x166   : > { %3588 = vmatprep.mubr.f32.mxu0 %v4621_v9  ;;  %3650 = vmatprep.mubr.f32.mxu1 %v1673_v62  ;;  %v5403_v9 = vand.u32 4294901760, %v4704_v15  ;;  %v5416_v62 = vld [vmem:[#allocation34_spill] sm:$0xff] }
 0x167   : > { %3667 = vmatprep.subr.mxu0 %v5400_v46  ;;  %3730 = vmatpush3.msra.mxu1 %v5372_v48  ;;  %v5411_v48 = vand.u32 4294901760, %v4770_v42 }
 0x168   : > { %3668 = vmatpush3.msra.mxu0 %v5400_v46  ;;  %3731 = vmatprep.subr.mxu1 %v5374_v53 }
 0x169   : > { %3669 = vmatprep.subr.mxu0 %v5401_v26  ;;  %3732 = vmatpush3.msra.mxu1 %v5374_v53  ;;  %v5415_v53 = vand.u32 4294901760, %v4799_v16 }
 0x16a   : > { %3589 = vmatmul.mubr.f32.gmra.mxu0 %v4609_v28  ;;  %3651 = vmatmul.mubr.f32.gmra.mxu1 %v5402_v19  ;;  %v5405_v28 = vld [vmem:[#allocation19_spill] sm:$0xff] }
 0x16b   : > { %3670 = vmatpush3.msra.mxu0 %v5401_v26  ;;  %3733 = vmatprep.subr.mxu1 %v5376_v4 }
 0x16c   : > { %3591 = vmatprep.mubr.f32.mxu0 %v4648_v35  ;;  %3653 = vmatprep.mubr.f32.mxu1 %v5403_v9  ;;  %v5408_v35 = vld [vmem:[#allocation20_spill] sm:$0xff] }
 0x16d   : > { %3671 = vmatprep.subr.mxu0 %v5404_v33  ;;  %3734 = vmatpush3.msra.mxu1 %v5376_v4  ;;  %v5418_v4 = vld [vmem:[#allocation38_spill] sm:$0xff] }
 0x16e   : > { %3672 = vmatpush3.msra.mxu0 %v5404_v33  ;;  %3735 = vmatprep.subr.mxu1 %v5378_v57 }
 0x16f   : > { %3673 = vmatprep.subr.mxu0 %v5405_v28  ;;  %3736 = vmatpush3.msra.mxu1 %v5378_v57  ;;  %v5420_v57 = vld [vmem:[#allocation44_spill] sm:$0xff] }
 0x170   : > { %3592 = vmatmul.mubr.f32.gmra.mxu0 %v4639_v34  ;;  %3654 = vmatmul.mubr.f32.gmra.mxu1 %v5406_v29  ;;  %v5409_v34 = vld [vmem:[#allocation23_spill] sm:$0xff] }
 0x171   : > { %3674 = vmatpush3.msra.mxu0 %v5405_v28  ;;  %3737 = vmatprep.subr.mxu1 %v5380_v12 }
 0x172   : > { %3594 = vmatprep.mubr.f32.mxu0 %v4674_v41  ;;  %3656 = vmatprep.mubr.f32.mxu1 %v5407_v20  ;;  %v5413_v41 = vld [vmem:[#allocation29_spill] sm:$0xff] }
 0x173   : > { %3675 = vmatprep.subr.mxu0 %v5408_v35  ;;  %3738 = vmatpush3.msra.mxu1 %v5380_v12 }
 0x174   : > { %3676 = vmatpush3.msra.mxu0 %v5408_v35  ;;  %3739 = vmatprep.subr.mxu1 %v5382_v7 }
 0x175   : > { %3677 = vmatprep.subr.mxu0 %v5409_v34  ;;  %3740 = vmatpush3.msra.mxu1 %v5382_v7 }
 0x176   : > { %3595 = vmatmul.mubr.f32.gmra.mxu0 %v4682_v37  ;;  %3657 = vmatmul.mubr.f32.gmra.mxu1 %v5410_v47  ;;  %v5414_v37 = vand.u32 4294901760, %v4790_v32 }
 0x177   : > { %3678 = vmatpush3.msra.mxu0 %v5409_v34  ;;  %3741 = vmatprep.subr.mxu1 %v5384_v56 }
 0x178   : > { %3597 = vmatprep.mubr.f32.mxu0 %v4704_v15  ;;  %3659 = vmatprep.mubr.f32.mxu1 %v5411_v48  ;;  %v5417_v15 = vld [vmem:[#allocation35_spill] sm:$0xff] }
 0x179   : > { %3679 = vmatprep.subr.mxu0 %v5412_v38  ;;  %3742 = vmatpush3.msra.mxu1 %v5384_v56 }
 0x17a   : > { %3680 = vmatpush3.msra.mxu0 %v5412_v38  ;;  %3743 = vmatprep.subr.mxu1 %v5386_v43 }
 0x17b   : > { %3681 = vmatprep.subr.mxu0 %v5413_v41  ;;  %3744 = vmatpush3.msra.mxu1 %v5386_v43 }
 0x17c   : > { %3598 = vmatmul.mubr.f32.gmra.mxu0 %v4727_v8  ;;  %3660 = vmatmul.mubr.f32.gmra.mxu1 %v5414_v37  ;;  %v5421_v8 = vld [vmem:[#allocation47_spill] sm:$0xff] }
 0x17d   : > { %3682 = vmatpush3.msra.mxu0 %v5413_v41  ;;  %3745 = vmatprep.subr.mxu1 %v5388_v5 }
 0x17e   : > { %3600 = vmatprep.mubr.f32.mxu0 %v4741_v21  ;;  %3662 = vmatprep.mubr.f32.mxu1 %v5415_v53  ;;  %v5422_v21 = vld [vmem:[#allocation49_spill] sm:$0xff]  ;;  %v5081_v53 = vld [vmem:[%s5195_s4] ss:$0 sm:$0xff] }
 0x17f   : > { %3683 = vmatprep.subr.mxu0 %v5416_v62  ;;  %3746 = vmatpush3.msra.mxu1 %v5388_v5 }
 0x180   : > { %3684 = vmatpush3.msra.mxu0 %v5416_v62  ;;  %3747 = vmatprep.subr.mxu1 %v5390_v49 }
 0x181   : > { %3685 = vmatprep.subr.mxu0 %v5417_v15  ;;  %3748 = vmatpush3.msra.mxu1 %v5390_v49 }
 0x182   : > { %3601 = vmatmul.mubr.f32.gmra.mxu0 %v4759_v58  ;;  %3663 = vmatmul.mubr.f32.gmra.mxu1 %v1763_v59 }
 0x183   : > { %3686 = vmatpush3.msra.mxu0 %v5417_v15  ;;  %3749 = vmatprep.subr.mxu1 %v5392_v0 }
 0x184   : > { %3603 = vmatprep.mubr.f32.mxu0 %v4770_v42  ;;  %3687 = vmatprep.subr.mxu0 %v5418_v4 }
 0x185   : > { %3750 = vmatpush3.msra.mxu1 %v5392_v0  ;;  %3753 = vmatprep.mubr.f32.mxu1 %v4583_v50 }
 0x186   : > { %3688 = vmatpush3.msra.mxu0 %v5418_v4  ;;  %3751 = vmatprep.subr.mxu1 %v5394_v23 }
 0x187   : > { %3689 = vmatprep.subr.mxu0 %v5419_v18  ;;  %3752 = vmatpush3.msra.mxu1 %v5394_v23 }
 0x188   : > { %3604 = vmatmul.mubr.f32.gmra.mxu0 %v4790_v32  ;;  %3754 = vmatmul.mubr.f32.vlgmr.msra.gmra.mxu1 %v4573_v54 }
 0x189   : > { %3690 = vmatpush3.msra.mxu0 %v5419_v18  ;;  %3606 = vmatprep.mubr.f32.mxu0 %v4799_v16 }
 0x18a   : > { %3691 = vmatprep.subr.mxu0 %v5420_v57  ;;  %3756 = vmatprep.mubr.f32.mxu1 %v4612_v10 }
 0x18b   : > { %3692 = vmatpush3.msra.mxu0 %v5420_v57 }
 0x18c   : > { %3693 = vmatprep.subr.mxu0 %v5421_v8  ;;  %3607 = vmatmul.mubr.f32.gmra.mxu0 %v4816_v40 }
 0x18d   : > { %3694 = vmatpush3.msra.mxu0 %v5421_v8  ;;  %3757 = vmatmul.mubr.f32.gmra.mxu1 %v4595_v22 }
 0x18e   : > { %3695 = vmatprep.subr.mxu0 %v5422_v21  ;;  %3697 = vmatprep.mubr.f32.mxu0 %v4583_v50 }
 0x18f   : > { %3759 = vmatprep.mubr.f32.mxu1 %v4642_v55  ;;  %3696 = vmatpush3.msra.mxu0 %v5422_v21 }
 0x190   : > { %3698 = vmatmul.mubr.f32.vlgmr.msra.gmra.mxu0 %v4573_v54 }
 0x191   : > { %3760 = vmatmul.mubr.f32.gmra.mxu1 %v4626_v52  ;;  %3700 = vmatprep.mubr.f32.mxu0 %v4612_v10 }
 0x192   : > { %3762 = vmatprep.mubr.f32.mxu1 %v4660_v3 }
 0x194   : > { %3701 = vmatmul.mubr.f32.gmra.mxu0 %v4595_v22 }
 0x195   : > { %3763 = vmatmul.mubr.f32.gmra.mxu1 %v4650_v14  ;;  %3703 = vmatprep.mubr.f32.mxu0 %v4642_v55 }
 0x196   : > { %3765 = vmatprep.mubr.f32.mxu1 %v4690_v13 }
 0x198   : > { %3704 = vmatmul.mubr.f32.gmra.mxu0 %v4626_v52 }
 0x199   : > { %3766 = vmatmul.mubr.f32.gmra.mxu1 %v4698_v24  ;;  %3706 = vmatprep.mubr.f32.mxu0 %v4660_v3 }
 0x19a   : > { %3768 = vmatprep.mubr.f32.mxu1 %v4716_v1 }
 0x19c   : > { %3707 = vmatmul.mubr.f32.gmra.mxu0 %v4650_v14 }
 0x19d   : > { %3769 = vmatmul.mubr.f32.gmra.mxu1 %v4738_v27  ;;  %3709 = vmatprep.mubr.f32.mxu0 %v4690_v13 }
 0x19e   : > { %3771 = vmatprep.mubr.f32.mxu1 %v4747_v63 }
 0x1a0   : > { %3710 = vmatmul.mubr.f32.gmra.mxu0 %v4698_v24 }
 0x1a1   : > { %3772 = vmatmul.mubr.f32.gmra.mxu1 %v4767_v36  ;;  %3712 = vmatprep.mubr.f32.mxu0 %v4716_v1 }
 0x1a2   : > { %3774 = vmatprep.mubr.f32.mxu1 %v4778_v11 }
 0x1a4   : > { %3713 = vmatmul.mubr.f32.gmra.mxu0 %v4738_v27 }
 0x1a5   : > { %3775 = vmatmul.mubr.f32.gmra.mxu1 %v4796_v39  ;;  %3715 = vmatprep.mubr.f32.mxu0 %v4747_v63 }
 0x1a8   : > { %3716 = vmatmul.mubr.f32.gmra.mxu0 %v4767_v36 }
 0x1a9   : > { %3718 = vmatprep.mubr.f32.mxu0 %v4778_v11 }
 0x1ac   : > { %3719 = vmatmul.mubr.f32.gmra.mxu0 %v4796_v39 }
 0x1eb   : > { %v4992_v54 = vpop.f32.mrf.mxu1 }
 0x1ed   : > { %v4994_v50 = vpop.f32.mrf.mxu1 }
 0x1ef   : > { %v4996_v22 = vpop.f32.mrf.mxu1 }
 0x1f1   : > { %v4998_v10 = vpop.f32.mrf.mxu1 }
 0x1f4   : > { %v3475_v52 = vpop.f32.mrf.mxu0  ;;  %v5000_v55 = vpop.f32.mrf.mxu1 }
 0x1f5   : > { %v1628_v57 = vadd.f32 %v3475_v52, %v5081_v53 }
 0x1f6   : > { %v1617_v14 = vpop.f32.mrf.mxu0  ;;  %v5002_v3 = vpop.f32.mrf.mxu1 }
 0x1f7   : > { %v1618_v8 = vadd.f32 %v5081_v53, %v1617_v14 }
 0x1fa   : > { %v3478_v13 = vpop.f32.mrf.mxu0  ;;  %v5004_v24 = vpop.f32.mrf.mxu1 }
 0x1fc   : > { %v1637_v1 = vpop.f32.mrf.mxu0  ;;  %v5006_v27 = vpop.f32.mrf.mxu1 }
 0x200   : > { %v3481_v12 = vpop.f32.mrf.mxu0  ;;  %v5008_v63 = vpop.f32.mrf.mxu1 }
 0x201   : > { %v1668_v52 = vadd.f32 %v3481_v12, %v5081_v53 }
 0x202   : > { %v5010_v31 = vpop.f32.mrf.mxu0  ;;  %v5012_v7 = vpop.f32.mrf.mxu1 }
 0x206   : > { %v5014_v58 = vpop.f32.mrf.mxu0  ;;  %v5016_v36 = vpop.f32.mrf.mxu1 }
 0x208   : > { %v5018_v42 = vpop.f32.mrf.mxu0  ;;  %v5020_v56 = vpop.f32.mrf.mxu1 }
 0x20c   : > { %v5022_v11 = vpop.f32.mrf.mxu0  ;;  %v5024_v40 = vpop.f32.mrf.mxu1 }
 0x20e   : > { %v5026_v43 = vpop.f32.mrf.mxu0  ;;  %v5028_v32 = vpop.f32.mrf.mxu1 }
 0x20f   : > { %5423 = vst [vmem:[#allocation53_spill] sm:$0xff] %v5028_v32  ;;  %v1919_v32 = vadd.f32 %v4994_v50, %v1618_v8  ;;  %v1688_v50 = vadd.f32 %v5014_v58, %v5081_v53 }
 0x212   : > { %v5030_v39 = vpop.f32.mrf.mxu0  ;;  %v5032_v16 = vpop.f32.mrf.mxu1 }
 0x213   : > { %5424 = vst [vmem:[#allocation55_spill] sm:$0xff] %v5032_v16 }
 0x214   : > { %v5034_v5 = vpop.f32.mrf.mxu0  ;;  %v5036_v25 = vpop.f32.mrf.mxu1 }
 0x215   : > { %5425 = vst [vmem:[#allocation50_spill] sm:$0xff] %v5036_v25  ;;  %v1925_v25 = vadd.f32 %v4992_v54, %v1628_v57  ;;  %v1658_v54 = vadd.f32 %v5081_v53, %v5010_v31  ;;  %v1678_v31 = vadd.f32 %v5081_v53, %v5018_v42  ;;  %v1961_v42 = vadd.f32 %v5004_v24, %v1688_v50 }
 0x218   : > { %v5038_v49 = vpop.f32.mrf.mxu0  ;;  %v3643_v60 = vpop.f32.mrf.mxu1 }
 0x21a   : > { %v5040_v0 = vpop.f32.mrf.mxu0  ;;  %v2306_v17 = vpop.f32.mrf.mxu1 }
 0x21e   : > { %v5042_v6 = vpop.f32.mrf.mxu0  ;;  %v5044_v59 = vpop.f32.mrf.mxu1 }
 0x220   : > { %v5046_v23 = vpop.f32.mrf.mxu0  ;;  %v5048_v51 = vpop.f32.mrf.mxu1 }
 0x221   : > { %5426 = vst [vmem:[#allocation57_spill] sm:$0xff] %v5046_v23 }
 0x224   : > { %v3587_v2 = vpop.f32.mrf.mxu0  ;;  %v5050_v44 = vpop.f32.mrf.mxu1 }
 0x226   : > { %v2112_v61 = vpop.f32.mrf.mxu0  ;;  %v5052_v30 = vpop.f32.mrf.mxu1 }
 0x227   : > { %v2113_v14 = vadd.f32 %v2112_v61, %v1919_v32  ;;  %v1949_v32 = vadd.f32 %v5000_v55, %v1668_v52 }
 0x22a   : > { %v3590_v45 = vpop.f32.mrf.mxu0  ;;  %v5054_v46 = vpop.f32.mrf.mxu1 }
 0x22c   : > { %v2126_v26 = vpop.f32.mrf.mxu0  ;;  %v5056_v19 = vpop.f32.mrf.mxu1 }
 0x230   : > { %v3593_v9 = vpop.f32.mrf.mxu0  ;;  %v5058_v33 = vpop.f32.mrf.mxu1 }
 0x231   : > { %v2148_v58 = vadd.f32 %v3593_v9, %v1949_v32 }
 0x232   : > { %v2140_v28 = vpop.f32.mrf.mxu0  ;;  %v5060_v29 = vpop.f32.mrf.mxu1 }
 0x236   : > { %v5062_v20 = vpop.f32.mrf.mxu0  ;;  %v5064_v35 = vpop.f32.mrf.mxu1 }
 0x237   : > { %5427 = vst [vmem:[#allocation51_spill] sm:$0xff] %v5064_v35  ;;  %v2120_v35 = vadd.f32 %v3587_v2, %v1925_v25 }
 0x238   : > { %v5066_v34 = vpop.f32.mrf.mxu0  ;;  %v5068_v47 = vpop.f32.mrf.mxu1 }
 0x239   : > { %5428 = vst [vmem:[#allocation52_spill] sm:$0xff] %v5068_v47  ;;  %v2315_v2 = vadd.f32 %v3643_v60, %v2120_v35 }
 0x23c   : > { %v5070_v48 = vpop.f32.mrf.mxu0  ;;  %v5072_v38 = vpop.f32.mrf.mxu1 }
 0x23d   : > { %5429 = vst [vmem:[#allocation54_spill] sm:$0xff] %v5072_v38  ;;  %v1648_v38 = vadd.f32 %v3478_v13, %v5081_v53 }
 0x23e   : > { %v5074_v41 = vpop.f32.mrf.mxu0  ;;  %v5076_v37 = vpop.f32.mrf.mxu1 }
 0x23f   : > { %5430 = vst [vmem:[#allocation56_spill] sm:$0xff] %v5076_v37 }
 0x242   : > { %v5083_v62 = vpop.f32.mrf.mxu0  ;;  %v5085_v15 = vpop.f32.mrf.mxu1 }
 0x243   : > { %5431 = vst [vmem:[#allocation58_spill] sm:$0xff] %v5085_v15  ;;  %v1638_v15 = vadd.f32 %v5081_v53, %v1637_v1 }
 0x244   : > { %v5087_v4 = vpop.f32.mrf.mxu0  ;;  %v5089_v18 = vpop.f32.mrf.mxu1 }
 0x245   : > { %5432 = vst [vmem:[#allocation2_spill] sm:$0xff] %v5089_v18  ;;  %v1931_v1 = vadd.f32 %v4998_v10, %v1638_v15 }
 0x247   : > { %v2127_v12 = vadd.f32 %v2126_v26, %v1931_v1 }
 0x248   : > { %v5093_v21 = vpop.f32.mrf.mxu0  ;;  %v3755_v37 = vpop.f32.mrf.mxu1 }
 0x249   : > { %5433 = vst [vmem:[#allocation4_spill] sm:$0xff] %v5093_v21  ;;  %v1937_v21 = vadd.f32 %v4996_v22, %v1648_v38  ;;  %v2307_v38 = vadd.f32 %v2306_v17, %v2113_v14  ;;  %v1708_v17 = vadd.f32 %v5022_v11, %v5081_v53  ;;  %v2323_v9 = vadd.f32 %v5048_v51, %v2127_v12 }
 0x24a   : > { %v5097_v47 = vpop.f32.mrf.mxu0  ;;  %v2722_v16 = vpop.f32.mrf.mxu1  ;;  %v1955_v14 = vadd.f32 %v5006_v27, %v1678_v31  ;;  %v1748_v12 = vadd.f32 %v5038_v49, %v5081_v53 }
 0x24b   : > { %v2134_v57 = vadd.f32 %v3590_v45, %v1937_v21  ;;  %v1973_v51 = vadd.f32 %v5008_v63, %v1708_v17 }
 0x24c   : > { %v5101_v18 = vpop.f32.mrf.mxu0 }
 0x24d   : > { %v3758_v23 = vpop.f32.mrf.mxu1  ;;  %v2331_v26 = vadd.f32 %v5044_v59, %v2134_v57 }
 0x24e   : > { %v5107_v13 = vpop.f32.mrf.mxu0 }
 0x24f   : > { %5434 = vst [vmem:[#allocation7_spill] sm:$0xff] %v5107_v13  ;;  %v2734_v25 = vpop.f32.mrf.mxu1  ;;  %v1943_v13 = vadd.f32 %v5002_v3, %v1658_v54  ;;  %v2162_v54 = vadd.f32 %v5062_v20, %v1961_v42  ;;  %v5436_v42 = vld [vmem:[#allocation53_spill] sm:$0xff] }
 0x250   : > { %v3699_v8 = vpop.f32.mrf.mxu0 }
 0x251   : > { %v2552_v22 = vadd.f32 %v3699_v8, %v2315_v2  ;;  %v3761_v61 = vpop.f32.mrf.mxu1  ;;  %v2141_v35 = vadd.f32 %v2140_v28, %v1943_v13  ;;  %v1728_v13 = vadd.f32 %v5030_v39, %v5081_v53  ;;  %v1718_v2 = vadd.f32 %v5081_v53, %v5034_v5 }
 0x252   : > { %v2545_v10 = vpop.f32.mrf.mxu0  ;;  %v2176_v39 = vadd.f32 %v5070_v48, %v1973_v51 }
 0x253   : > { %v2729_v60 = vadd.f32 %v3755_v37, %v2552_v22  ;;  %v2546_v45 = vadd.f32 %v2545_v10, %v2307_v38  ;;  %v2746_v55 = vpop.f32.mrf.mxu1  ;;  %v1698_v37 = vadd.f32 %v5081_v53, %v5026_v43  ;;  %v2155_v43 = vadd.f32 %v5066_v34, %v1955_v14 }
 0x254   : > { %v3702_v3 = vpop.f32.mrf.mxu0  ;;  %v1738_v38 = vadd.f32 %v5081_v53, %v5040_v0 }
 0x255   : > { %2817 = vst [vmem:[%s5120_s9 + $0x8] sm:$0xff] %v2729_v60  ;;  %v2723_v15 = vadd.f32 %v2722_v16, %v2546_v45  ;;  %v2564_v21 = vadd.f32 %v3702_v3, %v2331_v26  ;;  %v3764_v52 = vpop.f32.mrf.mxu1  ;;  %v2347_v16 = vadd.f32 %v5050_v44, %v2148_v58  ;;  %v1967_v44 = vadd.f32 %v5012_v7, %v1698_v37  ;;  %v5435_v26 = vld [vmem:[#allocation57_spill] sm:$0xff] }
 0x256   : > { %v2557_v59 = vpop.f32.mrf.mxu0  ;;  %v1768_v58 = vadd.f32 %v5042_v6, %v5081_v53  ;;  %v1997_v60 = vadd.f32 %v5024_v40, %v1748_v12  ;;  %v1758_v17 = vadd.f32 %v5081_v53, %v5435_v26 }
 0x257   : > { %2816 = vst [vmem:[%s5120_s9] sm:$0xff] %v2723_v15  ;;  %v2741_v11 = vadd.f32 %v3758_v23, %v2564_v21  ;;  %v2558_v24 = vadd.f32 %v2557_v59, %v2323_v9  ;;  %v2758_v28 = vpop.f32.mrf.mxu1  ;;  %v2339_v23 = vadd.f32 %v5052_v30, %v2141_v35  ;;  %v1985_v30 = vadd.f32 %v5016_v36, %v1728_v13  ;;  %v5437_v35 = vld [vmem:[#allocation4_spill] sm:$0xff]  ;;  %v5438_v21 = vld [vmem:[#allocation51_spill] sm:$0xff] }
 0x258   : > { %v3705_v57 = vpop.f32.mrf.mxu0  ;;  %v2169_v5 = vadd.f32 %v5074_v41, %v1967_v44  ;;  %v2379_v41 = vadd.f32 %v5058_v33, %v2176_v39  ;;  %v1991_v33 = vadd.f32 %v5436_v42, %v1738_v38  ;;  %v2204_v6 = vadd.f32 %v5437_v35, %v1997_v60 }
 0x259   : > { %2819 = vst [vmem:[%s5120_s9 + $0x18] sm:$0xff] %v2741_v11  ;;  %v2735_v27 = vadd.f32 %v2734_v25, %v2558_v24  ;;  %v2576_v1 = vadd.f32 %v3705_v57, %v2347_v16  ;;  %v3767_v20 = vpop.f32.mrf.mxu1  ;;  %v2363_v25 = vadd.f32 %v5054_v46, %v2162_v54  ;;  %v1979_v46 = vadd.f32 %v5020_v56, %v1718_v2  ;;  %v5440_v54 = vld [vmem:[#allocation52_spill] sm:$0xff]  ;;  %v5441_v24 = vld [vmem:[#allocation50_spill] sm:$0xff] }
 0x25a   : > { %v2569_v50 = vpop.f32.mrf.mxu0  ;;  %v2190_v49 = vadd.f32 %v5083_v62, %v1985_v30  ;;  %v2371_v62 = vadd.f32 %v5060_v29, %v2169_v5  ;;  %v2197_v29 = vadd.f32 %v5097_v47, %v1991_v33  ;;  %v5443_v47 = vld [vmem:[#allocation7_spill] sm:$0xff] }
 0x25b   : > { %2818 = vst [vmem:[%s5120_s9 + $0x10] sm:$0xff] %v2735_v27  ;;  %v2753_v63 = vadd.f32 %v3761_v61, %v2576_v1  ;;  %v2570_v8 = vadd.f32 %v2569_v50, %v2339_v23  ;;  %v2770_v34 = vpop.f32.mrf.mxu1  ;;  %v2355_v61 = vadd.f32 %v5056_v19, %v2155_v43  ;;  %v2183_v0 = vadd.f32 %v5087_v4, %v1979_v46  ;;  %v5442_v43 = vld [vmem:[#allocation54_spill] sm:$0xff]  ;;  %v5444_v50 = vld [vmem:[#allocation56_spill] sm:$0xff] }
 0x25c   : > { %v3708_v32 = vpop.f32.mrf.mxu0  ;;  %v2395_v4 = vadd.f32 %v5438_v21, %v2190_v49  ;;  %v2411_v27 = vadd.f32 %v5442_v43, %v2204_v6  ;;  %v2403_v39 = vadd.f32 %v5444_v50, %v2197_v29 }
 0x25d   : > { %2821 = vst [vmem:[%s5120_s9 + $0x28] sm:$0xff] %v2753_v63  ;;  %v2747_v7 = vadd.f32 %v2746_v55, %v2570_v8  ;;  %v2588_v22 = vadd.f32 %v3708_v32, %v2363_v25  ;;  %v3770_v48 = vpop.f32.mrf.mxu1  ;;  %v2387_v11 = vadd.f32 %v5440_v54, %v2183_v0 }
 0x25e   : > { %v2581_v31 = vpop.f32.mrf.mxu0 }
 0x25f   : > { %2820 = vst [vmem:[%s5120_s9 + $0x20] sm:$0xff] %v2747_v7  ;;  %v2765_v36 = vadd.f32 %v3764_v52, %v2588_v22  ;;  %v2582_v10 = vadd.f32 %v2581_v31, %v2355_v61  ;;  %v2782_v19 = vpop.f32.mrf.mxu1  ;;  %v5439_v52 = vld [vmem:[#allocation55_spill] sm:$0xff]  ;;  %v5446_v7 = vld [vmem:[#allocation2_spill] sm:$0xff] }
 0x260   : > { %v3711_v45 = vpop.f32.mrf.mxu0  ;;  %v2009_v9 = vadd.f32 %v5439_v52, %v1768_v58 }
 0x261   : > { %2823 = vst [vmem:[%s5120_s9 + $0x38] sm:$0xff] %v2765_v36  ;;  %v2759_v56 = vadd.f32 %v2758_v28, %v2582_v10  ;;  %v2600_v55 = vadd.f32 %v3711_v45, %v2379_v41  ;;  %v3773_v37 = vpop.f32.mrf.mxu1  ;;  %v2003_v28 = vadd.f32 %v5441_v24, %v1758_v17 }
 0x262   : > { %v2593_v3 = vpop.f32.mrf.mxu0  ;;  %v2218_v13 = vadd.f32 %v5101_v18, %v2009_v9 }
 0x263   : > { %2822 = vst [vmem:[%s5120_s9 + $0x30] sm:$0xff] %v2759_v56  ;;  %v2777_v40 = vadd.f32 %v3767_v20, %v2600_v55  ;;  %v2594_v15 = vadd.f32 %v2593_v3, %v2371_v62  ;;  %v2794_v1 = vpop.f32.mrf.mxu1  ;;  %v2211_v23 = vadd.f32 %v5443_v47, %v2003_v28 }
 0x264   : > { %v3714_v14 = vpop.f32.mrf.mxu0 }
 0x265   : > { %2825 = vst [vmem:[%s5120_s9 + $0x48] sm:$0xff] %v2777_v40  ;;  %v2771_v53 = vadd.f32 %v2770_v34, %v2594_v15  ;;  %v2612_v59 = vadd.f32 %v3714_v14, %v2395_v4  ;;  %v5445_v34 = vld [vmem:[#allocation58_spill] sm:$0xff]  ;;  %v3776_v12 = vpop.f32.mrf.mxu1  ;;  %v2419_v22 = vadd.f32 %v5446_v7, %v2211_v23 }
 0x266   : > { %v2605_v16 = vpop.f32.mrf.mxu0  ;;  %v2427_v25 = vadd.f32 %v5445_v34, %v2218_v13 }
 0x267   : > { %2824 = vst [vmem:[%s5120_s9 + $0x40] sm:$0xff] %v2771_v53  ;;  %v2789_v51 = vadd.f32 %v3770_v48, %v2612_v59  ;;  %v2606_v57 = vadd.f32 %v2605_v16, %v2387_v11  ;;  %v2806_v46 = vpop.f32.mrf.mxu1 }
 0x268   : > { %v3717_v20 = vpop.f32.mrf.mxu0 }
 0x269   : > { %2827 = vst [vmem:[%s5120_s9 + $0x58] sm:$0xff] %v2789_v51  ;;  %v2783_v2 = vadd.f32 %v2782_v19, %v2606_v57  ;;  %v2624_v44 = vadd.f32 %v3717_v20, %v2411_v27 }
 0x26a   : > { %v2617_v63 = vpop.f32.mrf.mxu0 }
 0x26b   : > { %2826 = vst [vmem:[%s5120_s9 + $0x50] sm:$0xff] %v2783_v2  ;;  %v2801_v18 = vadd.f32 %v3773_v37, %v2624_v44  ;;  %v2618_v8 = vadd.f32 %v2617_v63, %v2403_v39 }
 0x26c   : > { %v3720_v30 = vpop.f32.mrf.mxu0 }
 0x26d   : > { %2829 = vst [vmem:[%s5120_s9 + $0x68] sm:$0xff] %v2801_v18  ;;  %v2795_v32 = vadd.f32 %v2794_v1, %v2618_v8  ;;  %v2636_v5 = vadd.f32 %v3720_v30, %v2427_v25 }
 0x26e   : > { %v2629_v48 = vpop.f32.mrf.mxu0 }
 0x26f   : > { %2828 = vst [vmem:[%s5120_s9 + $0x60] sm:$0xff] %v2795_v32  ;;  %v2813_v61 = vadd.f32 %v3776_v12, %v2636_v5  ;;  %v2630_v38 = vadd.f32 %v2629_v48, %v2419_v22 }
 0x271   : > { %2831 = vst [vmem:[%s5120_s9 + $0x78] sm:$0xff] %v2813_v61  ;;  %v2807_v31 = vadd.f32 %v2806_v46, %v2630_v38 }
 0x273   : > { %2830 = vst [vmem:[%s5120_s9 + $0x70] sm:$0xff] %v2807_v31 }
 0x274 PF: > { %s17_s21 = sadd.s32 1, %s3791_s21  }
 0x275   : > { %p14_p4 = scmp.ge.s32.totalorder %s17_s21, 4  }
 0x277   :  { %16 = sbr.rel (!%p14_p4) target bundleno = 1 (0x1), region = 82 }

</bundles_post_ra>
